<compile_context>
chip_gen: v7x
topology: tpu7x:2x2x1
jax: 0.10.0
libtpu: 0.0.40
codegen_flags: <defaults>
</compile_context>

<pallas_src>
import functools

import jax
import jax.numpy as jnp
from jax import lax
from jax.experimental import pallas as pl
from jax.experimental.pallas import tpu as pltpu


# ----------------------------------------------------------------------------
# Layer 1: ConvTranspose2d(nz, cout, k=4, s=1, p=0) on a 1x1 input.
# out[n, oc, ky, kx] = sum_ic x[n, ic] * W[ic, oc, ky, kx] + b[oc]  -> ReLU
# i.e. a single dense matmul with lane dim = cout*16 (lane-dense output).
# ----------------------------------------------------------------------------
def _head_kernel(x_ref, w_ref, b_ref, o_ref):
    y = jnp.dot(x_ref[...], w_ref[...], preferred_element_type=jnp.float32)
    o_ref[...] = jnp.maximum(y + b_ref[...], 0.0)


def make_head(N, nz, cout):
    F = cout * 16
    return pl.pallas_call(
        _head_kernel,
        out_shape=jax.ShapeDtypeStruct((N, F), jnp.float32),
        grid=(1,),
        in_specs=[
            pl.BlockSpec((N, nz), lambda i: (0, 0)),
            pl.BlockSpec((nz, F), lambda i: (0, 0)),
            pl.BlockSpec((1, F), lambda i: (0, 0)),
        ],
        out_specs=pl.BlockSpec((N, F), lambda i: (0, 0)),
        compiler_params=pltpu.CompilerParams(dimension_semantics=("arbitrary",)),
    )


# ----------------------------------------------------------------------------
# Stride-2 layers: ConvTranspose2d(cin, cout, k=4, s=2, p=1), Hout = 2*Hin.
# Sub-pixel decomposition (derived from y = 2i - 1 + ky):
#   out[oc, 2m+a, 2n+b] = b[oc]
#     + sum_{ic,u,v in {0,1}} xpad[ic, m+a+u, n+b+v] * W[ic, oc, 3-a-2u, 3-b-2v]
# xpad = zero pad (top 1, bottom 2, left 1, right 1) then row-major flatten, so
# every tap is a contiguous lane-slice of the flattened buffer (no reshapes).
# Output is phase-separated (N, 2, 2, cout, Hin*Wp); wrapper interleaves.
# ----------------------------------------------------------------------------
def make_deconv_s2(N, cin, cout, hin, win, act):
    wp = win + 2                 # padded width
    hp = hin + 3                 # padded height (extra bottom row keeps slabs in-bounds)
    L = hin * wp                 # per-phase flattened output length (keeps 2 junk cols/row)
    Lp = hp * wp

    def kernel(x_ref, w_ref, b_ref, o_ref):
        x = x_ref[0]             # (cin, Lp)  spatial-on-lanes
        bias = b_ref[...]        # (cout, 1)  broadcasts along lanes

        # 9 shifted views of the flattened padded input, shared across phases.
        slab = {}
        for r in range(3):
            for c in range(3):
                s = r * wp + c
                slab[(r, c)] = x[:, s:s + L]           # (cin, L)

        for a in range(2):
            for b in range(2):
                acc = None
                for u in range(2):
                    for v in range(2):
                        t = ((a * 2 + b) * 2 + u) * 2 + v
                        p = jnp.dot(w_ref[t], slab[(a + u, b + v)],
                                    preferred_element_type=jnp.float32)
                        acc = p if acc is None else acc + p
                acc = acc + bias
                if act == "tanh":
                    acc = jnp.tanh(acc)
                else:
                    acc = jnp.maximum(acc, 0.0)
                o_ref[0, a, b] = acc

    return pl.pallas_call(
        kernel,
        out_shape=jax.ShapeDtypeStruct((N, 2, 2, cout, L), jnp.float32),
        grid=(N,),
        in_specs=[
            pl.BlockSpec((1, cin, Lp), lambda n: (n, 0, 0)),
            pl.BlockSpec((16, cout, cin), lambda n: (0, 0, 0)),
            pl.BlockSpec((cout, 1), lambda n: (0, 0)),
        ],
        out_specs=pl.BlockSpec((1, 2, 2, cout, L), lambda n: (n, 0, 0, 0, 0)),
        compiler_params=pltpu.CompilerParams(dimension_semantics=("parallel",)),
    )


# ----------------------------------------------------------------------------
# Wrapper-side layout plumbing (tiny tensors; plain XLA ops).
# ----------------------------------------------------------------------------
def pack_phase_weights(w):
    # w: (cin, cout, 4, 4) PyTorch ConvTranspose2d layout -> (16, cout, cin)
    taps = []
    for a in range(2):
        for b in range(2):
            for u in range(2):
                for v in range(2):
                    taps.append(w[:, :, 3 - a - 2 * u, 3 - b - 2 * v].T)
    return jnp.stack(taps, axis=0)


def pad_flatten(x):
    # (N, C, H, W) -> (N, C, (H+3)*(W+2)) zero-padded, row-major flattened.
    n, c, h, w = x.shape
    xp = jnp.pad(x, ((0, 0), (0, 0), (1, 2), (1, 1)))
    return xp.reshape(n, c, (h + 3) * (w + 2))


def unphase(y, win):
    # (N, 2, 2, cout, hin*(win+2)) -> (N, cout, 2*hin, 2*win)
    n, _, _, cout, L = y.shape
    wp = win + 2
    hin = L // wp
    y = y.reshape(n, 2, 2, cout, hin, wp)[..., :win]      # drop junk pad columns
    y = y.transpose(0, 3, 4, 1, 5, 2)                     # (n, cout, hin, a, win, b)
    return y.reshape(n, cout, 2 * hin, 2 * win)


def g_nlayers_pallas(x, params, *, ngf, output_nc):
    # x: (N, nz, 1, 1); params: [(w, b)] in PyTorch ConvTranspose2d layout.
    N, nz = x.shape[0], x.shape[1]
    chans = [ngf * 4, ngf * 3, ngf * 2, ngf, output_nc]
    acts = ["relu", "relu", "relu", "tanh"]

    w0, b0 = params[0]
    head = make_head(N, nz, chans[0])
    h = head(x.reshape(N, nz),
             w0.reshape(nz, chans[0] * 16),
             jnp.repeat(b0, 16).reshape(1, chans[0] * 16))
    h = h.reshape(N, chans[0], 4, 4)

    hin = win = 4
    cin = chans[0]
    for li, (cout, act) in enumerate(zip(chans[1:], acts), start=1):
        w, b = params[li]
        layer = make_deconv_s2(N, cin, cout, hin, win, act)
        y = layer(pad_flatten(h), pack_phase_weights(w), b.reshape(cout, 1))
        h = unphase(y, win)
        hin, win, cin = 2 * hin, 2 * win, cout
    return h


# ----------------------------------------------------------------------------
# Pure-JAX reference of the PyTorch forward pass.
# ----------------------------------------------------------------------------
def conv_transpose_ref(x, w, b, stride, pad):
    # PyTorch ConvTranspose2d == conv(dilate(x, s), flip(W)^T_io, pad = k-1-p)
    k = w.shape[2]
    wf = jnp.flip(w, (2, 3)).transpose(1, 0, 2, 3)        # (cout, cin, kh, kw)
    y = lax.conv_general_dilated(
        x, wf, window_strides=(1, 1),
        padding=[(k - 1 - pad, k - 1 - pad)] * 2,
        lhs_dilation=(stride, stride),
        dimension_numbers=('NCHW', 'OIHW', 'NCHW'),
        precision=lax.Precision.HIGHEST)
    return y + b.reshape(1, -1, 1, 1)


def g_nlayers_ref(x, params):
    h = jax.nn.relu(conv_transpose_ref(x, *params[0], stride=1, pad=0))
    for i in range(1, 4):
        h = jax.nn.relu(conv_transpose_ref(h, *params[i], stride=2, pad=1))
    return jnp.tanh(conv_transpose_ref(h, *params[4], stride=2, pad=1))


if __name__ == "__main__":
    # Small config: G_NLayers(output_nc=3, nz=16, ngf=8, n_layers=3,
    #                         norm_layer=None, nl_layer=ReLU)
    N, nz, ngf, output_nc = 2, 16, 8, 3

    key = jax.random.PRNGKey(0)
    kx, *kws = jax.random.split(key, 11)

    x = jax.random.normal(kx, (N, nz, 1, 1), jnp.float32)

    chans = [nz, ngf * 4, ngf * 3, ngf * 2, ngf, output_nc]
    params = []
    for i in range(5):
        cin, cout = chans[i], chans[i + 1]
        w = jax.random.normal(kws[2 * i], (cin, cout, 4, 4), jnp.float32) * 0.1
        b = jax.random.normal(kws[2 * i + 1], (cout,), jnp.float32) * 0.1
        params.append((w, b))

    fwd = jax.jit(functools.partial(g_nlayers_pallas, ngf=ngf, output_nc=output_nc))
    out = jax.block_until_ready(fwd(x, params))

    ref = g_nlayers_ref(x, params)
    assert out.shape == (N, output_nc, 64, 64), out.shape
    max_err = float(jnp.max(jnp.abs(out - ref)))
    assert max_err < 2e-3, max_err

    print("KERNEL_OK")
</pallas_src>

<mosaic_0001>
module attributes {stable_mosaic.version = 11 : i64} {
  func.func @_head_kernel(%arg0: i32, %arg1: memref<2x16xf32, #tpu.memory_space<vmem>>, %arg2: memref<16x512xf32, #tpu.memory_space<vmem>>, %arg3: memref<1x512xf32, #tpu.memory_space<vmem>>, %arg4: memref<2x512xf32, #tpu.memory_space<vmem>>) attributes {dimension_semantics = [#tpu.dimension_semantics<arbitrary>], iteration_bounds = array<i64: 1>, scalar_prefetch = 0 : i64, scratch_operands = 0 : i64, tpu.core_type = #tpu.core_type<tc>, window_params = [{pipeline_mode = #tpu.pipeline_mode<synchronous>, transform_indices = @transform_0, window_bounds = array<i64: 2, 16>}, {pipeline_mode = #tpu.pipeline_mode<synchronous>, transform_indices = @transform_1, window_bounds = array<i64: 16, 512>}, {pipeline_mode = #tpu.pipeline_mode<synchronous>, transform_indices = @transform_2, window_bounds = array<i64: 1, 512>}, {pipeline_mode = #tpu.pipeline_mode<synchronous>, transform_indices = @transform_3, window_bounds = array<i64: 2, 512>}]} {
    %c0 = arith.constant 0 : index
    %c0_0 = arith.constant 0 : index
    %0 = vector.load %arg1[%c0, %c0_0] : memref<2x16xf32, #tpu.memory_space<vmem>>, vector<2x16xf32>
    %c0_1 = arith.constant 0 : index
    %c0_2 = arith.constant 0 : index
    %1 = vector.load %arg2[%c0_1, %c0_2] : memref<16x512xf32, #tpu.memory_space<vmem>>, vector<16x512xf32>
    %cst = arith.constant dense<0.000000e+00> : vector<2x512xf32>
    %2 = tpu.matmul %0, %1, %cst {dimension_numbers = #tpu.dot_dimension_numbers<[1], [0], [0], [1], [0, 0, 1, 1], [], []>} : vector<2x16xf32>, vector<16x512xf32>, vector<2x512xf32> -> vector<2x512xf32>
    %c0_3 = arith.constant 0 : index
    %c0_4 = arith.constant 0 : index
    %3 = vector.load %arg3[%c0_3, %c0_4] : memref<1x512xf32, #tpu.memory_space<vmem>>, vector<1x512xf32>
    %4 = vector.broadcast %3 : vector<1x512xf32> to vector<2x512xf32>
    %5 = arith.addf %2, %4 : vector<2x512xf32>
    %cst_5 = arith.constant 0.000000e+00 : f32
    %6 = vector.broadcast %cst_5 : f32 to vector<2x512xf32>
    %7 = arith.maximumf %5, %6 : vector<2x512xf32>
    %c0_6 = arith.constant 0 : index
    %c0_7 = arith.constant 0 : index
    %8 = vector.load %arg4[%c0_6, %c0_7] : memref<2x512xf32, #tpu.memory_space<vmem>>, vector<2x512xf32>
    tpu.vector_store %arg4[%c0_6, %c0_7], %7 {strides = array<i32>} : memref<2x512xf32, #tpu.memory_space<vmem>>, vector<2x512xf32>,
    return
  }
  func.func @transform_0(%arg0: i32) -> (i32, i32) {
    %c0_i32 = arith.constant 0 : i32
    %c0_i32_0 = arith.constant 0 : i32
    %c0_i32_1 = arith.constant 0 : i32
    return %c0_i32, %c0_i32_0 : i32, i32
  }
  func.func @transform_1(%arg0: i32) -> (i32, i32) {
    %c0_i32 = arith.constant 0 : i32
    %c0_i32_0 = arith.constant 0 : i32
    %c0_i32_1 = arith.constant 0 : i32
    return %c0_i32, %c0_i32_0 : i32, i32
  }
  func.func @transform_2(%arg0: i32) -> (i32, i32) {
    %c0_i32 = arith.constant 0 : i32
    %c0_i32_0 = arith.constant 0 : i32
    %c0_i32_1 = arith.constant 0 : i32
    return %c0_i32, %c0_i32_0 : i32, i32
  }
  func.func @transform_3(%arg0: i32) -> (i32, i32) {
    %c0_i32 = arith.constant 0 : i32
    %c0_i32_0 = arith.constant 0 : i32
    %c0_i32_1 = arith.constant 0 : i32
    return %c0_i32, %c0_i32_0 : i32, i32
  }
}

module attributes {stable_mosaic.version = 11 : i64} {
  func.func @kernel(%arg0: i32, %arg1: memref<1x32x42xf32, #tpu.memory_space<vmem>>, %arg2: memref<16x24x32xf32, #tpu.memory_space<vmem>>, %arg3: memref<24x1xf32, #tpu.memory_space<vmem>>, %arg4: memref<1x2x2x24x24xf32, #tpu.memory_space<vmem>>) attributes {dimension_semantics = [#tpu.dimension_semantics<parallel>], iteration_bounds = array<i64: 2>, scalar_prefetch = 0 : i64, scratch_operands = 0 : i64, tpu.core_type = #tpu.core_type<tc>, window_params = [{transform_indices = @transform_0, window_bounds = array<i64: 1, 32, 42>}, {pipeline_mode = #tpu.pipeline_mode<synchronous>, transform_indices = @transform_1, window_bounds = array<i64: 16, 24, 32>}, {pipeline_mode = #tpu.pipeline_mode<synchronous>, transform_indices = @transform_2, window_bounds = array<i64: 24, 1>}, {transform_indices = @transform_3, window_bounds = array<i64: 1, 2, 2, 24, 24>}]} {
    %c0 = arith.constant 0 : index
    %c0_0 = arith.constant 0 : index
    %c0_1 = arith.constant 0 : index
    %0 = vector.load %arg1[%c0, %c0_0, %c0_1] : memref<1x32x42xf32, #tpu.memory_space<vmem>>, vector<1x32x42xf32>
    %1 = vector.shape_cast %0 : vector<1x32x42xf32> to vector<32x42xf32>
    %c0_2 = arith.constant 0 : index
    %c0_3 = arith.constant 0 : index
    %2 = vector.load %arg3[%c0_2, %c0_3] : memref<24x1xf32, #tpu.memory_space<vmem>>, vector<24x1xf32>
    %3 = vector.extract_strided_slice %1 {offsets = [0, 0], sizes = [32, 24], strides = [1, 1]} : vector<32x42xf32> to vector<32x24xf32>
    %4 = vector.extract_strided_slice %1 {offsets = [0, 1], sizes = [32, 24], strides = [1, 1]} : vector<32x42xf32> to vector<32x24xf32>
    %5 = vector.extract_strided_slice %1 {offsets = [0, 2], sizes = [32, 24], strides = [1, 1]} : vector<32x42xf32> to vector<32x24xf32>
    %6 = vector.extract_strided_slice %1 {offsets = [0, 6], sizes = [32, 24], strides = [1, 1]} : vector<32x42xf32> to vector<32x24xf32>
    %7 = vector.extract_strided_slice %1 {offsets = [0, 7], sizes = [32, 24], strides = [1, 1]} : vector<32x42xf32> to vector<32x24xf32>
    %8 = vector.extract_strided_slice %1 {offsets = [0, 8], sizes = [32, 24], strides = [1, 1]} : vector<32x42xf32> to vector<32x24xf32>
    %9 = vector.extract_strided_slice %1 {offsets = [0, 12], sizes = [32, 24], strides = [1, 1]} : vector<32x42xf32> to vector<32x24xf32>
    %10 = vector.extract_strided_slice %1 {offsets = [0, 13], sizes = [32, 24], strides = [1, 1]} : vector<32x42xf32> to vector<32x24xf32>
    %11 = vector.extract_strided_slice %1 {offsets = [0, 14], sizes = [32, 24], strides = [1, 1]} : vector<32x42xf32> to vector<32x24xf32>
    %c0_4 = arith.constant 0 : index
    %c0_5 = arith.constant 0 : index
    %c0_6 = arith.constant 0 : index
    %12 = vector.load %arg2[%c0_4, %c0_5, %c0_6] : memref<16x24x32xf32, #tpu.memory_space<vmem>>, vector<1x24x32xf32>
    %13 = vector.shape_cast %12 : vector<1x24x32xf32> to vector<24x32xf32>
    %cst = arith.constant dense<0.000000e+00> : vector<24x24xf32>
    %14 = tpu.matmul %13, %3, %cst {dimension_numbers = #tpu.dot_dimension_numbers<[1], [0], [0], [1], [0, 0, 1, 1], [], []>} : vector<24x32xf32>, vector<32x24xf32>, vector<24x24xf32> -> vector<24x24xf32>
    %c1 = arith.constant 1 : index
    %c0_7 = arith.constant 0 : index
    %c0_8 = arith.constant 0 : index
    %15 = vector.load %arg2[%c1, %c0_7, %c0_8] : memref<16x24x32xf32, #tpu.memory_space<vmem>>, vector<1x24x32xf32>
    %16 = vector.shape_cast %15 : vector<1x24x32xf32> to vector<24x32xf32>
    %cst_9 = arith.constant dense<0.000000e+00> : vector<24x24xf32>
    %17 = tpu.matmul %16, %4, %cst_9 {dimension_numbers = #tpu.dot_dimension_numbers<[1], [0], [0], [1], [0, 0, 1, 1], [], []>} : vector<24x32xf32>, vector<32x24xf32>, vector<24x24xf32> -> vector<24x24xf32>
    %18 = arith.addf %14, %17 : vector<24x24xf32>
    %c2 = arith.constant 2 : index
    %c0_10 = arith.constant 0 : index
    %c0_11 = arith.constant 0 : index
    %19 = vector.load %arg2[%c2, %c0_10, %c0_11] : memref<16x24x32xf32, #tpu.memory_space<vmem>>, vector<1x24x32xf32>
    %20 = vector.shape_cast %19 : vector<1x24x32xf32> to vector<24x32xf32>
    %cst_12 = arith.constant dense<0.000000e+00> : vector<24x24xf32>
    %21 = tpu.matmul %20, %6, %cst_12 {dimension_numbers = #tpu.dot_dimension_numbers<[1], [0], [0], [1], [0, 0, 1, 1], [], []>} : vector<24x32xf32>, vector<32x24xf32>, vector<24x24xf32> -> vector<24x24xf32>
    %22 = arith.addf %18, %21 : vector<24x24xf32>
    %c3 = arith.constant 3 : index
    %c0_13 = arith.constant 0 : index
    %c0_14 = arith.constant 0 : index
    %23 = vector.load %arg2[%c3, %c0_13, %c0_14] : memref<16x24x32xf32, #tpu.memory_space<vmem>>, vector<1x24x32xf32>
    %24 = vector.shape_cast %23 : vector<1x24x32xf32> to vector<24x32xf32>
    %cst_15 = arith.constant dense<0.000000e+00> : vector<24x24xf32>
    %25 = tpu.matmul %24, %7, %cst_15 {dimension_numbers = #tpu.dot_dimension_numbers<[1], [0], [0], [1], [0, 0, 1, 1], [], []>} : vector<24x32xf32>, vector<32x24xf32>, vector<24x24xf32> -> vector<24x24xf32>
    %26 = arith.addf %22, %25 : vector<24x24xf32>
    %27 = vector.broadcast %2 : vector<24x1xf32> to vector<24x24xf32>
    %28 = arith.addf %26, %27 : vector<24x24xf32>
    %cst_16 = arith.constant 0.000000e+00 : f32
    %29 = vector.broadcast %cst_16 : f32 to vector<24x24xf32>
    %30 = arith.maximumf %28, %29 : vector<24x24xf32>
    %c0_17 = arith.constant 0 : index
    %c0_18 = arith.constant 0 : index
    %c0_19 = arith.constant 0 : index
    %c0_20 = arith.constant 0 : index
    %c0_21 = arith.constant 0 : index
    %31 = vector.load %arg4[%c0_17, %c0_18, %c0_19, %c0_20, %c0_21] : memref<1x2x2x24x24xf32, #tpu.memory_space<vmem>>, vector<1x1x1x24x24xf32>
    %32 = vector.shape_cast %31 : vector<1x1x1x24x24xf32> to vector<24x24xf32>
    %33 = vector.shape_cast %30 : vector<24x24xf32> to vector<1x1x1x24x24xf32>
    tpu.vector_store %arg4[%c0_17, %c0_18, %c0_19, %c0_20, %c0_21], %33 {strides = array<i32>} : memref<1x2x2x24x24xf32, #tpu.memory_space<vmem>>, vector<1x1x1x24x24xf32>,
    %c4 = arith.constant 4 : index
    %c0_22 = arith.constant 0 : index
    %c0_23 = arith.constant 0 : index
    %34 = vector.load %arg2[%c4, %c0_22, %c0_23] : memref<16x24x32xf32, #tpu.memory_space<vmem>>, vector<1x24x32xf32>
    %35 = vector.shape_cast %34 : vector<1x24x32xf32> to vector<24x32xf32>
    %cst_24 = arith.constant dense<0.000000e+00> : vector<24x24xf32>
    %36 = tpu.matmul %35, %4, %cst_24 {dimension_numbers = #tpu.dot_dimension_numbers<[1], [0], [0], [1], [0, 0, 1, 1], [], []>} : vector<24x32xf32>, vector<32x24xf32>, vector<24x24xf32> -> vector<24x24xf32>
    %c5 = arith.constant 5 : index
    %c0_25 = arith.constant 0 : index
    %c0_26 = arith.constant 0 : index
    %37 = vector.load %arg2[%c5, %c0_25, %c0_26] : memref<16x24x32xf32, #tpu.memory_space<vmem>>, vector<1x24x32xf32>
    %38 = vector.shape_cast %37 : vector<1x24x32xf32> to vector<24x32xf32>
    %cst_27 = arith.constant dense<0.000000e+00> : vector<24x24xf32>
    %39 = tpu.matmul %38, %5, %cst_27 {dimension_numbers = #tpu.dot_dimension_numbers<[1], [0], [0], [1], [0, 0, 1, 1], [], []>} : vector<24x32xf32>, vector<32x24xf32>, vector<24x24xf32> -> vector<24x24xf32>
    %40 = arith.addf %36, %39 : vector<24x24xf32>
    %c6 = arith.constant 6 : index
    %c0_28 = arith.constant 0 : index
    %c0_29 = arith.constant 0 : index
    %41 = vector.load %arg2[%c6, %c0_28, %c0_29] : memref<16x24x32xf32, #tpu.memory_space<vmem>>, vector<1x24x32xf32>
    %42 = vector.shape_cast %41 : vector<1x24x32xf32> to vector<24x32xf32>
    %cst_30 = arith.constant dense<0.000000e+00> : vector<24x24xf32>
    %43 = tpu.matmul %42, %7, %cst_30 {dimension_numbers = #tpu.dot_dimension_numbers<[1], [0], [0], [1], [0, 0, 1, 1], [], []>} : vector<24x32xf32>, vector<32x24xf32>, vector<24x24xf32> -> vector<24x24xf32>
    %44 = arith.addf %40, %43 : vector<24x24xf32>
    %c7 = arith.constant 7 : index
    %c0_31 = arith.constant 0 : index
    %c0_32 = arith.constant 0 : index
    %45 = vector.load %arg2[%c7, %c0_31, %c0_32] : memref<16x24x32xf32, #tpu.memory_space<vmem>>, vector<1x24x32xf32>
    %46 = vector.shape_cast %45 : vector<1x24x32xf32> to vector<24x32xf32>
    %cst_33 = arith.constant dense<0.000000e+00> : vector<24x24xf32>
    %47 = tpu.matmul %46, %8, %cst_33 {dimension_numbers = #tpu.dot_dimension_numbers<[1], [0], [0], [1], [0, 0, 1, 1], [], []>} : vector<24x32xf32>, vector<32x24xf32>, vector<24x24xf32> -> vector<24x24xf32>
    %48 = arith.addf %44, %47 : vector<24x24xf32>
    %49 = vector.broadcast %2 : vector<24x1xf32> to vector<24x24xf32>
    %50 = arith.addf %48, %49 : vector<24x24xf32>
    %cst_34 = arith.constant 0.000000e+00 : f32
    %51 = vector.broadcast %cst_34 : f32 to vector<24x24xf32>
    %52 = arith.maximumf %50, %51 : vector<24x24xf32>
    %c0_35 = arith.constant 0 : index
    %c0_36 = arith.constant 0 : index
    %c1_37 = arith.constant 1 : index
    %c0_38 = arith.constant 0 : index
    %c0_39 = arith.constant 0 : index
    %53 = vector.load %arg4[%c0_35, %c0_36, %c1_37, %c0_38, %c0_39] : memref<1x2x2x24x24xf32, #tpu.memory_space<vmem>>, vector<1x1x1x24x24xf32>
    %54 = vector.shape_cast %53 : vector<1x1x1x24x24xf32> to vector<24x24xf32>
    %55 = vector.shape_cast %52 : vector<24x24xf32> to vector<1x1x1x24x24xf32>
    tpu.vector_store %arg4[%c0_35, %c0_36, %c1_37, %c0_38, %c0_39], %55 {strides = array<i32>} : memref<1x2x2x24x24xf32, #tpu.memory_space<vmem>>, vector<1x1x1x24x24xf32>,
    %c8 = arith.constant 8 : index
    %c0_40 = arith.constant 0 : index
    %c0_41 = arith.constant 0 : index
    %56 = vector.load %arg2[%c8, %c0_40, %c0_41] : memref<16x24x32xf32, #tpu.memory_space<vmem>>, vector<1x24x32xf32>
    %57 = vector.shape_cast %56 : vector<1x24x32xf32> to vector<24x32xf32>
    %cst_42 = arith.constant dense<0.000000e+00> : vector<24x24xf32>
    %58 = tpu.matmul %57, %6, %cst_42 {dimension_numbers = #tpu.dot_dimension_numbers<[1], [0], [0], [1], [0, 0, 1, 1], [], []>} : vector<24x32xf32>, vector<32x24xf32>, vector<24x24xf32> -> vector<24x24xf32>
    %c9 = arith.constant 9 : index
    %c0_43 = arith.constant 0 : index
    %c0_44 = arith.constant 0 : index
    %59 = vector.load %arg2[%c9, %c0_43, %c0_44] : memref<16x24x32xf32, #tpu.memory_space<vmem>>, vector<1x24x32xf32>
    %60 = vector.shape_cast %59 : vector<1x24x32xf32> to vector<24x32xf32>
    %cst_45 = arith.constant dense<0.000000e+00> : vector<24x24xf32>
    %61 = tpu.matmul %60, %7, %cst_45 {dimension_numbers = #tpu.dot_dimension_numbers<[1], [0], [0], [1], [0, 0, 1, 1], [], []>} : vector<24x32xf32>, vector<32x24xf32>, vector<24x24xf32> -> vector<24x24xf32>
    %62 = arith.addf %58, %61 : vector<24x24xf32>
    %c10 = arith.constant 10 : index
    %c0_46 = arith.constant 0 : index
    %c0_47 = arith.constant 0 : index
    %63 = vector.load %arg2[%c10, %c0_46, %c0_47] : memref<16x24x32xf32, #tpu.memory_space<vmem>>, vector<1x24x32xf32>
    %64 = vector.shape_cast %63 : vector<1x24x32xf32> to vector<24x32xf32>
    %cst_48 = arith.constant dense<0.000000e+00> : vector<24x24xf32>
    %65 = tpu.matmul %64, %9, %cst_48 {dimension_numbers = #tpu.dot_dimension_numbers<[1], [0], [0], [1], [0, 0, 1, 1], [], []>} : vector<24x32xf32>, vector<32x24xf32>, vector<24x24xf32> -> vector<24x24xf32>
    %66 = arith.addf %62, %65 : vector<24x24xf32>
    %c11 = arith.constant 11 : index
    %c0_49 = arith.constant 0 : index
    %c0_50 = arith.constant 0 : index
    %67 = vector.load %arg2[%c11, %c0_49, %c0_50] : memref<16x24x32xf32, #tpu.memory_space<vmem>>, vector<1x24x32xf32>
    %68 = vector.shape_cast %67 : vector<1x24x32xf32> to vector<24x32xf32>
    %cst_51 = arith.constant dense<0.000000e+00> : vector<24x24xf32>
    %69 = tpu.matmul %68, %10, %cst_51 {dimension_numbers = #tpu.dot_dimension_numbers<[1], [0], [0], [1], [0, 0, 1, 1], [], []>} : vector<24x32xf32>, vector<32x24xf32>, vector<24x24xf32> -> vector<24x24xf32>
    %70 = arith.addf %66, %69 : vector<24x24xf32>
    %71 = vector.broadcast %2 : vector<24x1xf32> to vector<24x24xf32>
    %72 = arith.addf %70, %71 : vector<24x24xf32>
    %cst_52 = arith.constant 0.000000e+00 : f32
    %73 = vector.broadcast %cst_52 : f32 to vector<24x24xf32>
    %74 = arith.maximumf %72, %73 : vector<24x24xf32>
    %c0_53 = arith.constant 0 : index
    %c1_54 = arith.constant 1 : index
    %c0_55 = arith.constant 0 : index
    %c0_56 = arith.constant 0 : index
    %c0_57 = arith.constant 0 : index
    %75 = vector.load %arg4[%c0_53, %c1_54, %c0_55, %c0_56, %c0_57] : memref<1x2x2x24x24xf32, #tpu.memory_space<vmem>>, vector<1x1x1x24x24xf32>
    %76 = vector.shape_cast %75 : vector<1x1x1x24x24xf32> to vector<24x24xf32>
    %77 = vector.shape_cast %74 : vector<24x24xf32> to vector<1x1x1x24x24xf32>
    tpu.vector_store %arg4[%c0_53, %c1_54, %c0_55, %c0_56, %c0_57], %77 {strides = array<i32>} : memref<1x2x2x24x24xf32, #tpu.memory_space<vmem>>, vector<1x1x1x24x24xf32>,
    %c12 = arith.constant 12 : index
    %c0_58 = arith.constant 0 : index
    %c0_59 = arith.constant 0 : index
    %78 = vector.load %arg2[%c12, %c0_58, %c0_59] : memref<16x24x32xf32, #tpu.memory_space<vmem>>, vector<1x24x32xf32>
    %79 = vector.shape_cast %78 : vector<1x24x32xf32> to vector<24x32xf32>
    %cst_60 = arith.constant dense<0.000000e+00> : vector<24x24xf32>
    %80 = tpu.matmul %79, %7, %cst_60 {dimension_numbers = #tpu.dot_dimension_numbers<[1], [0], [0], [1], [0, 0, 1, 1], [], []>} : vector<24x32xf32>, vector<32x24xf32>, vector<24x24xf32> -> vector<24x24xf32>
    %c13 = arith.constant 13 : index
    %c0_61 = arith.constant 0 : index
    %c0_62 = arith.constant 0 : index
    %81 = vector.load %arg2[%c13, %c0_61, %c0_62] : memref<16x24x32xf32, #tpu.memory_space<vmem>>, vector<1x24x32xf32>
    %82 = vector.shape_cast %81 : vector<1x24x32xf32> to vector<24x32xf32>
    %cst_63 = arith.constant dense<0.000000e+00> : vector<24x24xf32>
    %83 = tpu.matmul %82, %8, %cst_63 {dimension_numbers = #tpu.dot_dimension_numbers<[1], [0], [0], [1], [0, 0, 1, 1], [], []>} : vector<24x32xf32>, vector<32x24xf32>, vector<24x24xf32> -> vector<24x24xf32>
    %84 = arith.addf %80, %83 : vector<24x24xf32>
    %c14 = arith.constant 14 : index
    %c0_64 = arith.constant 0 : index
    %c0_65 = arith.constant 0 : index
    %85 = vector.load %arg2[%c14, %c0_64, %c0_65] : memref<16x24x32xf32, #tpu.memory_space<vmem>>, vector<1x24x32xf32>
    %86 = vector.shape_cast %85 : vector<1x24x32xf32> to vector<24x32xf32>
    %cst_66 = arith.constant dense<0.000000e+00> : vector<24x24xf32>
    %87 = tpu.matmul %86, %10, %cst_66 {dimension_numbers = #tpu.dot_dimension_numbers<[1], [0], [0], [1], [0, 0, 1, 1], [], []>} : vector<24x32xf32>, vector<32x24xf32>, vector<24x24xf32> -> vector<24x24xf32>
    %88 = arith.addf %84, %87 : vector<24x24xf32>
    %c15 = arith.constant 15 : index
    %c0_67 = arith.constant 0 : index
    %c0_68 = arith.constant 0 : index
    %89 = vector.load %arg2[%c15, %c0_67, %c0_68] : memref<16x24x32xf32, #tpu.memory_space<vmem>>, vector<1x24x32xf32>
    %90 = vector.shape_cast %89 : vector<1x24x32xf32> to vector<24x32xf32>
    %cst_69 = arith.constant dense<0.000000e+00> : vector<24x24xf32>
    %91 = tpu.matmul %90, %11, %cst_69 {dimension_numbers = #tpu.dot_dimension_numbers<[1], [0], [0], [1], [0, 0, 1, 1], [], []>} : vector<24x32xf32>, vector<32x24xf32>, vector<24x24xf32> -> vector<24x24xf32>
    %92 = arith.addf %88, %91 : vector<24x24xf32>
    %93 = vector.broadcast %2 : vector<24x1xf32> to vector<24x24xf32>
    %94 = arith.addf %92, %93 : vector<24x24xf32>
    %cst_70 = arith.constant 0.000000e+00 : f32
    %95 = vector.broadcast %cst_70 : f32 to vector<24x24xf32>
    %96 = arith.maximumf %94, %95 : vector<24x24xf32>
    %c0_71 = arith.constant 0 : index
    %c1_72 = arith.constant 1 : index
    %c1_73 = arith.constant 1 : index
    %c0_74 = arith.constant 0 : index
    %c0_75 = arith.constant 0 : index
    %97 = vector.load %arg4[%c0_71, %c1_72, %c1_73, %c0_74, %c0_75] : memref<1x2x2x24x24xf32, #tpu.memory_space<vmem>>, vector<1x1x1x24x24xf32>
    %98 = vector.shape_cast %97 : vector<1x1x1x24x24xf32> to vector<24x24xf32>
    %99 = vector.shape_cast %96 : vector<24x24xf32> to vector<1x1x1x24x24xf32>
    tpu.vector_store %arg4[%c0_71, %c1_72, %c1_73, %c0_74, %c0_75], %99 {strides = array<i32>} : memref<1x2x2x24x24xf32, #tpu.memory_space<vmem>>, vector<1x1x1x24x24xf32>,
    return
  }
  func.func @transform_0(%arg0: i32) -> (i32, i32, i32) {
    %c0_i32 = arith.constant 0 : i32
    %c0_i32_0 = arith.constant 0 : i32
    %c0_i32_1 = arith.constant 0 : i32
    return %arg0, %c0_i32, %c0_i32_0 : i32, i32, i32
  }
  func.func @transform_1(%arg0: i32) -> (i32, i32, i32) {
    %c0_i32 = arith.constant 0 : i32
    %c0_i32_0 = arith.constant 0 : i32
    %c0_i32_1 = arith.constant 0 : i32
    %c0_i32_2 = arith.constant 0 : i32
    return %c0_i32, %c0_i32_0, %c0_i32_1 : i32, i32, i32
  }
  func.func @transform_2(%arg0: i32) -> (i32, i32) {
    %c0_i32 = arith.constant 0 : i32
    %c0_i32_0 = arith.constant 0 : i32
    %c0_i32_1 = arith.constant 0 : i32
    return %c0_i32, %c0_i32_0 : i32, i32
  }
  func.func @transform_3(%arg0: i32) -> (i32, i32, i32, i32, i32) {
    %c0_i32 = arith.constant 0 : i32
    %c0_i32_0 = arith.constant 0 : i32
    %c0_i32_1 = arith.constant 0 : i32
    %c0_i32_2 = arith.constant 0 : i32
    %c0_i32_3 = arith.constant 0 : i32
    return %arg0, %c0_i32, %c0_i32_0, %c0_i32_1, %c0_i32_2 : i32, i32, i32, i32, i32
  }
}

module attributes {stable_mosaic.version = 11 : i64} {
  func.func @kernel(%arg0: i32, %arg1: memref<1x24x110xf32, #tpu.memory_space<vmem>>, %arg2: memref<16x16x24xf32, #tpu.memory_space<vmem>>, %arg3: memref<16x1xf32, #tpu.memory_space<vmem>>, %arg4: memref<1x2x2x16x80xf32, #tpu.memory_space<vmem>>) attributes {dimension_semantics = [#tpu.dimension_semantics<parallel>], iteration_bounds = array<i64: 2>, scalar_prefetch = 0 : i64, scratch_operands = 0 : i64, tpu.core_type = #tpu.core_type<tc>, window_params = [{transform_indices = @transform_0, window_bounds = array<i64: 1, 24, 110>}, {pipeline_mode = #tpu.pipeline_mode<synchronous>, transform_indices = @transform_1, window_bounds = array<i64: 16, 16, 24>}, {pipeline_mode = #tpu.pipeline_mode<synchronous>, transform_indices = @transform_2, window_bounds = array<i64: 16, 1>}, {transform_indices = @transform_3, window_bounds = array<i64: 1, 2, 2, 16, 80>}]} {
    %c0 = arith.constant 0 : index
    %c0_0 = arith.constant 0 : index
    %c0_1 = arith.constant 0 : index
    %0 = vector.load %arg1[%c0, %c0_0, %c0_1] : memref<1x24x110xf32, #tpu.memory_space<vmem>>, vector<1x24x110xf32>
    %1 = vector.shape_cast %0 : vector<1x24x110xf32> to vector<24x110xf32>
    %c0_2 = arith.constant 0 : index
    %c0_3 = arith.constant 0 : index
    %2 = vector.load %arg3[%c0_2, %c0_3] : memref<16x1xf32, #tpu.memory_space<vmem>>, vector<16x1xf32>
    %3 = vector.extract_strided_slice %1 {offsets = [0, 0], sizes = [24, 80], strides = [1, 1]} : vector<24x110xf32> to vector<24x80xf32>
    %4 = vector.extract_strided_slice %1 {offsets = [0, 1], sizes = [24, 80], strides = [1, 1]} : vector<24x110xf32> to vector<24x80xf32>
    %5 = vector.extract_strided_slice %1 {offsets = [0, 2], sizes = [24, 80], strides = [1, 1]} : vector<24x110xf32> to vector<24x80xf32>
    %6 = vector.extract_strided_slice %1 {offsets = [0, 10], sizes = [24, 80], strides = [1, 1]} : vector<24x110xf32> to vector<24x80xf32>
    %7 = vector.extract_strided_slice %1 {offsets = [0, 11], sizes = [24, 80], strides = [1, 1]} : vector<24x110xf32> to vector<24x80xf32>
    %8 = vector.extract_strided_slice %1 {offsets = [0, 12], sizes = [24, 80], strides = [1, 1]} : vector<24x110xf32> to vector<24x80xf32>
    %9 = vector.extract_strided_slice %1 {offsets = [0, 20], sizes = [24, 80], strides = [1, 1]} : vector<24x110xf32> to vector<24x80xf32>
    %10 = vector.extract_strided_slice %1 {offsets = [0, 21], sizes = [24, 80], strides = [1, 1]} : vector<24x110xf32> to vector<24x80xf32>
    %11 = vector.extract_strided_slice %1 {offsets = [0, 22], sizes = [24, 80], strides = [1, 1]} : vector<24x110xf32> to vector<24x80xf32>
    %c0_4 = arith.constant 0 : index
    %c0_5 = arith.constant 0 : index
    %c0_6 = arith.constant 0 : index
    %12 = vector.load %arg2[%c0_4, %c0_5, %c0_6] : memref<16x16x24xf32, #tpu.memory_space<vmem>>, vector<1x16x24xf32>
    %13 = vector.shape_cast %12 : vector<1x16x24xf32> to vector<16x24xf32>
    %cst = arith.constant dense<0.000000e+00> : vector<16x80xf32>
    %14 = tpu.matmul %13, %3, %cst {dimension_numbers = #tpu.dot_dimension_numbers<[1], [0], [0], [1], [0, 0, 1, 1], [], []>} : vector<16x24xf32>, vector<24x80xf32>, vector<16x80xf32> -> vector<16x80xf32>
    %c1 = arith.constant 1 : index
    %c0_7 = arith.constant 0 : index
    %c0_8 = arith.constant 0 : index
    %15 = vector.load %arg2[%c1, %c0_7, %c0_8] : memref<16x16x24xf32, #tpu.memory_space<vmem>>, vector<1x16x24xf32>
    %16 = vector.shape_cast %15 : vector<1x16x24xf32> to vector<16x24xf32>
    %cst_9 = arith.constant dense<0.000000e+00> : vector<16x80xf32>
    %17 = tpu.matmul %16, %4, %cst_9 {dimension_numbers = #tpu.dot_dimension_numbers<[1], [0], [0], [1], [0, 0, 1, 1], [], []>} : vector<16x24xf32>, vector<24x80xf32>, vector<16x80xf32> -> vector<16x80xf32>
    %18 = arith.addf %14, %17 : vector<16x80xf32>
    %c2 = arith.constant 2 : index
    %c0_10 = arith.constant 0 : index
    %c0_11 = arith.constant 0 : index
    %19 = vector.load %arg2[%c2, %c0_10, %c0_11] : memref<16x16x24xf32, #tpu.memory_space<vmem>>, vector<1x16x24xf32>
    %20 = vector.shape_cast %19 : vector<1x16x24xf32> to vector<16x24xf32>
    %cst_12 = arith.constant dense<0.000000e+00> : vector<16x80xf32>
    %21 = tpu.matmul %20, %6, %cst_12 {dimension_numbers = #tpu.dot_dimension_numbers<[1], [0], [0], [1], [0, 0, 1, 1], [], []>} : vector<16x24xf32>, vector<24x80xf32>, vector<16x80xf32> -> vector<16x80xf32>
    %22 = arith.addf %18, %21 : vector<16x80xf32>
    %c3 = arith.constant 3 : index
    %c0_13 = arith.constant 0 : index
    %c0_14 = arith.constant 0 : index
    %23 = vector.load %arg2[%c3, %c0_13, %c0_14] : memref<16x16x24xf32, #tpu.memory_space<vmem>>, vector<1x16x24xf32>
    %24 = vector.shape_cast %23 : vector<1x16x24xf32> to vector<16x24xf32>
    %cst_15 = arith.constant dense<0.000000e+00> : vector<16x80xf32>
    %25 = tpu.matmul %24, %7, %cst_15 {dimension_numbers = #tpu.dot_dimension_numbers<[1], [0], [0], [1], [0, 0, 1, 1], [], []>} : vector<16x24xf32>, vector<24x80xf32>, vector<16x80xf32> -> vector<16x80xf32>
    %26 = arith.addf %22, %25 : vector<16x80xf32>
    %27 = vector.broadcast %2 : vector<16x1xf32> to vector<16x80xf32>
    %28 = arith.addf %26, %27 : vector<16x80xf32>
    %cst_16 = arith.constant 0.000000e+00 : f32
    %29 = vector.broadcast %cst_16 : f32 to vector<16x80xf32>
    %30 = arith.maximumf %28, %29 : vector<16x80xf32>
    %c0_17 = arith.constant 0 : index
    %c0_18 = arith.constant 0 : index
    %c0_19 = arith.constant 0 : index
    %c0_20 = arith.constant 0 : index
    %c0_21 = arith.constant 0 : index
    %31 = vector.load %arg4[%c0_17, %c0_18, %c0_19, %c0_20, %c0_21] : memref<1x2x2x16x80xf32, #tpu.memory_space<vmem>>, vector<1x1x1x16x80xf32>
    %32 = vector.shape_cast %31 : vector<1x1x1x16x80xf32> to vector<16x80xf32>
    %33 = vector.shape_cast %30 : vector<16x80xf32> to vector<1x1x1x16x80xf32>
    tpu.vector_store %arg4[%c0_17, %c0_18, %c0_19, %c0_20, %c0_21], %33 {strides = array<i32>} : memref<1x2x2x16x80xf32, #tpu.memory_space<vmem>>, vector<1x1x1x16x80xf32>,
    %c4 = arith.constant 4 : index
    %c0_22 = arith.constant 0 : index
    %c0_23 = arith.constant 0 : index
    %34 = vector.load %arg2[%c4, %c0_22, %c0_23] : memref<16x16x24xf32, #tpu.memory_space<vmem>>, vector<1x16x24xf32>
    %35 = vector.shape_cast %34 : vector<1x16x24xf32> to vector<16x24xf32>
    %cst_24 = arith.constant dense<0.000000e+00> : vector<16x80xf32>
    %36 = tpu.matmul %35, %4, %cst_24 {dimension_numbers = #tpu.dot_dimension_numbers<[1], [0], [0], [1], [0, 0, 1, 1], [], []>} : vector<16x24xf32>, vector<24x80xf32>, vector<16x80xf32> -> vector<16x80xf32>
    %c5 = arith.constant 5 : index
    %c0_25 = arith.constant 0 : index
    %c0_26 = arith.constant 0 : index
    %37 = vector.load %arg2[%c5, %c0_25, %c0_26] : memref<16x16x24xf32, #tpu.memory_space<vmem>>, vector<1x16x24xf32>
    %38 = vector.shape_cast %37 : vector<1x16x24xf32> to vector<16x24xf32>
    %cst_27 = arith.constant dense<0.000000e+00> : vector<16x80xf32>
    %39 = tpu.matmul %38, %5, %cst_27 {dimension_numbers = #tpu.dot_dimension_numbers<[1], [0], [0], [1], [0, 0, 1, 1], [], []>} : vector<16x24xf32>, vector<24x80xf32>, vector<16x80xf32> -> vector<16x80xf32>
    %40 = arith.addf %36, %39 : vector<16x80xf32>
    %c6 = arith.constant 6 : index
    %c0_28 = arith.constant 0 : index
    %c0_29 = arith.constant 0 : index
    %41 = vector.load %arg2[%c6, %c0_28, %c0_29] : memref<16x16x24xf32, #tpu.memory_space<vmem>>, vector<1x16x24xf32>
    %42 = vector.shape_cast %41 : vector<1x16x24xf32> to vector<16x24xf32>
    %cst_30 = arith.constant dense<0.000000e+00> : vector<16x80xf32>
    %43 = tpu.matmul %42, %7, %cst_30 {dimension_numbers = #tpu.dot_dimension_numbers<[1], [0], [0], [1], [0, 0, 1, 1], [], []>} : vector<16x24xf32>, vector<24x80xf32>, vector<16x80xf32> -> vector<16x80xf32>
    %44 = arith.addf %40, %43 : vector<16x80xf32>
    %c7 = arith.constant 7 : index
    %c0_31 = arith.constant 0 : index
    %c0_32 = arith.constant 0 : index
    %45 = vector.load %arg2[%c7, %c0_31, %c0_32] : memref<16x16x24xf32, #tpu.memory_space<vmem>>, vector<1x16x24xf32>
    %46 = vector.shape_cast %45 : vector<1x16x24xf32> to vector<16x24xf32>
    %cst_33 = arith.constant dense<0.000000e+00> : vector<16x80xf32>
    %47 = tpu.matmul %46, %8, %cst_33 {dimension_numbers = #tpu.dot_dimension_numbers<[1], [0], [0], [1], [0, 0, 1, 1], [], []>} : vector<16x24xf32>, vector<24x80xf32>, vector<16x80xf32> -> vector<16x80xf32>
    %48 = arith.addf %44, %47 : vector<16x80xf32>
    %49 = vector.broadcast %2 : vector<16x1xf32> to vector<16x80xf32>
    %50 = arith.addf %48, %49 : vector<16x80xf32>
    %cst_34 = arith.constant 0.000000e+00 : f32
    %51 = vector.broadcast %cst_34 : f32 to vector<16x80xf32>
    %52 = arith.maximumf %50, %51 : vector<16x80xf32>
    %c0_35 = arith.constant 0 : index
    %c0_36 = arith.constant 0 : index
    %c1_37 = arith.constant 1 : index
    %c0_38 = arith.constant 0 : index
    %c0_39 = arith.constant 0 : index
    %53 = vector.load %arg4[%c0_35, %c0_36, %c1_37, %c0_38, %c0_39] : memref<1x2x2x16x80xf32, #tpu.memory_space<vmem>>, vector<1x1x1x16x80xf32>
    %54 = vector.shape_cast %53 : vector<1x1x1x16x80xf32> to vector<16x80xf32>
    %55 = vector.shape_cast %52 : vector<16x80xf32> to vector<1x1x1x16x80xf32>
    tpu.vector_store %arg4[%c0_35, %c0_36, %c1_37, %c0_38, %c0_39], %55 {strides = array<i32>} : memref<1x2x2x16x80xf32, #tpu.memory_space<vmem>>, vector<1x1x1x16x80xf32>,
    %c8 = arith.constant 8 : index
    %c0_40 = arith.constant 0 : index
    %c0_41 = arith.constant 0 : index
    %56 = vector.load %arg2[%c8, %c0_40, %c0_41] : memref<16x16x24xf32, #tpu.memory_space<vmem>>, vector<1x16x24xf32>
    %57 = vector.shape_cast %56 : vector<1x16x24xf32> to vector<16x24xf32>
    %cst_42 = arith.constant dense<0.000000e+00> : vector<16x80xf32>
    %58 = tpu.matmul %57, %6, %cst_42 {dimension_numbers = #tpu.dot_dimension_numbers<[1], [0], [0], [1], [0, 0, 1, 1], [], []>} : vector<16x24xf32>, vector<24x80xf32>, vector<16x80xf32> -> vector<16x80xf32>
    %c9 = arith.constant 9 : index
    %c0_43 = arith.constant 0 : index
    %c0_44 = arith.constant 0 : index
    %59 = vector.load %arg2[%c9, %c0_43, %c0_44] : memref<16x16x24xf32, #tpu.memory_space<vmem>>, vector<1x16x24xf32>
    %60 = vector.shape_cast %59 : vector<1x16x24xf32> to vector<16x24xf32>
    %cst_45 = arith.constant dense<0.000000e+00> : vector<16x80xf32>
    %61 = tpu.matmul %60, %7, %cst_45 {dimension_numbers = #tpu.dot_dimension_numbers<[1], [0], [0], [1], [0, 0, 1, 1], [], []>} : vector<16x24xf32>, vector<24x80xf32>, vector<16x80xf32> -> vector<16x80xf32>
    %62 = arith.addf %58, %61 : vector<16x80xf32>
    %c10 = arith.constant 10 : index
    %c0_46 = arith.constant 0 : index
    %c0_47 = arith.constant 0 : index
    %63 = vector.load %arg2[%c10, %c0_46, %c0_47] : memref<16x16x24xf32, #tpu.memory_space<vmem>>, vector<1x16x24xf32>
    %64 = vector.shape_cast %63 : vector<1x16x24xf32> to vector<16x24xf32>
    %cst_48 = arith.constant dense<0.000000e+00> : vector<16x80xf32>
    %65 = tpu.matmul %64, %9, %cst_48 {dimension_numbers = #tpu.dot_dimension_numbers<[1], [0], [0], [1], [0, 0, 1, 1], [], []>} : vector<16x24xf32>, vector<24x80xf32>, vector<16x80xf32> -> vector<16x80xf32>
    %66 = arith.addf %62, %65 : vector<16x80xf32>
    %c11 = arith.constant 11 : index
    %c0_49 = arith.constant 0 : index
    %c0_50 = arith.constant 0 : index
    %67 = vector.load %arg2[%c11, %c0_49, %c0_50] : memref<16x16x24xf32, #tpu.memory_space<vmem>>, vector<1x16x24xf32>
    %68 = vector.shape_cast %67 : vector<1x16x24xf32> to vector<16x24xf32>
    %cst_51 = arith.constant dense<0.000000e+00> : vector<16x80xf32>
    %69 = tpu.matmul %68, %10, %cst_51 {dimension_numbers = #tpu.dot_dimension_numbers<[1], [0], [0], [1], [0, 0, 1, 1], [], []>} : vector<16x24xf32>, vector<24x80xf32>, vector<16x80xf32> -> vector<16x80xf32>
    %70 = arith.addf %66, %69 : vector<16x80xf32>
    %71 = vector.broadcast %2 : vector<16x1xf32> to vector<16x80xf32>
    %72 = arith.addf %70, %71 : vector<16x80xf32>
    %cst_52 = arith.constant 0.000000e+00 : f32
    %73 = vector.broadcast %cst_52 : f32 to vector<16x80xf32>
    %74 = arith.maximumf %72, %73 : vector<16x80xf32>
    %c0_53 = arith.constant 0 : index
    %c1_54 = arith.constant 1 : index
    %c0_55 = arith.constant 0 : index
    %c0_56 = arith.constant 0 : index
    %c0_57 = arith.constant 0 : index
    %75 = vector.load %arg4[%c0_53, %c1_54, %c0_55, %c0_56, %c0_57] : memref<1x2x2x16x80xf32, #tpu.memory_space<vmem>>, vector<1x1x1x16x80xf32>
    %76 = vector.shape_cast %75 : vector<1x1x1x16x80xf32> to vector<16x80xf32>
    %77 = vector.shape_cast %74 : vector<16x80xf32> to vector<1x1x1x16x80xf32>
    tpu.vector_store %arg4[%c0_53, %c1_54, %c0_55, %c0_56, %c0_57], %77 {strides = array<i32>} : memref<1x2x2x16x80xf32, #tpu.memory_space<vmem>>, vector<1x1x1x16x80xf32>,
    %c12 = arith.constant 12 : index
    %c0_58 = arith.constant 0 : index
    %c0_59 = arith.constant 0 : index
    %78 = vector.load %arg2[%c12, %c0_58, %c0_59] : memref<16x16x24xf32, #tpu.memory_space<vmem>>, vector<1x16x24xf32>
    %79 = vector.shape_cast %78 : vector<1x16x24xf32> to vector<16x24xf32>
    %cst_60 = arith.constant dense<0.000000e+00> : vector<16x80xf32>
    %80 = tpu.matmul %79, %7, %cst_60 {dimension_numbers = #tpu.dot_dimension_numbers<[1], [0], [0], [1], [0, 0, 1, 1], [], []>} : vector<16x24xf32>, vector<24x80xf32>, vector<16x80xf32> -> vector<16x80xf32>
    %c13 = arith.constant 13 : index
    %c0_61 = arith.constant 0 : index
    %c0_62 = arith.constant 0 : index
    %81 = vector.load %arg2[%c13, %c0_61, %c0_62] : memref<16x16x24xf32, #tpu.memory_space<vmem>>, vector<1x16x24xf32>
    %82 = vector.shape_cast %81 : vector<1x16x24xf32> to vector<16x24xf32>
    %cst_63 = arith.constant dense<0.000000e+00> : vector<16x80xf32>
    %83 = tpu.matmul %82, %8, %cst_63 {dimension_numbers = #tpu.dot_dimension_numbers<[1], [0], [0], [1], [0, 0, 1, 1], [], []>} : vector<16x24xf32>, vector<24x80xf32>, vector<16x80xf32> -> vector<16x80xf32>
    %84 = arith.addf %80, %83 : vector<16x80xf32>
    %c14 = arith.constant 14 : index
    %c0_64 = arith.constant 0 : index
    %c0_65 = arith.constant 0 : index
    %85 = vector.load %arg2[%c14, %c0_64, %c0_65] : memref<16x16x24xf32, #tpu.memory_space<vmem>>, vector<1x16x24xf32>
    %86 = vector.shape_cast %85 : vector<1x16x24xf32> to vector<16x24xf32>
    %cst_66 = arith.constant dense<0.000000e+00> : vector<16x80xf32>
    %87 = tpu.matmul %86, %10, %cst_66 {dimension_numbers = #tpu.dot_dimension_numbers<[1], [0], [0], [1], [0, 0, 1, 1], [], []>} : vector<16x24xf32>, vector<24x80xf32>, vector<16x80xf32> -> vector<16x80xf32>
    %88 = arith.addf %84, %87 : vector<16x80xf32>
    %c15 = arith.constant 15 : index
    %c0_67 = arith.constant 0 : index
    %c0_68 = arith.constant 0 : index
    %89 = vector.load %arg2[%c15, %c0_67, %c0_68] : memref<16x16x24xf32, #tpu.memory_space<vmem>>, vector<1x16x24xf32>
    %90 = vector.shape_cast %89 : vector<1x16x24xf32> to vector<16x24xf32>
    %cst_69 = arith.constant dense<0.000000e+00> : vector<16x80xf32>
    %91 = tpu.matmul %90, %11, %cst_69 {dimension_numbers = #tpu.dot_dimension_numbers<[1], [0], [0], [1], [0, 0, 1, 1], [], []>} : vector<16x24xf32>, vector<24x80xf32>, vector<16x80xf32> -> vector<16x80xf32>
    %92 = arith.addf %88, %91 : vector<16x80xf32>
    %93 = vector.broadcast %2 : vector<16x1xf32> to vector<16x80xf32>
    %94 = arith.addf %92, %93 : vector<16x80xf32>
    %cst_70 = arith.constant 0.000000e+00 : f32
    %95 = vector.broadcast %cst_70 : f32 to vector<16x80xf32>
    %96 = arith.maximumf %94, %95 : vector<16x80xf32>
    %c0_71 = arith.constant 0 : index
    %c1_72 = arith.constant 1 : index
    %c1_73 = arith.constant 1 : index
    %c0_74 = arith.constant 0 : index
    %c0_75 = arith.constant 0 : index
    %97 = vector.load %arg4[%c0_71, %c1_72, %c1_73, %c0_74, %c0_75] : memref<1x2x2x16x80xf32, #tpu.memory_space<vmem>>, vector<1x1x1x16x80xf32>
    %98 = vector.shape_cast %97 : vector<1x1x1x16x80xf32> to vector<16x80xf32>
    %99 = vector.shape_cast %96 : vector<16x80xf32> to vector<1x1x1x16x80xf32>
    tpu.vector_store %arg4[%c0_71, %c1_72, %c1_73, %c0_74, %c0_75], %99 {strides = array<i32>} : memref<1x2x2x16x80xf32, #tpu.memory_space<vmem>>, vector<1x1x1x16x80xf32>,
    return
  }
  func.func @transform_0(%arg0: i32) -> (i32, i32, i32) {
    %c0_i32 = arith.constant 0 : i32
    %c0_i32_0 = arith.constant 0 : i32
    %c0_i32_1 = arith.constant 0 : i32
    return %arg0, %c0_i32, %c0_i32_0 : i32, i32, i32
  }
  func.func @transform_1(%arg0: i32) -> (i32, i32, i32) {
    %c0_i32 = arith.constant 0 : i32
    %c0_i32_0 = arith.constant 0 : i32
    %c0_i32_1 = arith.constant 0 : i32
    %c0_i32_2 = arith.constant 0 : i32
    return %c0_i32, %c0_i32_0, %c0_i32_1 : i32, i32, i32
  }
  func.func @transform_2(%arg0: i32) -> (i32, i32) {
    %c0_i32 = arith.constant 0 : i32
    %c0_i32_0 = arith.constant 0 : i32
    %c0_i32_1 = arith.constant 0 : i32
    return %c0_i32, %c0_i32_0 : i32, i32
  }
  func.func @transform_3(%arg0: i32) -> (i32, i32, i32, i32, i32) {
    %c0_i32 = arith.constant 0 : i32
    %c0_i32_0 = arith.constant 0 : i32
    %c0_i32_1 = arith.constant 0 : i32
    %c0_i32_2 = arith.constant 0 : i32
    %c0_i32_3 = arith.constant 0 : i32
    return %arg0, %c0_i32, %c0_i32_0, %c0_i32_1, %c0_i32_2 : i32, i32, i32, i32, i32
  }
}

module attributes {stable_mosaic.version = 11 : i64} {
  func.func @kernel(%arg0: i32, %arg1: memref<1x16x342xf32, #tpu.memory_space<vmem>>, %arg2: memref<16x8x16xf32, #tpu.memory_space<vmem>>, %arg3: memref<8x1xf32, #tpu.memory_space<vmem>>, %arg4: memref<1x2x2x8x288xf32, #tpu.memory_space<vmem>>) attributes {dimension_semantics = [#tpu.dimension_semantics<parallel>], iteration_bounds = array<i64: 2>, scalar_prefetch = 0 : i64, scratch_operands = 0 : i64, tpu.core_type = #tpu.core_type<tc>, window_params = [{transform_indices = @transform_0, window_bounds = array<i64: 1, 16, 342>}, {pipeline_mode = #tpu.pipeline_mode<synchronous>, transform_indices = @transform_1, window_bounds = array<i64: 16, 8, 16>}, {pipeline_mode = #tpu.pipeline_mode<synchronous>, transform_indices = @transform_2, window_bounds = array<i64: 8, 1>}, {transform_indices = @transform_3, window_bounds = array<i64: 1, 2, 2, 8, 288>}]} {
    %c0 = arith.constant 0 : index
    %c0_0 = arith.constant 0 : index
    %c0_1 = arith.constant 0 : index
    %0 = vector.load %arg1[%c0, %c0_0, %c0_1] : memref<1x16x342xf32, #tpu.memory_space<vmem>>, vector<1x16x342xf32>
    %1 = vector.shape_cast %0 : vector<1x16x342xf32> to vector<16x342xf32>
    %c0_2 = arith.constant 0 : index
    %c0_3 = arith.constant 0 : index
    %2 = vector.load %arg3[%c0_2, %c0_3] : memref<8x1xf32, #tpu.memory_space<vmem>>, vector<8x1xf32>
    %3 = vector.extract_strided_slice %1 {offsets = [0, 0], sizes = [16, 288], strides = [1, 1]} : vector<16x342xf32> to vector<16x288xf32>
    %4 = vector.extract_strided_slice %1 {offsets = [0, 1], sizes = [16, 288], strides = [1, 1]} : vector<16x342xf32> to vector<16x288xf32>
    %5 = vector.extract_strided_slice %1 {offsets = [0, 2], sizes = [16, 288], strides = [1, 1]} : vector<16x342xf32> to vector<16x288xf32>
    %6 = vector.extract_strided_slice %1 {offsets = [0, 18], sizes = [16, 288], strides = [1, 1]} : vector<16x342xf32> to vector<16x288xf32>
    %7 = vector.extract_strided_slice %1 {offsets = [0, 19], sizes = [16, 288], strides = [1, 1]} : vector<16x342xf32> to vector<16x288xf32>
    %8 = vector.extract_strided_slice %1 {offsets = [0, 20], sizes = [16, 288], strides = [1, 1]} : vector<16x342xf32> to vector<16x288xf32>
    %9 = vector.extract_strided_slice %1 {offsets = [0, 36], sizes = [16, 288], strides = [1, 1]} : vector<16x342xf32> to vector<16x288xf32>
    %10 = vector.extract_strided_slice %1 {offsets = [0, 37], sizes = [16, 288], strides = [1, 1]} : vector<16x342xf32> to vector<16x288xf32>
    %11 = vector.extract_strided_slice %1 {offsets = [0, 38], sizes = [16, 288], strides = [1, 1]} : vector<16x342xf32> to vector<16x288xf32>
    %c0_4 = arith.constant 0 : index
    %c0_5 = arith.constant 0 : index
    %c0_6 = arith.constant 0 : index
    %12 = vector.load %arg2[%c0_4, %c0_5, %c0_6] : memref<16x8x16xf32, #tpu.memory_space<vmem>>, vector<1x8x16xf32>
    %13 = vector.shape_cast %12 : vector<1x8x16xf32> to vector<8x16xf32>
    %cst = arith.constant dense<0.000000e+00> : vector<8x288xf32>
    %14 = tpu.matmul %13, %3, %cst {dimension_numbers = #tpu.dot_dimension_numbers<[1], [0], [0], [1], [0, 0, 1, 1], [], []>} : vector<8x16xf32>, vector<16x288xf32>, vector<8x288xf32> -> vector<8x288xf32>
    %c1 = arith.constant 1 : index
    %c0_7 = arith.constant 0 : index
    %c0_8 = arith.constant 0 : index
    %15 = vector.load %arg2[%c1, %c0_7, %c0_8] : memref<16x8x16xf32, #tpu.memory_space<vmem>>, vector<1x8x16xf32>
    %16 = vector.shape_cast %15 : vector<1x8x16xf32> to vector<8x16xf32>
    %cst_9 = arith.constant dense<0.000000e+00> : vector<8x288xf32>
    %17 = tpu.matmul %16, %4, %cst_9 {dimension_numbers = #tpu.dot_dimension_numbers<[1], [0], [0], [1], [0, 0, 1, 1], [], []>} : vector<8x16xf32>, vector<16x288xf32>, vector<8x288xf32> -> vector<8x288xf32>
    %18 = arith.addf %14, %17 : vector<8x288xf32>
    %c2 = arith.constant 2 : index
    %c0_10 = arith.constant 0 : index
    %c0_11 = arith.constant 0 : index
    %19 = vector.load %arg2[%c2, %c0_10, %c0_11] : memref<16x8x16xf32, #tpu.memory_space<vmem>>, vector<1x8x16xf32>
    %20 = vector.shape_cast %19 : vector<1x8x16xf32> to vector<8x16xf32>
    %cst_12 = arith.constant dense<0.000000e+00> : vector<8x288xf32>
    %21 = tpu.matmul %20, %6, %cst_12 {dimension_numbers = #tpu.dot_dimension_numbers<[1], [0], [0], [1], [0, 0, 1, 1], [], []>} : vector<8x16xf32>, vector<16x288xf32>, vector<8x288xf32> -> vector<8x288xf32>
    %22 = arith.addf %18, %21 : vector<8x288xf32>
    %c3 = arith.constant 3 : index
    %c0_13 = arith.constant 0 : index
    %c0_14 = arith.constant 0 : index
    %23 = vector.load %arg2[%c3, %c0_13, %c0_14] : memref<16x8x16xf32, #tpu.memory_space<vmem>>, vector<1x8x16xf32>
    %24 = vector.shape_cast %23 : vector<1x8x16xf32> to vector<8x16xf32>
    %cst_15 = arith.constant dense<0.000000e+00> : vector<8x288xf32>
    %25 = tpu.matmul %24, %7, %cst_15 {dimension_numbers = #tpu.dot_dimension_numbers<[1], [0], [0], [1], [0, 0, 1, 1], [], []>} : vector<8x16xf32>, vector<16x288xf32>, vector<8x288xf32> -> vector<8x288xf32>
    %26 = arith.addf %22, %25 : vector<8x288xf32>
    %27 = vector.broadcast %2 : vector<8x1xf32> to vector<8x288xf32>
    %28 = arith.addf %26, %27 : vector<8x288xf32>
    %cst_16 = arith.constant 0.000000e+00 : f32
    %29 = vector.broadcast %cst_16 : f32 to vector<8x288xf32>
    %30 = arith.maximumf %28, %29 : vector<8x288xf32>
    %c0_17 = arith.constant 0 : index
    %c0_18 = arith.constant 0 : index
    %c0_19 = arith.constant 0 : index
    %c0_20 = arith.constant 0 : index
    %c0_21 = arith.constant 0 : index
    %31 = vector.load %arg4[%c0_17, %c0_18, %c0_19, %c0_20, %c0_21] : memref<1x2x2x8x288xf32, #tpu.memory_space<vmem>>, vector<1x1x1x8x288xf32>
    %32 = vector.shape_cast %31 : vector<1x1x1x8x288xf32> to vector<8x288xf32>
    %33 = vector.shape_cast %30 : vector<8x288xf32> to vector<1x1x1x8x288xf32>
    tpu.vector_store %arg4[%c0_17, %c0_18, %c0_19, %c0_20, %c0_21], %33 {strides = array<i32>} : memref<1x2x2x8x288xf32, #tpu.memory_space<vmem>>, vector<1x1x1x8x288xf32>,
    %c4 = arith.constant 4 : index
    %c0_22 = arith.constant 0 : index
    %c0_23 = arith.constant 0 : index
    %34 = vector.load %arg2[%c4, %c0_22, %c0_23] : memref<16x8x16xf32, #tpu.memory_space<vmem>>, vector<1x8x16xf32>
    %35 = vector.shape_cast %34 : vector<1x8x16xf32> to vector<8x16xf32>
    %cst_24 = arith.constant dense<0.000000e+00> : vector<8x288xf32>
    %36 = tpu.matmul %35, %4, %cst_24 {dimension_numbers = #tpu.dot_dimension_numbers<[1], [0], [0], [1], [0, 0, 1, 1], [], []>} : vector<8x16xf32>, vector<16x288xf32>, vector<8x288xf32> -> vector<8x288xf32>
    %c5 = arith.constant 5 : index
    %c0_25 = arith.constant 0 : index
    %c0_26 = arith.constant 0 : index
    %37 = vector.load %arg2[%c5, %c0_25, %c0_26] : memref<16x8x16xf32, #tpu.memory_space<vmem>>, vector<1x8x16xf32>
    %38 = vector.shape_cast %37 : vector<1x8x16xf32> to vector<8x16xf32>
    %cst_27 = arith.constant dense<0.000000e+00> : vector<8x288xf32>
    %39 = tpu.matmul %38, %5, %cst_27 {dimension_numbers = #tpu.dot_dimension_numbers<[1], [0], [0], [1], [0, 0, 1, 1], [], []>} : vector<8x16xf32>, vector<16x288xf32>, vector<8x288xf32> -> vector<8x288xf32>
    %40 = arith.addf %36, %39 : vector<8x288xf32>
    %c6 = arith.constant 6 : index
    %c0_28 = arith.constant 0 : index
    %c0_29 = arith.constant 0 : index
    %41 = vector.load %arg2[%c6, %c0_28, %c0_29] : memref<16x8x16xf32, #tpu.memory_space<vmem>>, vector<1x8x16xf32>
    %42 = vector.shape_cast %41 : vector<1x8x16xf32> to vector<8x16xf32>
    %cst_30 = arith.constant dense<0.000000e+00> : vector<8x288xf32>
    %43 = tpu.matmul %42, %7, %cst_30 {dimension_numbers = #tpu.dot_dimension_numbers<[1], [0], [0], [1], [0, 0, 1, 1], [], []>} : vector<8x16xf32>, vector<16x288xf32>, vector<8x288xf32> -> vector<8x288xf32>
    %44 = arith.addf %40, %43 : vector<8x288xf32>
    %c7 = arith.constant 7 : index
    %c0_31 = arith.constant 0 : index
    %c0_32 = arith.constant 0 : index
    %45 = vector.load %arg2[%c7, %c0_31, %c0_32] : memref<16x8x16xf32, #tpu.memory_space<vmem>>, vector<1x8x16xf32>
    %46 = vector.shape_cast %45 : vector<1x8x16xf32> to vector<8x16xf32>
    %cst_33 = arith.constant dense<0.000000e+00> : vector<8x288xf32>
    %47 = tpu.matmul %46, %8, %cst_33 {dimension_numbers = #tpu.dot_dimension_numbers<[1], [0], [0], [1], [0, 0, 1, 1], [], []>} : vector<8x16xf32>, vector<16x288xf32>, vector<8x288xf32> -> vector<8x288xf32>
    %48 = arith.addf %44, %47 : vector<8x288xf32>
    %49 = vector.broadcast %2 : vector<8x1xf32> to vector<8x288xf32>
    %50 = arith.addf %48, %49 : vector<8x288xf32>
    %cst_34 = arith.constant 0.000000e+00 : f32
    %51 = vector.broadcast %cst_34 : f32 to vector<8x288xf32>
    %52 = arith.maximumf %50, %51 : vector<8x288xf32>
    %c0_35 = arith.constant 0 : index
    %c0_36 = arith.constant 0 : index
    %c1_37 = arith.constant 1 : index
    %c0_38 = arith.constant 0 : index
    %c0_39 = arith.constant 0 : index
    %53 = vector.load %arg4[%c0_35, %c0_36, %c1_37, %c0_38, %c0_39] : memref<1x2x2x8x288xf32, #tpu.memory_space<vmem>>, vector<1x1x1x8x288xf32>
    %54 = vector.shape_cast %53 : vector<1x1x1x8x288xf32> to vector<8x288xf32>
    %55 = vector.shape_cast %52 : vector<8x288xf32> to vector<1x1x1x8x288xf32>
    tpu.vector_store %arg4[%c0_35, %c0_36, %c1_37, %c0_38, %c0_39], %55 {strides = array<i32>} : memref<1x2x2x8x288xf32, #tpu.memory_space<vmem>>, vector<1x1x1x8x288xf32>,
    %c8 = arith.constant 8 : index
    %c0_40 = arith.constant 0 : index
    %c0_41 = arith.constant 0 : index
    %56 = vector.load %arg2[%c8, %c0_40, %c0_41] : memref<16x8x16xf32, #tpu.memory_space<vmem>>, vector<1x8x16xf32>
    %57 = vector.shape_cast %56 : vector<1x8x16xf32> to vector<8x16xf32>
    %cst_42 = arith.constant dense<0.000000e+00> : vector<8x288xf32>
    %58 = tpu.matmul %57, %6, %cst_42 {dimension_numbers = #tpu.dot_dimension_numbers<[1], [0], [0], [1], [0, 0, 1, 1], [], []>} : vector<8x16xf32>, vector<16x288xf32>, vector<8x288xf32> -> vector<8x288xf32>
    %c9 = arith.constant 9 : index
    %c0_43 = arith.constant 0 : index
    %c0_44 = arith.constant 0 : index
    %59 = vector.load %arg2[%c9, %c0_43, %c0_44] : memref<16x8x16xf32, #tpu.memory_space<vmem>>, vector<1x8x16xf32>
    %60 = vector.shape_cast %59 : vector<1x8x16xf32> to vector<8x16xf32>
    %cst_45 = arith.constant dense<0.000000e+00> : vector<8x288xf32>
    %61 = tpu.matmul %60, %7, %cst_45 {dimension_numbers = #tpu.dot_dimension_numbers<[1], [0], [0], [1], [0, 0, 1, 1], [], []>} : vector<8x16xf32>, vector<16x288xf32>, vector<8x288xf32> -> vector<8x288xf32>
    %62 = arith.addf %58, %61 : vector<8x288xf32>
    %c10 = arith.constant 10 : index
    %c0_46 = arith.constant 0 : index
    %c0_47 = arith.constant 0 : index
    %63 = vector.load %arg2[%c10, %c0_46, %c0_47] : memref<16x8x16xf32, #tpu.memory_space<vmem>>, vector<1x8x16xf32>
    %64 = vector.shape_cast %63 : vector<1x8x16xf32> to vector<8x16xf32>
    %cst_48 = arith.constant dense<0.000000e+00> : vector<8x288xf32>
    %65 = tpu.matmul %64, %9, %cst_48 {dimension_numbers = #tpu.dot_dimension_numbers<[1], [0], [0], [1], [0, 0, 1, 1], [], []>} : vector<8x16xf32>, vector<16x288xf32>, vector<8x288xf32> -> vector<8x288xf32>
    %66 = arith.addf %62, %65 : vector<8x288xf32>
    %c11 = arith.constant 11 : index
    %c0_49 = arith.constant 0 : index
    %c0_50 = arith.constant 0 : index
    %67 = vector.load %arg2[%c11, %c0_49, %c0_50] : memref<16x8x16xf32, #tpu.memory_space<vmem>>, vector<1x8x16xf32>
    %68 = vector.shape_cast %67 : vector<1x8x16xf32> to vector<8x16xf32>
    %cst_51 = arith.constant dense<0.000000e+00> : vector<8x288xf32>
    %69 = tpu.matmul %68, %10, %cst_51 {dimension_numbers = #tpu.dot_dimension_numbers<[1], [0], [0], [1], [0, 0, 1, 1], [], []>} : vector<8x16xf32>, vector<16x288xf32>, vector<8x288xf32> -> vector<8x288xf32>
    %70 = arith.addf %66, %69 : vector<8x288xf32>
    %71 = vector.broadcast %2 : vector<8x1xf32> to vector<8x288xf32>
    %72 = arith.addf %70, %71 : vector<8x288xf32>
    %cst_52 = arith.constant 0.000000e+00 : f32
    %73 = vector.broadcast %cst_52 : f32 to vector<8x288xf32>
    %74 = arith.maximumf %72, %73 : vector<8x288xf32>
    %c0_53 = arith.constant 0 : index
    %c1_54 = arith.constant 1 : index
    %c0_55 = arith.constant 0 : index
    %c0_56 = arith.constant 0 : index
    %c0_57 = arith.constant 0 : index
    %75 = vector.load %arg4[%c0_53, %c1_54, %c0_55, %c0_56, %c0_57] : memref<1x2x2x8x288xf32, #tpu.memory_space<vmem>>, vector<1x1x1x8x288xf32>
    %76 = vector.shape_cast %75 : vector<1x1x1x8x288xf32> to vector<8x288xf32>
    %77 = vector.shape_cast %74 : vector<8x288xf32> to vector<1x1x1x8x288xf32>
    tpu.vector_store %arg4[%c0_53, %c1_54, %c0_55, %c0_56, %c0_57], %77 {strides = array<i32>} : memref<1x2x2x8x288xf32, #tpu.memory_space<vmem>>, vector<1x1x1x8x288xf32>,
    %c12 = arith.constant 12 : index
    %c0_58 = arith.constant 0 : index
    %c0_59 = arith.constant 0 : index
    %78 = vector.load %arg2[%c12, %c0_58, %c0_59] : memref<16x8x16xf32, #tpu.memory_space<vmem>>, vector<1x8x16xf32>
    %79 = vector.shape_cast %78 : vector<1x8x16xf32> to vector<8x16xf32>
    %cst_60 = arith.constant dense<0.000000e+00> : vector<8x288xf32>
    %80 = tpu.matmul %79, %7, %cst_60 {dimension_numbers = #tpu.dot_dimension_numbers<[1], [0], [0], [1], [0, 0, 1, 1], [], []>} : vector<8x16xf32>, vector<16x288xf32>, vector<8x288xf32> -> vector<8x288xf32>
    %c13 = arith.constant 13 : index
    %c0_61 = arith.constant 0 : index
    %c0_62 = arith.constant 0 : index
    %81 = vector.load %arg2[%c13, %c0_61, %c0_62] : memref<16x8x16xf32, #tpu.memory_space<vmem>>, vector<1x8x16xf32>
    %82 = vector.shape_cast %81 : vector<1x8x16xf32> to vector<8x16xf32>
    %cst_63 = arith.constant dense<0.000000e+00> : vector<8x288xf32>
    %83 = tpu.matmul %82, %8, %cst_63 {dimension_numbers = #tpu.dot_dimension_numbers<[1], [0], [0], [1], [0, 0, 1, 1], [], []>} : vector<8x16xf32>, vector<16x288xf32>, vector<8x288xf32> -> vector<8x288xf32>
    %84 = arith.addf %80, %83 : vector<8x288xf32>
    %c14 = arith.constant 14 : index
    %c0_64 = arith.constant 0 : index
    %c0_65 = arith.constant 0 : index
    %85 = vector.load %arg2[%c14, %c0_64, %c0_65] : memref<16x8x16xf32, #tpu.memory_space<vmem>>, vector<1x8x16xf32>
    %86 = vector.shape_cast %85 : vector<1x8x16xf32> to vector<8x16xf32>
    %cst_66 = arith.constant dense<0.000000e+00> : vector<8x288xf32>
    %87 = tpu.matmul %86, %10, %cst_66 {dimension_numbers = #tpu.dot_dimension_numbers<[1], [0], [0], [1], [0, 0, 1, 1], [], []>} : vector<8x16xf32>, vector<16x288xf32>, vector<8x288xf32> -> vector<8x288xf32>
    %88 = arith.addf %84, %87 : vector<8x288xf32>
    %c15 = arith.constant 15 : index
    %c0_67 = arith.constant 0 : index
    %c0_68 = arith.constant 0 : index
    %89 = vector.load %arg2[%c15, %c0_67, %c0_68] : memref<16x8x16xf32, #tpu.memory_space<vmem>>, vector<1x8x16xf32>
    %90 = vector.shape_cast %89 : vector<1x8x16xf32> to vector<8x16xf32>
    %cst_69 = arith.constant dense<0.000000e+00> : vector<8x288xf32>
    %91 = tpu.matmul %90, %11, %cst_69 {dimension_numbers = #tpu.dot_dimension_numbers<[1], [0], [0], [1], [0, 0, 1, 1], [], []>} : vector<8x16xf32>, vector<16x288xf32>, vector<8x288xf32> -> vector<8x288xf32>
    %92 = arith.addf %88, %91 : vector<8x288xf32>
    %93 = vector.broadcast %2 : vector<8x1xf32> to vector<8x288xf32>
    %94 = arith.addf %92, %93 : vector<8x288xf32>
    %cst_70 = arith.constant 0.000000e+00 : f32
    %95 = vector.broadcast %cst_70 : f32 to vector<8x288xf32>
    %96 = arith.maximumf %94, %95 : vector<8x288xf32>
    %c0_71 = arith.constant 0 : index
    %c1_72 = arith.constant 1 : index
    %c1_73 = arith.constant 1 : index
    %c0_74 = arith.constant 0 : index
    %c0_75 = arith.constant 0 : index
    %97 = vector.load %arg4[%c0_71, %c1_72, %c1_73, %c0_74, %c0_75] : memref<1x2x2x8x288xf32, #tpu.memory_space<vmem>>, vector<1x1x1x8x288xf32>
    %98 = vector.shape_cast %97 : vector<1x1x1x8x288xf32> to vector<8x288xf32>
    %99 = vector.shape_cast %96 : vector<8x288xf32> to vector<1x1x1x8x288xf32>
    tpu.vector_store %arg4[%c0_71, %c1_72, %c1_73, %c0_74, %c0_75], %99 {strides = array<i32>} : memref<1x2x2x8x288xf32, #tpu.memory_space<vmem>>, vector<1x1x1x8x288xf32>,
    return
  }
  func.func @transform_0(%arg0: i32) -> (i32, i32, i32) {
    %c0_i32 = arith.constant 0 : i32
    %c0_i32_0 = arith.constant 0 : i32
    %c0_i32_1 = arith.constant 0 : i32
    return %arg0, %c0_i32, %c0_i32_0 : i32, i32, i32
  }
  func.func @transform_1(%arg0: i32) -> (i32, i32, i32) {
    %c0_i32 = arith.constant 0 : i32
    %c0_i32_0 = arith.constant 0 : i32
    %c0_i32_1 = arith.constant 0 : i32
    %c0_i32_2 = arith.constant 0 : i32
    return %c0_i32, %c0_i32_0, %c0_i32_1 : i32, i32, i32
  }
  func.func @transform_2(%arg0: i32) -> (i32, i32) {
    %c0_i32 = arith.constant 0 : i32
    %c0_i32_0 = arith.constant 0 : i32
    %c0_i32_1 = arith.constant 0 : i32
    return %c0_i32, %c0_i32_0 : i32, i32
  }
  func.func @transform_3(%arg0: i32) -> (i32, i32, i32, i32, i32) {
    %c0_i32 = arith.constant 0 : i32
    %c0_i32_0 = arith.constant 0 : i32
    %c0_i32_1 = arith.constant 0 : i32
    %c0_i32_2 = arith.constant 0 : i32
    %c0_i32_3 = arith.constant 0 : i32
    return %arg0, %c0_i32, %c0_i32_0, %c0_i32_1, %c0_i32_2 : i32, i32, i32, i32, i32
  }
}

module attributes {stable_mosaic.version = 11 : i64} {
  func.func @kernel(%arg0: i32, %arg1: memref<1x8x1190xf32, #tpu.memory_space<vmem>>, %arg2: memref<16x3x8xf32, #tpu.memory_space<vmem>>, %arg3: memref<3x1xf32, #tpu.memory_space<vmem>>, %arg4: memref<1x2x2x3x1088xf32, #tpu.memory_space<vmem>>) attributes {dimension_semantics = [#tpu.dimension_semantics<parallel>], iteration_bounds = array<i64: 2>, scalar_prefetch = 0 : i64, scratch_operands = 0 : i64, tpu.core_type = #tpu.core_type<tc>, window_params = [{transform_indices = @transform_0, window_bounds = array<i64: 1, 8, 1190>}, {pipeline_mode = #tpu.pipeline_mode<synchronous>, transform_indices = @transform_1, window_bounds = array<i64: 16, 3, 8>}, {pipeline_mode = #tpu.pipeline_mode<synchronous>, transform_indices = @transform_2, window_bounds = array<i64: 3, 1>}, {transform_indices = @transform_3, window_bounds = array<i64: 1, 2, 2, 3, 1088>}]} {
    %c0 = arith.constant 0 : index
    %c0_0 = arith.constant 0 : index
    %c0_1 = arith.constant 0 : index
    %0 = vector.load %arg1[%c0, %c0_0, %c0_1] : memref<1x8x1190xf32, #tpu.memory_space<vmem>>, vector<1x8x1190xf32>
    %1 = vector.shape_cast %0 : vector<1x8x1190xf32> to vector<8x1190xf32>
    %c0_2 = arith.constant 0 : index
    %c0_3 = arith.constant 0 : index
    %2 = vector.load %arg3[%c0_2, %c0_3] : memref<3x1xf32, #tpu.memory_space<vmem>>, vector<3x1xf32>
    %3 = vector.extract_strided_slice %1 {offsets = [0, 0], sizes = [8, 1088], strides = [1, 1]} : vector<8x1190xf32> to vector<8x1088xf32>
    %4 = vector.extract_strided_slice %1 {offsets = [0, 1], sizes = [8, 1088], strides = [1, 1]} : vector<8x1190xf32> to vector<8x1088xf32>
    %5 = vector.extract_strided_slice %1 {offsets = [0, 2], sizes = [8, 1088], strides = [1, 1]} : vector<8x1190xf32> to vector<8x1088xf32>
    %6 = vector.extract_strided_slice %1 {offsets = [0, 34], sizes = [8, 1088], strides = [1, 1]} : vector<8x1190xf32> to vector<8x1088xf32>
    %7 = vector.extract_strided_slice %1 {offsets = [0, 35], sizes = [8, 1088], strides = [1, 1]} : vector<8x1190xf32> to vector<8x1088xf32>
    %8 = vector.extract_strided_slice %1 {offsets = [0, 36], sizes = [8, 1088], strides = [1, 1]} : vector<8x1190xf32> to vector<8x1088xf32>
    %9 = vector.extract_strided_slice %1 {offsets = [0, 68], sizes = [8, 1088], strides = [1, 1]} : vector<8x1190xf32> to vector<8x1088xf32>
    %10 = vector.extract_strided_slice %1 {offsets = [0, 69], sizes = [8, 1088], strides = [1, 1]} : vector<8x1190xf32> to vector<8x1088xf32>
    %11 = vector.extract_strided_slice %1 {offsets = [0, 70], sizes = [8, 1088], strides = [1, 1]} : vector<8x1190xf32> to vector<8x1088xf32>
    %c0_4 = arith.constant 0 : index
    %c0_5 = arith.constant 0 : index
    %c0_6 = arith.constant 0 : index
    %12 = vector.load %arg2[%c0_4, %c0_5, %c0_6] : memref<16x3x8xf32, #tpu.memory_space<vmem>>, vector<1x3x8xf32>
    %13 = vector.shape_cast %12 : vector<1x3x8xf32> to vector<3x8xf32>
    %cst = arith.constant dense<0.000000e+00> : vector<3x1088xf32>
    %14 = tpu.matmul %13, %3, %cst {dimension_numbers = #tpu.dot_dimension_numbers<[1], [0], [0], [1], [0, 0, 1, 1], [], []>} : vector<3x8xf32>, vector<8x1088xf32>, vector<3x1088xf32> -> vector<3x1088xf32>
    %c1 = arith.constant 1 : index
    %c0_7 = arith.constant 0 : index
    %c0_8 = arith.constant 0 : index
    %15 = vector.load %arg2[%c1, %c0_7, %c0_8] : memref<16x3x8xf32, #tpu.memory_space<vmem>>, vector<1x3x8xf32>
    %16 = vector.shape_cast %15 : vector<1x3x8xf32> to vector<3x8xf32>
    %cst_9 = arith.constant dense<0.000000e+00> : vector<3x1088xf32>
    %17 = tpu.matmul %16, %4, %cst_9 {dimension_numbers = #tpu.dot_dimension_numbers<[1], [0], [0], [1], [0, 0, 1, 1], [], []>} : vector<3x8xf32>, vector<8x1088xf32>, vector<3x1088xf32> -> vector<3x1088xf32>
    %18 = arith.addf %14, %17 : vector<3x1088xf32>
    %c2 = arith.constant 2 : index
    %c0_10 = arith.constant 0 : index
    %c0_11 = arith.constant 0 : index
    %19 = vector.load %arg2[%c2, %c0_10, %c0_11] : memref<16x3x8xf32, #tpu.memory_space<vmem>>, vector<1x3x8xf32>
    %20 = vector.shape_cast %19 : vector<1x3x8xf32> to vector<3x8xf32>
    %cst_12 = arith.constant dense<0.000000e+00> : vector<3x1088xf32>
    %21 = tpu.matmul %20, %6, %cst_12 {dimension_numbers = #tpu.dot_dimension_numbers<[1], [0], [0], [1], [0, 0, 1, 1], [], []>} : vector<3x8xf32>, vector<8x1088xf32>, vector<3x1088xf32> -> vector<3x1088xf32>
    %22 = arith.addf %18, %21 : vector<3x1088xf32>
    %c3 = arith.constant 3 : index
    %c0_13 = arith.constant 0 : index
    %c0_14 = arith.constant 0 : index
    %23 = vector.load %arg2[%c3, %c0_13, %c0_14] : memref<16x3x8xf32, #tpu.memory_space<vmem>>, vector<1x3x8xf32>
    %24 = vector.shape_cast %23 : vector<1x3x8xf32> to vector<3x8xf32>
    %cst_15 = arith.constant dense<0.000000e+00> : vector<3x1088xf32>
    %25 = tpu.matmul %24, %7, %cst_15 {dimension_numbers = #tpu.dot_dimension_numbers<[1], [0], [0], [1], [0, 0, 1, 1], [], []>} : vector<3x8xf32>, vector<8x1088xf32>, vector<3x1088xf32> -> vector<3x1088xf32>
    %26 = arith.addf %22, %25 : vector<3x1088xf32>
    %27 = vector.broadcast %2 : vector<3x1xf32> to vector<3x1088xf32>
    %28 = arith.addf %26, %27 : vector<3x1088xf32>
    %29 = math.tanh %28 : vector<3x1088xf32>
    %c0_16 = arith.constant 0 : index
    %c0_17 = arith.constant 0 : index
    %c0_18 = arith.constant 0 : index
    %c0_19 = arith.constant 0 : index
    %c0_20 = arith.constant 0 : index
    %30 = vector.load %arg4[%c0_16, %c0_17, %c0_18, %c0_19, %c0_20] : memref<1x2x2x3x1088xf32, #tpu.memory_space<vmem>>, vector<1x1x1x3x1088xf32>
    %31 = vector.shape_cast %30 : vector<1x1x1x3x1088xf32> to vector<3x1088xf32>
    %32 = vector.shape_cast %29 : vector<3x1088xf32> to vector<1x1x1x3x1088xf32>
    tpu.vector_store %arg4[%c0_16, %c0_17, %c0_18, %c0_19, %c0_20], %32 {strides = array<i32>} : memref<1x2x2x3x1088xf32, #tpu.memory_space<vmem>>, vector<1x1x1x3x1088xf32>,
    %c4 = arith.constant 4 : index
    %c0_21 = arith.constant 0 : index
    %c0_22 = arith.constant 0 : index
    %33 = vector.load %arg2[%c4, %c0_21, %c0_22] : memref<16x3x8xf32, #tpu.memory_space<vmem>>, vector<1x3x8xf32>
    %34 = vector.shape_cast %33 : vector<1x3x8xf32> to vector<3x8xf32>
    %cst_23 = arith.constant dense<0.000000e+00> : vector<3x1088xf32>
    %35 = tpu.matmul %34, %4, %cst_23 {dimension_numbers = #tpu.dot_dimension_numbers<[1], [0], [0], [1], [0, 0, 1, 1], [], []>} : vector<3x8xf32>, vector<8x1088xf32>, vector<3x1088xf32> -> vector<3x1088xf32>
    %c5 = arith.constant 5 : index
    %c0_24 = arith.constant 0 : index
    %c0_25 = arith.constant 0 : index
    %36 = vector.load %arg2[%c5, %c0_24, %c0_25] : memref<16x3x8xf32, #tpu.memory_space<vmem>>, vector<1x3x8xf32>
    %37 = vector.shape_cast %36 : vector<1x3x8xf32> to vector<3x8xf32>
    %cst_26 = arith.constant dense<0.000000e+00> : vector<3x1088xf32>
    %38 = tpu.matmul %37, %5, %cst_26 {dimension_numbers = #tpu.dot_dimension_numbers<[1], [0], [0], [1], [0, 0, 1, 1], [], []>} : vector<3x8xf32>, vector<8x1088xf32>, vector<3x1088xf32> -> vector<3x1088xf32>
    %39 = arith.addf %35, %38 : vector<3x1088xf32>
    %c6 = arith.constant 6 : index
    %c0_27 = arith.constant 0 : index
    %c0_28 = arith.constant 0 : index
    %40 = vector.load %arg2[%c6, %c0_27, %c0_28] : memref<16x3x8xf32, #tpu.memory_space<vmem>>, vector<1x3x8xf32>
    %41 = vector.shape_cast %40 : vector<1x3x8xf32> to vector<3x8xf32>
    %cst_29 = arith.constant dense<0.000000e+00> : vector<3x1088xf32>
    %42 = tpu.matmul %41, %7, %cst_29 {dimension_numbers = #tpu.dot_dimension_numbers<[1], [0], [0], [1], [0, 0, 1, 1], [], []>} : vector<3x8xf32>, vector<8x1088xf32>, vector<3x1088xf32> -> vector<3x1088xf32>
    %43 = arith.addf %39, %42 : vector<3x1088xf32>
    %c7 = arith.constant 7 : index
    %c0_30 = arith.constant 0 : index
    %c0_31 = arith.constant 0 : index
    %44 = vector.load %arg2[%c7, %c0_30, %c0_31] : memref<16x3x8xf32, #tpu.memory_space<vmem>>, vector<1x3x8xf32>
    %45 = vector.shape_cast %44 : vector<1x3x8xf32> to vector<3x8xf32>
    %cst_32 = arith.constant dense<0.000000e+00> : vector<3x1088xf32>
    %46 = tpu.matmul %45, %8, %cst_32 {dimension_numbers = #tpu.dot_dimension_numbers<[1], [0], [0], [1], [0, 0, 1, 1], [], []>} : vector<3x8xf32>, vector<8x1088xf32>, vector<3x1088xf32> -> vector<3x1088xf32>
    %47 = arith.addf %43, %46 : vector<3x1088xf32>
    %48 = vector.broadcast %2 : vector<3x1xf32> to vector<3x1088xf32>
    %49 = arith.addf %47, %48 : vector<3x1088xf32>
    %50 = math.tanh %49 : vector<3x1088xf32>
    %c0_33 = arith.constant 0 : index
    %c0_34 = arith.constant 0 : index
    %c1_35 = arith.constant 1 : index
    %c0_36 = arith.constant 0 : index
    %c0_37 = arith.constant 0 : index
    %51 = vector.load %arg4[%c0_33, %c0_34, %c1_35, %c0_36, %c0_37] : memref<1x2x2x3x1088xf32, #tpu.memory_space<vmem>>, vector<1x1x1x3x1088xf32>
    %52 = vector.shape_cast %51 : vector<1x1x1x3x1088xf32> to vector<3x1088xf32>
    %53 = vector.shape_cast %50 : vector<3x1088xf32> to vector<1x1x1x3x1088xf32>
    tpu.vector_store %arg4[%c0_33, %c0_34, %c1_35, %c0_36, %c0_37], %53 {strides = array<i32>} : memref<1x2x2x3x1088xf32, #tpu.memory_space<vmem>>, vector<1x1x1x3x1088xf32>,
    %c8 = arith.constant 8 : index
    %c0_38 = arith.constant 0 : index
    %c0_39 = arith.constant 0 : index
    %54 = vector.load %arg2[%c8, %c0_38, %c0_39] : memref<16x3x8xf32, #tpu.memory_space<vmem>>, vector<1x3x8xf32>
    %55 = vector.shape_cast %54 : vector<1x3x8xf32> to vector<3x8xf32>
    %cst_40 = arith.constant dense<0.000000e+00> : vector<3x1088xf32>
    %56 = tpu.matmul %55, %6, %cst_40 {dimension_numbers = #tpu.dot_dimension_numbers<[1], [0], [0], [1], [0, 0, 1, 1], [], []>} : vector<3x8xf32>, vector<8x1088xf32>, vector<3x1088xf32> -> vector<3x1088xf32>
    %c9 = arith.constant 9 : index
    %c0_41 = arith.constant 0 : index
    %c0_42 = arith.constant 0 : index
    %57 = vector.load %arg2[%c9, %c0_41, %c0_42] : memref<16x3x8xf32, #tpu.memory_space<vmem>>, vector<1x3x8xf32>
    %58 = vector.shape_cast %57 : vector<1x3x8xf32> to vector<3x8xf32>
    %cst_43 = arith.constant dense<0.000000e+00> : vector<3x1088xf32>
    %59 = tpu.matmul %58, %7, %cst_43 {dimension_numbers = #tpu.dot_dimension_numbers<[1], [0], [0], [1], [0, 0, 1, 1], [], []>} : vector<3x8xf32>, vector<8x1088xf32>, vector<3x1088xf32> -> vector<3x1088xf32>
    %60 = arith.addf %56, %59 : vector<3x1088xf32>
    %c10 = arith.constant 10 : index
    %c0_44 = arith.constant 0 : index
    %c0_45 = arith.constant 0 : index
    %61 = vector.load %arg2[%c10, %c0_44, %c0_45] : memref<16x3x8xf32, #tpu.memory_space<vmem>>, vector<1x3x8xf32>
    %62 = vector.shape_cast %61 : vector<1x3x8xf32> to vector<3x8xf32>
    %cst_46 = arith.constant dense<0.000000e+00> : vector<3x1088xf32>
    %63 = tpu.matmul %62, %9, %cst_46 {dimension_numbers = #tpu.dot_dimension_numbers<[1], [0], [0], [1], [0, 0, 1, 1], [], []>} : vector<3x8xf32>, vector<8x1088xf32>, vector<3x1088xf32> -> vector<3x1088xf32>
    %64 = arith.addf %60, %63 : vector<3x1088xf32>
    %c11 = arith.constant 11 : index
    %c0_47 = arith.constant 0 : index
    %c0_48 = arith.constant 0 : index
    %65 = vector.load %arg2[%c11, %c0_47, %c0_48] : memref<16x3x8xf32, #tpu.memory_space<vmem>>, vector<1x3x8xf32>
    %66 = vector.shape_cast %65 : vector<1x3x8xf32> to vector<3x8xf32>
    %cst_49 = arith.constant dense<0.000000e+00> : vector<3x1088xf32>
    %67 = tpu.matmul %66, %10, %cst_49 {dimension_numbers = #tpu.dot_dimension_numbers<[1], [0], [0], [1], [0, 0, 1, 1], [], []>} : vector<3x8xf32>, vector<8x1088xf32>, vector<3x1088xf32> -> vector<3x1088xf32>
    %68 = arith.addf %64, %67 : vector<3x1088xf32>
    %69 = vector.broadcast %2 : vector<3x1xf32> to vector<3x1088xf32>
    %70 = arith.addf %68, %69 : vector<3x1088xf32>
    %71 = math.tanh %70 : vector<3x1088xf32>
    %c0_50 = arith.constant 0 : index
    %c1_51 = arith.constant 1 : index
    %c0_52 = arith.constant 0 : index
    %c0_53 = arith.constant 0 : index
    %c0_54 = arith.constant 0 : index
    %72 = vector.load %arg4[%c0_50, %c1_51, %c0_52, %c0_53, %c0_54] : memref<1x2x2x3x1088xf32, #tpu.memory_space<vmem>>, vector<1x1x1x3x1088xf32>
    %73 = vector.shape_cast %72 : vector<1x1x1x3x1088xf32> to vector<3x1088xf32>
    %74 = vector.shape_cast %71 : vector<3x1088xf32> to vector<1x1x1x3x1088xf32>
    tpu.vector_store %arg4[%c0_50, %c1_51, %c0_52, %c0_53, %c0_54], %74 {strides = array<i32>} : memref<1x2x2x3x1088xf32, #tpu.memory_space<vmem>>, vector<1x1x1x3x1088xf32>,
    %c12 = arith.constant 12 : index
    %c0_55 = arith.constant 0 : index
    %c0_56 = arith.constant 0 : index
    %75 = vector.load %arg2[%c12, %c0_55, %c0_56] : memref<16x3x8xf32, #tpu.memory_space<vmem>>, vector<1x3x8xf32>
    %76 = vector.shape_cast %75 : vector<1x3x8xf32> to vector<3x8xf32>
    %cst_57 = arith.constant dense<0.000000e+00> : vector<3x1088xf32>
    %77 = tpu.matmul %76, %7, %cst_57 {dimension_numbers = #tpu.dot_dimension_numbers<[1], [0], [0], [1], [0, 0, 1, 1], [], []>} : vector<3x8xf32>, vector<8x1088xf32>, vector<3x1088xf32> -> vector<3x1088xf32>
    %c13 = arith.constant 13 : index
    %c0_58 = arith.constant 0 : index
    %c0_59 = arith.constant 0 : index
    %78 = vector.load %arg2[%c13, %c0_58, %c0_59] : memref<16x3x8xf32, #tpu.memory_space<vmem>>, vector<1x3x8xf32>
    %79 = vector.shape_cast %78 : vector<1x3x8xf32> to vector<3x8xf32>
    %cst_60 = arith.constant dense<0.000000e+00> : vector<3x1088xf32>
    %80 = tpu.matmul %79, %8, %cst_60 {dimension_numbers = #tpu.dot_dimension_numbers<[1], [0], [0], [1], [0, 0, 1, 1], [], []>} : vector<3x8xf32>, vector<8x1088xf32>, vector<3x1088xf32> -> vector<3x1088xf32>
    %81 = arith.addf %77, %80 : vector<3x1088xf32>
    %c14 = arith.constant 14 : index
    %c0_61 = arith.constant 0 : index
    %c0_62 = arith.constant 0 : index
    %82 = vector.load %arg2[%c14, %c0_61, %c0_62] : memref<16x3x8xf32, #tpu.memory_space<vmem>>, vector<1x3x8xf32>
    %83 = vector.shape_cast %82 : vector<1x3x8xf32> to vector<3x8xf32>
    %cst_63 = arith.constant dense<0.000000e+00> : vector<3x1088xf32>
    %84 = tpu.matmul %83, %10, %cst_63 {dimension_numbers = #tpu.dot_dimension_numbers<[1], [0], [0], [1], [0, 0, 1, 1], [], []>} : vector<3x8xf32>, vector<8x1088xf32>, vector<3x1088xf32> -> vector<3x1088xf32>
    %85 = arith.addf %81, %84 : vector<3x1088xf32>
    %c15 = arith.constant 15 : index
    %c0_64 = arith.constant 0 : index
    %c0_65 = arith.constant 0 : index
    %86 = vector.load %arg2[%c15, %c0_64, %c0_65] : memref<16x3x8xf32, #tpu.memory_space<vmem>>, vector<1x3x8xf32>
    %87 = vector.shape_cast %86 : vector<1x3x8xf32> to vector<3x8xf32>
    %cst_66 = arith.constant dense<0.000000e+00> : vector<3x1088xf32>
    %88 = tpu.matmul %87, %11, %cst_66 {dimension_numbers = #tpu.dot_dimension_numbers<[1], [0], [0], [1], [0, 0, 1, 1], [], []>} : vector<3x8xf32>, vector<8x1088xf32>, vector<3x1088xf32> -> vector<3x1088xf32>
    %89 = arith.addf %85, %88 : vector<3x1088xf32>
    %90 = vector.broadcast %2 : vector<3x1xf32> to vector<3x1088xf32>
    %91 = arith.addf %89, %90 : vector<3x1088xf32>
    %92 = math.tanh %91 : vector<3x1088xf32>
    %c0_67 = arith.constant 0 : index
    %c1_68 = arith.constant 1 : index
    %c1_69 = arith.constant 1 : index
    %c0_70 = arith.constant 0 : index
    %c0_71 = arith.constant 0 : index
    %93 = vector.load %arg4[%c0_67, %c1_68, %c1_69, %c0_70, %c0_71] : memref<1x2x2x3x1088xf32, #tpu.memory_space<vmem>>, vector<1x1x1x3x1088xf32>
    %94 = vector.shape_cast %93 : vector<1x1x1x3x1088xf32> to vector<3x1088xf32>
    %95 = vector.shape_cast %92 : vector<3x1088xf32> to vector<1x1x1x3x1088xf32>
    tpu.vector_store %arg4[%c0_67, %c1_68, %c1_69, %c0_70, %c0_71], %95 {strides = array<i32>} : memref<1x2x2x3x1088xf32, #tpu.memory_space<vmem>>, vector<1x1x1x3x1088xf32>,
    return
  }
  func.func @transform_0(%arg0: i32) -> (i32, i32, i32) {
    %c0_i32 = arith.constant 0 : i32
    %c0_i32_0 = arith.constant 0 : i32
    %c0_i32_1 = arith.constant 0 : i32
    return %arg0, %c0_i32, %c0_i32_0 : i32, i32, i32
  }
  func.func @transform_1(%arg0: i32) -> (i32, i32, i32) {
    %c0_i32 = arith.constant 0 : i32
    %c0_i32_0 = arith.constant 0 : i32
    %c0_i32_1 = arith.constant 0 : i32
    %c0_i32_2 = arith.constant 0 : i32
    return %c0_i32, %c0_i32_0, %c0_i32_1 : i32, i32, i32
  }
  func.func @transform_2(%arg0: i32) -> (i32, i32) {
    %c0_i32 = arith.constant 0 : i32
    %c0_i32_0 = arith.constant 0 : i32
    %c0_i32_1 = arith.constant 0 : i32
    return %c0_i32, %c0_i32_0 : i32, i32
  }
  func.func @transform_3(%arg0: i32) -> (i32, i32, i32, i32, i32) {
    %c0_i32 = arith.constant 0 : i32
    %c0_i32_0 = arith.constant 0 : i32
    %c0_i32_1 = arith.constant 0 : i32
    %c0_i32_2 = arith.constant 0 : i32
    %c0_i32_3 = arith.constant 0 : i32
    return %arg0, %c0_i32, %c0_i32_0, %c0_i32_1, %c0_i32_2 : i32, i32, i32, i32, i32
  }
}

</mosaic_0001>

<bundles_post_ra>
// kernel: g_nlayers_pallas.5
= control target key start
LH: loop header
LB: loop body
LE: loop exit
PB: predicated region body
PF: predicated region fallthrough
CT: control target
= control target key end

     0   :  { %8 = vsyncpa [#allocation3], 0  ;;  %s272_s12 = smov [#allocation2]   ;;  %s337_s0 = inlined_call_operand.hbm [shape: f32[2,16], index: 0, kind: input, shape index: {}]   ;;  %s338_s1 = inlined_call_operand.vmem [shape: f32[16,512], index: 1, kind: input, shape index: {}]   ;;  %s339_s2 = inlined_call_operand.vmem [shape: f32[1,512], index: 2, kind: input, shape index: {}]   ;;  %s340_s3 = inlined_call_operand.vmem [shape: f32[2,512], index: 3, kind: output, shape index: {}]  }
   0x1   :  { %s15_s13 = sshll.u32 %s272_s12, 4  ;;  %s248_s16 = scalar_lea.hbm %s337_s0, 32  ;;  %s16_s13 = int_to_ptr.vmem [resolvable:$true] %s15_s13 }
   0x2   :  { %p249_p0 = scmp.ne.s32.totalorder %s337_s0, %s248_s16  ;;  %p252_p1 = scmp.lt.u32.totalorder %s248_s16, %s337_s0 }
   0x4   :  { %p254_p2 = pnand %p252_p1, %p249_p0 }
   0x6   :  { %257 = shalt.err (!%p254_p2)
}
   0x7   :  { %s258_s21 = scalar_lea.vmem %s16_s13, 32  ;;  %p263_p4 = scmp.lt.s32.totalorder %s16_s13, %s16_s13 }
   0x8   :  { %p259_p3 = scmp.ne.s32.totalorder %s16_s13, %s258_s21  ;;  %p264_p5 = scmp.lt.s32.totalorder %s258_s21, %s258_s21 }
   0xa   :  { %p265_p6 = por %p264_p5, %p263_p4 }
   0xc   :  { %p266_p7 = pnand %p265_p6, %p259_p3 }
   0xe   :  { %269 = shalt.err (!%p266_p7)
}
   0xf   :  { %18 = dma.hbm_to_vmem [thread:$0]  %s337_s0, 32, %s16_s13, [#allocation3]  }
  0x10   :  { %270 = dma.done.wait [#allocation3], 32  }
  0x11   :  { %271 = vsyncadd [#allocation3], 4294967264  ;;  %v273_v0 = vmov 0.0   ;;  %v28_v1 = vld [vmem:[%s338_s1 + $0x8] sm:$0xff]  ;;  %v30_v3 = vld [vmem:[%s338_s1 + $0x18] sm:$0xff]  ;;  %vm57_vm0 = vcmask 130048   ;;  %v37_v14 = vlaneseq }
  0x12   :  { %125 = vmatprep.mubr.f32.mxu0 %v273_v0  ;;  %196 = vmatprep.mubr.f32.mxu1 %v273_v0  ;;  %v32_v2 = vld [vmem:[%s338_s1 + $0x28] sm:$0xff]  ;;  %v34_v5 = vld [vmem:[%s338_s1 + $0x38] sm:$0xff]  ;;  %v27_v6 = vld [vmem:[%s338_s1] sm:$0xff]  ;;  %v274_v21 = vmov 1983009808  }
  0x13   :  { %v237_v4 = vpack.c.bf16 %v32_v2, %v28_v1  ;;  %v31_v7 = vld [vmem:[%s338_s1 + $0x20] sm:$0xff]  ;;  %v241_v8 = vpack.c.bf16 %v34_v5, %v30_v3  ;;  %v29_v10 = vld [vmem:[%s338_s1 + $0x10] sm:$0xff]  ;;  %v38_v15 = vshrl.u32 %v37_v14, 7  ;;  %v214_v22 = vunpack.c.l.s4 %v274_v21 }
  0x14   :  { %v239_v9 = vpack.c.bf16 %v31_v7, %v27_v6  ;;  %v33_v11 = vld [vmem:[%s338_s1 + $0x30] sm:$0xff]  ;;  %v26_v13 = vld [vmem:[#allocation2] sm:$0x3] }
  0x15   :  { %238 = vmatprep.subr.bf16.mxu0 %v237_v4  ;;  %v243_v12 = vpack.c.bf16 %v33_v11, %v29_v10  ;;  %242 = vmatprep.subr.bf16.mxu1 %v241_v8  ;;  %v39_v16 = vsub.s32 0, %v38_v15  ;;  %v35_v17 = vld [vmem:[%s339_s2] sm:$0xf]  ;;  %v47_v18 = vsub.s32 2, %v38_v15  ;;  %v43_v19 = vsub.s32 1, %v38_v15 }
  0x16   :  { %240 = vmatpush1.bf16.msra.mxu0 %v239_v9  ;;  %v51_v20 = vsub.s32 3, %v38_v15  ;;  %v215_v28 = vunpack.c.0.s8 %v214_v22 }
  0x17   :  { %244 = vmatpush1.bf16.msra.mxu1 %v243_v12  ;;  %v40_v23 = vrot.slane %v35_v17, %v39_v16  ;;  %v48_v24 = vrot.slane %v35_v17, %v47_v18  ;;  %v44_v25 = vrot.slane %v35_v17, %v43_v19 }
  0x18   :  { %v52_v26 = vrot.slane %v35_v17, %v51_v20  ;;  %v218_v39 = vsub.s32 %v215_v28, %v38_v15 }
  0x19   :  { %235 = vmatmul.mubr.msk.f32.vlgmr.msra.gmra.mrb[0].mxu0 %vm57_vm0, %v26_v13 }
  0x1a   :  { %236 = vmatmul.mubr.msk.f32.vlgmr.msra.gmra.mrb[0].mxu1 %vm57_vm0, %v26_v13 }
  0xec   :  { %v127_v27 = vpop.f32.mrb[0].mxu0 }
  0xed   :  { %v128_v29 = vadd.f32 %v127_v27, %v40_v23  ;;  %v198_v30 = vpop.f32.mrb[0].mxu1  ;;  %v129_v31 = vpop.f32.mrb[1].mxu0 }
  0xee   :  { %v199_v32 = vadd.f32 %v198_v30, %v48_v24  ;;  %v130_v33 = vadd.f32 %v129_v31, %v44_v25  ;;  %v200_v34 = vpop.f32.mrb[1].mxu1 }
  0xef   :  { %v203_v35 = vmax.f32 %v128_v29, 0.0  ;;  %v201_v36 = vadd.f32 %v200_v34, %v52_v26 }
  0xf0   :  { %v205_v37 = vmax.f32 %v199_v32, 0.0  ;;  %v204_v38 = vmax.f32 %v130_v33, 0.0 }
  0xf1   :  { %v206_v40 = vmax.f32 %v201_v36, 0.0 }
  0xf2   :  { %v211_v41 = vcombine.low %v203_v35, %v204_v38 }
  0xf3   :  { %v212_v42 = vcombine.low %v205_v37, %v206_v40 }
  0xf4   :  { %v219_v43 = vrot.slane %v211_v41, %v218_v39 }
  0xf5   :  { %v226_v44 = vrot.slane %v212_v42, %v218_v39 }
  0xf7   :  { %v227_v45 = vcombine.low %v219_v43, %v226_v44 }
  0xf9   :  { %229 = vst [vmem:[%s340_s3] sm:$0xff] %v227_v45 }
  0xfa   :  { %234 = vsyncpa [#allocation3], 1 }

// kernel: g_nlayers_pallas.7
= control target key start
LH: loop header
LB: loop body
LE: loop exit
PB: predicated region body
PF: predicated region fallthrough
CT: control target
= control target key end

     0   :  { %s2192_s12 = smov 0   ;;  %s2399_s0 = inlined_call_operand.vmem [shape: f32[2,24,110], index: 0, kind: input, shape index: {}]   ;;  %s2400_s1 = inlined_call_operand.vmem [shape: f32[16,16,24], index: 1, kind: input, shape index: {}]   ;;  %s2401_s2 = inlined_call_operand.vmem [shape: f32[16,1], index: 2, kind: input, shape index: {}]   ;;  %s2402_s3 = inlined_call_operand.vmem [shape: f32[2,2,2,16,80], index: 3, kind: output, shape index: {}]  }
   0x1 LB: > { %s1704_s13 = sadd.s32 4294967295, %s2161_s12   ;;  %p1708_p0 = scmp.ge.s32.totalorder %s2161_s12, 1  ;;  %s2161_s12 = sphi %s2192_s12, %s13_s12  }
   0x2   : > { %p137_p1 = scmp.lt.s32.totalorder %s2161_s12, 3 }
   0x4   : > { %p138_p2 = pnand %p1708_p0, %p137_p1 }
   0x5   : > { %p161_p3 = scmp.lt.s32.totalorder (!%p138_p2), %s1704_s13, 1  ;;  %v1712_v0 = vld [vmem:[%s2400_s1 + $0x10] sm:$0xff] (!%p138_p2)  ;;  %vm193_vm0 = vcmask (!%p138_p2), 195584   ;;  %s2163_s20 = smov (!%p138_p2), 127   ;;  %v175_v7 = vld [vmem:[%s2401_s2 + $0x8] sm:$0xff] (!%p138_p2)  ;;  %v174_v8 = vld [vmem:[%s2401_s2] sm:$0xff] (!%p138_p2) }
   0x6   : > { %141 = sbr.rel (%p138_p2) target bundleno = 421 (0x1a5), region = 32  ;;  %1869 = vmatprep.mubr.msk.f32.mxu0 (!%p138_p2), %vm193_vm0, %v1712_v0  ;;  %v1728_v5 = vld [vmem:[%s2400_s1 + $0x50] sm:$0xff] (!%p138_p2)  ;;  %s2164_s23 = smov (!%p138_p2), 126   ;;  %v2171_v9 = vmov (!%p138_p2), 0   ;;  %v1713_v20 = vld [vmem:[%s2400_s1 + $0x18] sm:$0xff] (!%p138_p2)  ;;  %v176_v25 = vld [vmem:[%s2400_s1] sm:$0xff] (!%p138_p2) }
   0x7   : > { %1905 = vmatprep.mubr.msk.f32.mxu1 (!%p138_p2), %vm193_vm0, %v1728_v5  ;;  %s2165_s24 = smov (!%p138_p2), 117   ;;  %s2166_s25 = smov (!%p138_p2), 118   ;;  %2154 = vset.pattern.permute.xlu1 (!%p138_p2), %v2171_v9  ;;  %v1729_v26 = vld [vmem:[%s2400_s1 + $0x58] sm:$0xff] (!%p138_p2)  ;;  %v1726_v31 = vld [vmem:[%s2400_s1 + $0x40] sm:$0xff] (!%p138_p2)  ;;  %v177_v32 = vld [vmem:[%s2400_s1 + $0x8] sm:$0xff] (!%p138_p2)  ;;  %vm560_vm1 = vcmask (!%p138_p2), 654336  }
   0x8   : > { %s2167_s26 = smov (!%p138_p2), 116   ;;  %s2168_s27 = smov (!%p138_p2), 107   ;;  %2153 = vset.pattern.permute.xlu0 (!%p138_p2), %v2171_v9  ;;  %v1718_v35 = vld [vmem:[%s2400_s1 + $0x20] sm:$0xff] (!%p138_p2)  ;;  %v1727_v36 = vld [vmem:[%s2400_s1 + $0x48] sm:$0xff] (!%p138_p2)  ;;  %v1722_v43 = vld [vmem:[%s2400_s1 + $0x30] sm:$0xff] (!%p138_p2) }
   0x9   : > { %s2169_s28 = smov (!%p138_p2), 108   ;;  %s2170_s29 = smov (!%p138_p2), 106   ;;  %v1734_v40 = vld [vmem:[%s2400_s1 + $0x60] sm:$0xff] (!%p138_p2)  ;;  %v1719_v41 = vld [vmem:[%s2400_s1 + $0x28] sm:$0xff] (!%p138_p2)  ;;  %v1738_v46 = vld [vmem:[%s2400_s1 + $0x70] sm:$0xff] (!%p138_p2) }
   0xa   : > { %v1735_v44 = vld [vmem:[%s2400_s1 + $0x68] sm:$0xff] (!%p138_p2)  ;;  %v1723_v47 = vld [vmem:[%s2400_s1 + $0x38] sm:$0xff] (!%p138_p2)  ;;  %v1746_v48 = vld [vmem:[%s2400_s1 + $0x90] sm:$0xff] (!%p138_p2) }
   0xb   : > { %v1739_v49 = vld [vmem:[%s2400_s1 + $0x78] sm:$0xff] (!%p138_p2)  ;;  %v1764_v54 = vld [vmem:[%s2400_s1 + $0xd0] sm:$0xff] (!%p138_p2)  ;;  %v1744_v56 = vld [vmem:[%s2400_s1 + $0x80] sm:$0xff] (!%p138_p2) }
   0xc   : > { %v1747_v51 = vld [vmem:[%s2400_s1 + $0x98] sm:$0xff] (!%p138_p2)  ;;  %v1762_v62 = vld [vmem:[%s2400_s1 + $0xc0] sm:$0xff] (!%p138_p2)  ;;  %v1745_v63 = vld [vmem:[%s2400_s1 + $0x88] sm:$0xff] (!%p138_p2) }
   0xd   : > { %s2404_s13 = smov (!%p161_p3, %s1704_s13), 1  ;;  %v1765_v57 = vld [vmem:[%s2400_s1 + $0xd8] sm:$0xff] }
   0xe   : > { %s2095_s14 = smul.u32 24, %s2404_s13 }
  0x10   : > { %s165_s19 = scalar_lea.vmem %s2399_s0, %s2095_s14 }
  0x11   : > { %v171_v1 = vld [vmem:[%s165_s19] sm:$0xff]  ;;  %v172_v2 = vld [vmem:[%s165_s19 + $0x8] sm:$0xff]  ;;  %v2210_v3 = vld [vmem:[%s165_s19 + $0x10] sm:$0xff]  ;;  %s1782_s19 = sshll.u32 %s2404_s13, 6 }
  0x12   : > { %v2113_v4 = vpack.i.bf16 %v172_v2, %v171_v1  ;;  %188 = vrot.lane.b32.xlu1 %v2210_v3, %s2163_s20  ;;  %v2011_v6 = vpack.c.bf16 %v172_v2, %v171_v1  ;;  %v1752_v2 = vld [vmem:[%s2400_s1 + $0xa0] sm:$0xff]  ;;  %s170_s22 = scalar_lea.vmem %s2402_s3, %s1782_s19 }
  0x14   : > { %2114 = vrot.lane.b32.xlu0 %v2113_v4, %s2163_s20 }
  0x16   : > { %573 = vrot.lane.b32.xlu1 %v2210_v3, %s2164_s23 }
  0x18   : > { %2119 = vrot.lane.b32.xlu0 %v2113_v4, %s2164_s23 }
  0x1a   : > { %2129 = vrot.lane.b32.xlu1 %v2113_v4, %s2165_s24 }
  0x1c   : > { %2124 = vrot.lane.b32.xlu0 %v2113_v4, %s2166_s25 }
  0x1e   : > { %458 = vrot.lane.b32.xlu1 %v2210_v3, %s2165_s24 }
  0x20   : > { %363 = vrot.lane.b32.xlu0 %v2210_v3, %s2166_s25 }
  0x22   : > { %833 = vrot.lane.b32.xlu1 %v2210_v3, %s2167_s26 }
  0x24   : > { %2134 = vrot.lane.b32.xlu0 %v2113_v4, %s2167_s26 }
  0x26   : > { %2144 = vrot.lane.b32.xlu1 %v2113_v4, %s2168_s27 }
  0x28   : > { %2139 = vrot.lane.b32.xlu0 %v2113_v4, %s2169_s28 }
  0x2a   : > { %1198 = vrot.lane.b32.xlu1 %v2210_v3, %s2168_s27 }
  0x2c   : > { %1103 = vrot.lane.b32.xlu0 %v2210_v3, %s2169_s28 }
  0x2e   : > { %1554 = vrot.lane.b32.xlu1 %v2210_v3, %s2170_s29 }
  0x30   : > { %2149 = vrot.lane.b32.xlu0 %v2113_v4, %s2170_s29 }
  0x32   : > { %553 = vperm.xlu1 %2154, %v175_v7   ;;  %v1770_v7 = vld [vmem:[%s2400_s1 + $0xe0] sm:$0xff] }
  0x34   : > { %548 = vperm.xlu0 %2153, %v174_v8   ;;  %v1753_v8 = vld [vmem:[%s2400_s1 + $0xa8] sm:$0xff] }
  0x84   : > { %v189_v11 = vpop.permute.xlu1 %188 }
  0x86   : > { %v2115_v10 = vpop.permute.xlu0 %2114 }
  0x87   : > { %v2117_v12 = vunpack.i.h.bf16 %v2115_v10  ;;  %v2116_v13 = vunpack.i.l.bf16 %v2115_v10  ;;  %v1756_v10 = vld [vmem:[%s2400_s1 + $0xb0] sm:$0xff] }
  0x88   : > { %v574_v18 = vpop.permute.xlu1 %573 }
  0x89   : > { %v2007_v14 = vpack.c.bf16 %v2117_v12, %v2116_v13  ;;  %v1774_v13 = vld [vmem:[%s2400_s1 + $0xf0] sm:$0xff] }
  0x8a   : > { %v2120_v15 = vpop.permute.xlu0 %2119 }
  0x8b   : > { %v2122_v16 = vunpack.i.h.bf16 %v2120_v15  ;;  %v2121_v17 = vunpack.i.l.bf16 %v2120_v15  ;;  %2008 = vmatprep.subr.bf16.mxu0 %v2007_v14  ;;  %v1775_v15 = vld [vmem:[%s2400_s1 + $0xf8] sm:$0xff] }
  0x8c   : > { %2010 = vmatpush3.bf16.msra.mxu0 %v2007_v14  ;;  %v2130_v24 = vpop.permute.xlu1 %2129 }
  0x8d   : > { %1867 = vmatprep.subr.mxu0 %v189_v11  ;;  %v2023_v19 = vpack.c.bf16 %v2122_v16, %v2121_v17  ;;  %v2132_v29 = vunpack.i.h.bf16 %v2130_v24  ;;  %v2131_v30 = vunpack.i.l.bf16 %v2130_v24 }
  0x8e   : > { %v2125_v21 = vpop.permute.xlu0 %2124 }
  0x8f   : > { %2024 = vmatprep.subr.bf16.mxu1 %v2023_v19  ;;  %v2127_v22 = vunpack.i.h.bf16 %v2125_v21  ;;  %v2126_v23 = vunpack.i.l.bf16 %v2125_v21  ;;  %v2254_v33 = vpack.c.bf16 %v2132_v29, %v2131_v30 }
  0x90   : > { %1868 = vmatpush3.msra.mxu0 %v189_v11  ;;  %2026 = vmatpush3.bf16.msra.mxu1 %v2023_v19  ;;  %v2268_v39 = vpop.permute.xlu1 %458 }
  0x91   : > { %1870 = vmatmul.mubr.msk.f32.vlgmr.msra.gmra.mrb[0].mxu0 %vm193_vm0, %v1713_v20  ;;  %2012 = vmatprep.subr.bf16.mxu0 %v2011_v6  ;;  %v2242_v28 = vpack.c.bf16 %v2127_v22, %v2126_v23 }
  0x92   : > { %2014 = vmatpush3.bf16.msra.mxu0 %v2011_v6  ;;  %1903 = vmatprep.subr.mxu1 %v574_v18  ;;  %v2240_v27 = vpop.permute.xlu0 %363 }
  0x93   : > { %1876 = vmatprep.subr.mxu0 %v2210_v3  ;;  %1878 = vmatprep.mubr.msk.f32.mxu0 %vm193_vm0, %v176_v25 }
  0x94   : > { %1904 = vmatpush3.msra.mxu1 %v574_v18  ;;  %v834_v45 = vpop.permute.xlu1 %833 }
  0x95   : > { %1906 = vmatmul.mubr.msk.f32.vlgmr.msra.gmra.mrb[0].mxu1 %vm193_vm0, %v1729_v26  ;;  %2028 = vmatprep.subr.bf16.mxu1 %v2007_v14 }
  0x96   : > { %2030 = vmatpush3.bf16.msra.mxu1 %v2007_v14  ;;  %1877 = vmatpush3.msra.mxu0 %v2210_v3  ;;  %v2135_v34 = vpop.permute.xlu0 %2134  ;;  %v1763_v3 = vld [vmem:[%s2400_s1 + $0xc8] sm:$0xff]  ;;  %v1757_v14 = vld [vmem:[%s2400_s1 + $0xb8] sm:$0xff] }
  0x97   : > { %1912 = vmatprep.subr.mxu1 %v189_v11  ;;  %2016 = vmatprep.subr.bf16.mxu0 %v2242_v28  ;;  %v2137_v37 = vunpack.i.h.bf16 %v2135_v34  ;;  %v2136_v38 = vunpack.i.l.bf16 %v2135_v34 }
  0x98   : > { %1914 = vmatprep.mubr.msk.f32.mxu1 %vm193_vm0, %v1726_v31  ;;  %v2145_v55 = vpop.permute.xlu1 %2144 }
  0x99   : > { %1879 = vmatmul.mubr.msk.f32.vlgmr.msra.gmra.mrb[0].mxu0 %vm193_vm0, %v177_v32  ;;  %v2035_v42 = vpack.c.bf16 %v2137_v37, %v2136_v38  ;;  %v2147_v60 = vunpack.i.h.bf16 %v2145_v55  ;;  %v2146_v61 = vunpack.i.l.bf16 %v2145_v55 }
  0x9a   : > { %2018 = vmatpush3.bf16.msra.mxu0 %v2242_v28  ;;  %1913 = vmatpush3.msra.mxu1 %v189_v11  ;;  %v2140_v50 = vpop.permute.xlu0 %2139  ;;  %v1771_v11 = vld [vmem:[%s2400_s1 + $0xe8] sm:$0xff] }
  0x9b   : > { %1885 = vmatprep.subr.mxu0 %v2240_v27  ;;  %2032 = vmatprep.subr.bf16.mxu1 %v2254_v33  ;;  %v2142_v52 = vunpack.i.h.bf16 %v2140_v50  ;;  %v2141_v53 = vunpack.i.l.bf16 %v2140_v50  ;;  %v2051_v0 = vpack.c.bf16 %v2147_v60, %v2146_v61 }
  0x9c   : > { %1887 = vmatprep.mubr.msk.f32.mxu0 %vm193_vm0, %v1718_v35  ;;  %v1199_v6 = vpop.permute.xlu1 %1198 }
  0x9d   : > { %1915 = vmatmul.mubr.msk.f32.vlgmr.msra.gmra.mrb[0].mxu1 %vm193_vm0, %v1727_v36  ;;  %v2047_v59 = vpack.c.bf16 %v2142_v52, %v2141_v53 }
  0x9e   : > { %1886 = vmatpush3.msra.mxu0 %v2240_v27  ;;  %2034 = vmatpush3.bf16.msra.mxu1 %v2254_v33  ;;  %v1104_v58 = vpop.permute.xlu0 %1103 }
  0x9f   : > { %2020 = vmatprep.subr.bf16.mxu0 %v2254_v33  ;;  %1921 = vmatprep.subr.mxu1 %v2268_v39 }
  0xa0   : > { %1923 = vmatprep.mubr.msk.f32.mxu1 %vm193_vm0, %v1734_v40  ;;  %v1555_v12 = vpop.permute.xlu1 %1554 }
  0xa1   : > { %1888 = vmatmul.mubr.msk.f32.vlgmr.msra.gmra.mrb[0].mxu0 %vm193_vm0, %v1719_v41 }
  0xa2   : > { %2022 = vmatpush3.bf16.msra.mxu0 %v2254_v33  ;;  %1922 = vmatpush3.msra.mxu1 %v2268_v39  ;;  %v2150_v1 = vpop.permute.xlu0 %2149 }
  0xa3   : > { %1894 = vmatprep.subr.mxu0 %v2268_v39  ;;  %2036 = vmatprep.subr.bf16.mxu1 %v2035_v42  ;;  %v2152_v4 = vunpack.i.h.bf16 %v2150_v1  ;;  %v2151_v5 = vunpack.i.l.bf16 %v2150_v1 }
  0xa4   : > { %1896 = vmatprep.mubr.msk.f32.mxu0 %vm193_vm0, %v1722_v43 }
  0xa5   : > { %1924 = vmatmul.mubr.msk.f32.vlgmr.msra.gmra.mrb[0].mxu1 %vm193_vm0, %v1735_v44  ;;  %v2067_v9 = vpack.c.bf16 %v2152_v4, %v2151_v5 }
  0xa6   : > { %1895 = vmatpush3.msra.mxu0 %v2268_v39  ;;  %2038 = vmatpush3.bf16.msra.mxu1 %v2035_v42 }
  0xa7   : > { %2040 = vmatprep.subr.bf16.mxu0 %v2254_v33  ;;  %1930 = vmatprep.subr.mxu1 %v834_v45 }
  0xa8   : > { %1932 = vmatprep.mubr.msk.f32.mxu1 %vm193_vm0, %v1738_v46 }
  0xa9   : > { %1897 = vmatmul.mubr.msk.f32.vlgmr.msra.gmra.mrb[0].mxu0 %vm193_vm0, %v1723_v47 }
  0xaa   : > { %1931 = vmatpush3.msra.mxu1 %v834_v45  ;;  %2042 = vmatpush3.bf16.msra.mxu0 %v2254_v33 }
  0xab   : > { %1939 = vmatprep.subr.mxu0 %v2268_v39  ;;  %2056 = vmatprep.subr.bf16.mxu1 %v2035_v42 }
  0xac   : > { %1941 = vmatprep.mubr.msk.f32.mxu0 %vm193_vm0, %v1746_v48 }
  0xad   : > { %1933 = vmatmul.mubr.msk.f32.vlgmr.msra.gmra.mrb[0].mxu1 %vm193_vm0, %v1739_v49 }
  0xae   : > { %1940 = vmatpush3.msra.mxu0 %v2268_v39  ;;  %2058 = vmatpush3.bf16.msra.mxu1 %v2035_v42 }
  0xaf   : > { %1942 = vmatmul.mubr.msk.f32.vlgmr.msra.gmra.mrb[2].mxu0 %vm193_vm0, %v1747_v51  ;;  %2044 = vmatprep.subr.bf16.mxu0 %v2242_v28 }
  0xb0   : > { %1975 = vmatprep.subr.mxu1 %v834_v45  ;;  %2046 = vmatpush3.bf16.msra.mxu0 %v2242_v28 }
  0xb1   : > { %1948 = vmatprep.subr.mxu0 %v2240_v27  ;;  %1977 = vmatprep.mubr.msk.f32.mxu1 %vm193_vm0, %v1764_v54  ;;  %v554_v16 = vpop.permute.xlu1 %553 }
  0xb2   : > { %1976 = vmatpush3.msra.mxu1 %v834_v45  ;;  %1950 = vmatprep.mubr.msk.f32.mxu0 %vm193_vm0, %v1744_v56 }
  0xb3   : > { %1978 = vmatmul.mubr.msk.f32.vlgmr.msra.gmra.mrb[2].mxu1 %vm193_vm0, %v1765_v57  ;;  %2060 = vmatprep.subr.bf16.mxu1 %v2254_v33  ;;  %v549_v17 = vpop.permute.xlu0 %548 }
  0xb4   : > { %1949 = vmatpush3.msra.mxu0 %v2240_v27  ;;  %2062 = vmatpush3.bf16.msra.mxu1 %v2254_v33 }
  0xb5   : > { %1984 = vmatprep.subr.mxu1 %v2268_v39  ;;  %2048 = vmatprep.subr.bf16.mxu0 %v2047_v59 }
  0xb6   : > { %1986 = vmatprep.mubr.msk.f32.mxu1 %vm193_vm0, %v1762_v62 }
  0xb7   : > { %1951 = vmatmul.mubr.msk.f32.vlgmr.msra.gmra.mrb[2].mxu0 %vm193_vm0, %v1745_v63 }
  0xb8   : > { %2050 = vmatpush3.bf16.msra.mxu0 %v2047_v59  ;;  %1985 = vmatpush3.msra.mxu1 %v2268_v39 }
  0xb9   : > { %1957 = vmatprep.subr.mxu0 %v1104_v58  ;;  %2064 = vmatprep.subr.bf16.mxu1 %v2051_v0 }
  0xba   : > { %1959 = vmatprep.mubr.msk.f32.mxu0 %vm193_vm0, %v1752_v2 }
  0xbb   : > { %1987 = vmatmul.mubr.msk.f32.vlgmr.msra.gmra.mrb[2].mxu1 %vm193_vm0, %v1763_v3 }
  0xbc   : > { %1958 = vmatpush3.msra.mxu0 %v1104_v58  ;;  %2066 = vmatpush3.bf16.msra.mxu1 %v2051_v0 }
  0xbd   : > { %2052 = vmatprep.subr.bf16.mxu0 %v2051_v0  ;;  %1993 = vmatprep.subr.mxu1 %v1199_v6 }
  0xbe   : > { %1995 = vmatprep.mubr.msk.f32.mxu1 %vm193_vm0, %v1770_v7 }
  0xbf   : > { %1960 = vmatmul.mubr.msk.f32.vlgmr.msra.gmra.mrb[2].mxu0 %vm193_vm0, %v1753_v8 }
  0xc0   : > { %2054 = vmatpush3.bf16.msra.mxu0 %v2051_v0  ;;  %1994 = vmatpush3.msra.mxu1 %v1199_v6 }
  0xc1   : > { %1966 = vmatprep.subr.mxu0 %v1199_v6  ;;  %2068 = vmatprep.subr.bf16.mxu1 %v2067_v9 }
  0xc2   : > { %1968 = vmatprep.mubr.msk.f32.mxu0 %vm193_vm0, %v1756_v10 }
  0xc3   : > { %1996 = vmatmul.mubr.msk.f32.vlgmr.msra.gmra.mrb[2].mxu1 %vm193_vm0, %v1771_v11 }
  0xc4   : > { %1967 = vmatpush3.msra.mxu0 %v1199_v6  ;;  %2070 = vmatpush3.bf16.msra.mxu1 %v2067_v9 }
  0xc5   : > { %2002 = vmatprep.subr.mxu1 %v1555_v12  ;;  %2004 = vmatprep.mubr.msk.f32.mxu1 %vm193_vm0, %v1774_v13 }
  0xc7   : > { %1969 = vmatmul.mubr.msk.f32.vlgmr.msra.gmra.mrb[2].mxu0 %vm193_vm0, %v1757_v14 }
  0xc8   : > { %2003 = vmatpush3.msra.mxu1 %v1555_v12 }
  0xcb   : > { %2005 = vmatmul.mubr.msk.f32.vlgmr.msra.gmra.mrb[2].mxu1 %vm193_vm0, %v1775_v15 }
 0x17c   : > { %v1898_v18 = vpop.f32.mrb[0].mxu0 }
 0x17d   : > { %v557_v19 = vadd.f32 %v1898_v18, %v554_v16  ;;  %v535_v20 = vpop.f32.mrb[1].mxu0 }
 0x17e   : > { %v556_v21 = vadd.f32 %v549_v17, %v535_v20 }
 0x17f   : > { %v559_v22 = vmax.f32 %v557_v19, 0.0 }
 0x180   : > { %v558_v23 = vmax.f32 %v556_v21, 0.0  ;;  %v1934_v24 = vpop.f32.mrb[0].mxu1 }
 0x181   : > { %562 = vst.msk [vmem:[%s170_s22 + $0x8] sm:$0xff] %vm560_vm1, %v559_v22  ;;  %v922_v25 = vadd.f32 %v1934_v24, %v554_v16  ;;  %v910_v26 = vpop.f32.mrb[1].mxu1 }
 0x182   : > { %561 = vst.msk [vmem:[%s170_s22] sm:$0xff] %vm560_vm1, %v558_v23  ;;  %v921_v27 = vadd.f32 %v910_v26, %v549_v17 }
 0x183   : > { %v924_v28 = vmax.f32 %v922_v25, 0.0 }
 0x184   : > { %v923_v29 = vmax.f32 %v921_v27, 0.0 }
 0x185   : > { %1743 = vst.msk [vmem:[%s170_s22 + $0x18] sm:$0xff] %vm560_vm1, %v924_v28 }
 0x186   : > { %1742 = vst.msk [vmem:[%s170_s22 + $0x10] sm:$0xff] %vm560_vm1, %v923_v29 }
 0x19a   : > { %v1970_v30 = vpop.f32.mrb[2].mxu0 }
 0x19b   : > { %v1287_v31 = vadd.f32 %v1970_v30, %v554_v16  ;;  %v1275_v32 = vpop.f32.mrb[3].mxu0 }
 0x19c   : > { %v1286_v33 = vadd.f32 %v1275_v32, %v549_v17 }
 0x19d   : > { %v1289_v34 = vmax.f32 %v1287_v31, 0.0 }
 0x19e   : > { %v1288_v35 = vmax.f32 %v1286_v33, 0.0  ;;  %v2006_v36 = vpop.f32.mrb[2].mxu1 }
 0x19f   : > { %1761 = vst.msk [vmem:[%s170_s22 + $0x28] sm:$0xff] %vm560_vm1, %v1289_v34  ;;  %v1643_v37 = vadd.f32 %v2006_v36, %v554_v16  ;;  %v1631_v38 = vpop.f32.mrb[3].mxu1 }
 0x1a0   : > { %1760 = vst.msk [vmem:[%s170_s22 + $0x20] sm:$0xff] %vm560_vm1, %v1288_v35  ;;  %v1642_v39 = vadd.f32 %v1631_v38, %v549_v17 }
 0x1a1   : > { %v1645_v40 = vmax.f32 %v1643_v37, 0.0 }
 0x1a2   : > { %v1644_v41 = vmax.f32 %v1642_v39, 0.0 }
 0x1a3   : > { %1779 = vst.msk [vmem:[%s170_s22 + $0x38] sm:$0xff] %vm560_vm1, %v1645_v40 }
 0x1a4   : > { %1778 = vst.msk [vmem:[%s170_s22 + $0x30] sm:$0xff] %vm560_vm1, %v1644_v41 }
 0x1a5 PF: > { %s13_s12 = sadd.s32 1, %s2161_s12  }
 0x1a6   : > { %p10_p4 = scmp.ge.s32.totalorder %s13_s12, 4  }
 0x1a8   :  { %12 = sbr.rel (!%p10_p4) target bundleno = 1 (0x1), region = 80 }

// kernel: g_nlayers_pallas.6
= control target key start
LH: loop header
LB: loop body
LE: loop exit
PB: predicated region body
PF: predicated region fallthrough
CT: control target
= control target key end

     0   :  { %s2636_s12 = smov 0   ;;  %s3066_s0 = inlined_call_operand.vmem [shape: f32[2,32,42], index: 0, kind: input, shape index: {}]   ;;  %s3067_s1 = inlined_call_operand.vmem [shape: f32[16,24,32], index: 1, kind: input, shape index: {}]   ;;  %s3068_s2 = inlined_call_operand.vmem [shape: f32[24,1], index: 2, kind: input, shape index: {}]   ;;  %s3069_s3 = inlined_call_operand.vmem [shape: f32[2,2,2,24,24], index: 3, kind: output, shape index: {}]  }
   0x1 LB: > { %s1900_s13 = sadd.s32 4294967295, %s2602_s12   ;;  %p1904_p0 = scmp.ge.s32.totalorder %s2602_s12, 1  ;;  %s2602_s12 = sphi %s2636_s12, %s13_s12  }
   0x2   : > { %p137_p1 = scmp.lt.s32.totalorder %s2602_s12, 3 }
   0x4   : > { %p138_p2 = pnand %p1904_p0, %p137_p1 }
   0x5   : > { %p161_p3 = scmp.lt.s32.totalorder (!%p138_p2), %s1900_s13, 1  ;;  %v2604_v0 = vmov (!%p138_p2), 0.0|0.0   ;;  %vm2605_vm0 = vmmov (!%p138_p2), 0   ;;  %v2606_v1 = vmov (!%p138_p2), 0.0   ;;  %s2607_s18 = smov (!%p138_p2), 122   ;;  %v178_v10 = vld [vmem:[%s3067_s1] sm:$0xff] (!%p138_p2) }
   0x6   : > { %141 = sbr.rel (%p138_p2) target bundleno = 458 (0x1ca), region = 32  ;;  %2403 = vmatprep.subr.bf16.mxu1 (!%p138_p2), %v2604_v0  ;;  %2150 = vmatprep.mubr.msk.f32.mxu1 (!%p138_p2), %vm2605_vm0, %v2606_v1  ;;  %s2608_s19 = smov (!%p138_p2), 127   ;;  %vm201_vm1 = vcmask (!%p138_p2), 261120   ;;  %v179_v11 = vld [vmem:[%s3067_s1 + $0x8] sm:$0xff] (!%p138_p2)  ;;  %v180_v12 = vld [vmem:[%s3067_s1 + $0x10] sm:$0xff] (!%p138_p2)  ;;  %v175_v13 = vld [vmem:[%s3068_s2] sm:$0xff] (!%p138_p2) }
   0x7   : > { %2397 = vmatprep.subr.bf16.mxu0 (!%p138_p2), %v2604_v0  ;;  %2133 = vmatprep.mubr.msk.f32.mxu0 (!%p138_p2), %vm2605_vm0, %v2606_v1  ;;  %s2609_s20 = smov (!%p138_p2), 121   ;;  %s2610_s23 = smov (!%p138_p2), 126   ;;  %v176_v14 = vld [vmem:[%s3068_s2 + $0x8] sm:$0xff] (!%p138_p2)  ;;  %v2615_v15 = vmov (!%p138_p2), 0   ;;  %v177_v16 = vld [vmem:[%s3068_s2 + $0x10] sm:$0xff] (!%p138_p2)  ;;  %v1908_v37 = vld [vmem:[%s3067_s1 + $0x18] sm:$0xff] (!%p138_p2) }
   0x8   : > { %s2611_s26 = smov (!%p138_p2), 120   ;;  %s2612_s29 = smov (!%p138_p2), 115   ;;  %2594 = vset.pattern.permute.xlu0 (!%p138_p2), %v2615_v15  ;;  %2595 = vset.pattern.permute.xlu1 (!%p138_p2), %v2615_v15  ;;  %v1909_v41 = vld [vmem:[%s3067_s1 + $0x20] sm:$0xff] (!%p138_p2)  ;;  %v1923_v42 = vld [vmem:[%s3067_s1 + $0x48] sm:$0xff] (!%p138_p2)  ;;  %v1924_v48 = vld [vmem:[%s3067_s1 + $0x50] sm:$0xff] (!%p138_p2)  ;;  %vm617_vm2 = vcmask (!%p138_p2), 195584  }
   0x9   : > { %s2613_s30 = smov (!%p138_p2), 116   ;;  %s2614_s4 = smov (!%p138_p2), 114   ;;  %v1910_v47 = vld [vmem:[%s3067_s1 + $0x28] sm:$0xff] (!%p138_p2)  ;;  %v1917_v52 = vld [vmem:[%s3067_s1 + $0x30] sm:$0xff] (!%p138_p2)  ;;  %v1925_v53 = vld [vmem:[%s3067_s1 + $0x58] sm:$0xff] (!%p138_p2) }
   0xa   : > { %v1918_v60 = vld [vmem:[%s3067_s1 + $0x38] sm:$0xff] (!%p138_p2)  ;;  %v1929_v61 = vld [vmem:[%s3067_s1 + $0x60] sm:$0xff] (!%p138_p2) }
   0xd   : > { %s3071_s13 = smov (!%p161_p3, %s1900_s13), 1 }
   0xe   : > { %s2012_s14 = sshll.u32 %s3071_s13, 5  ;;  %s2493_s28 = smul.u32 96, %s3071_s13 }
   0xf   : > { %s165_s17 = scalar_lea.vmem %s3066_s0, %s2012_s14 }
  0x10   : > { %v171_v2 = vld [vmem:[%s165_s17] sm:$0xff]  ;;  %v172_v3 = vld [vmem:[%s165_s17 + $0x8] sm:$0xff]  ;;  %v173_v4 = vld [vmem:[%s165_s17 + $0x10] sm:$0xff] }
  0x11   : > { %v2524_v5 = vpack.i.bf16 %v172_v3, %v171_v2  ;;  %v174_v6 = vld [vmem:[%s165_s17 + $0x18] sm:$0xff]  ;;  %v2404_v8 = vpack.c.bf16 %v172_v3, %v171_v2  ;;  %v1919_v3 = vld [vmem:[%s3067_s1 + $0x40] sm:$0xff] }
  0x12   : > { %v2519_v7 = vpack.i.bf16 %v174_v6, %v173_v4  ;;  %v2407_v9 = vpack.c.bf16 %v174_v6, %v173_v4  ;;  %v1930_v4 = vld [vmem:[%s3067_s1 + $0x68] sm:$0xff]  ;;  %v1932_v6 = vld [vmem:[%s3067_s1 + $0x78] sm:$0xff] }
  0x13   : > { %2525 = vrot.lane.b32.xlu1 %v2524_v5, %s2607_s18  ;;  %2515 = vrot.lane.b32.xlu0 %v2524_v5, %s2608_s19 }
  0x14   : > { %2405 = vmatpush3.bf16.msra.mxu1 %v2404_v8  ;;  %v1933_v8 = vld [vmem:[%s3067_s1 + $0x80] sm:$0xff] }
  0x15   : > { %2406 = vmatprep.subr.bf16.mxu1 %v2604_v0 }
  0x17   : > { %2530 = vrot.lane.b32.xlu1 %v2524_v5, %s2609_s20  ;;  %2520 = vrot.lane.b32.xlu0 %v2519_v7, %s2608_s19 }
  0x18   : > { %2408 = vmatpush3.bf16.msra.mxu1 %v2407_v9  ;;  %v1947_v9 = vld [vmem:[%s3067_s1 + $0xa8] sm:$0xff] }
  0x19   : > { %2415 = vmatprep.subr.bf16.mxu1 %v2604_v0 }
  0x1b   : > { %2540 = vrot.lane.b32.xlu1 %v2519_v7, %s2609_s20  ;;  %2535 = vrot.lane.b32.xlu0 %v2519_v7, %s2607_s18 }
  0x1c   : > { %2151 = vmatmul.mubr.msk.f32.vlgmr.msra.gmra.mrb[0].mxu1 %vm201_vm1, %v178_v10  ;;  %v1934_v10 = vld [vmem:[%s3067_s1 + $0x88] sm:$0xff] }
  0x1d   : > { %2153 = vmatprep.mubr.msk.f32.mxu1 %vm2605_vm0, %v2606_v1 }
  0x1f   : > { %2545 = vrot.lane.b32.xlu0 %v2524_v5, %s2610_s23  ;;  %2550 = vrot.lane.b32.xlu1 %v2519_v7, %s2610_s23 }
  0x20   : > { %2154 = vmatmul.mubr.msk.f32.gmra.mrb[2].mxu1 %vm201_vm1, %v179_v11  ;;  %v1948_v11 = vld [vmem:[%s3067_s1 + $0xb0] sm:$0xff] }
  0x21   : > { %2156 = vmatprep.mubr.msk.f32.mxu1 %vm2605_vm0, %v2606_v1 }
  0x23   : > { %2555 = vrot.lane.b32.xlu0 %v2524_v5, %s2611_s26  ;;  %2560 = vrot.lane.b32.xlu1 %v2519_v7, %s2611_s26 }
  0x24   : > { %2157 = vmatmul.mubr.msk.f32.gmra.mrb[4].mxu1 %vm201_vm1, %v180_v12 }
  0x25   : > { %2184 = vmatprep.mubr.msk.f32.mxu1 %vm2605_vm0, %v2606_v1 }
  0x27   : > { %2570 = vrot.lane.b32.xlu1 %v2524_v5, %s2612_s29  ;;  %2565 = vrot.lane.b32.xlu0 %v2524_v5, %s2613_s30 }
  0x2b   : > { %2580 = vrot.lane.b32.xlu1 %v2519_v7, %s2612_s29  ;;  %2575 = vrot.lane.b32.xlu0 %v2519_v7, %s2613_s30 }
  0x2f   : > { %2585 = vrot.lane.b32.xlu0 %v2524_v5, %s2614_s4  ;;  %2590 = vrot.lane.b32.xlu1 %v2519_v7, %s2614_s4  ;;  %v1931_v7 = vld [vmem:[%s3067_s1 + $0x70] sm:$0xff]  ;;  %s3024_s4 = scalar_lea.vmem %s3069_s3, %s2493_s28 }
  0x33   : > { %598 = vperm.xlu0 %2594, %v175_v13   ;;  %603 = vperm.xlu1 %2595, %v176_v14   ;;  %v1941_v13 = vld [vmem:[%s3067_s1 + $0x90] sm:$0xff]  ;;  %v1949_v14 = vld [vmem:[%s3067_s1 + $0xb8] sm:$0xff] }
  0x37   : > { %608 = vperm.xlu1 %2595, %v177_v16  }
  0x85   : > { %v2526_v17 = vpop.permute.xlu1 %2525  ;;  %v2516_v18 = vpop.permute.xlu0 %2515 }
  0x86   : > { %v2518_v19 = vunpack.i.h.bf16 %v2516_v18  ;;  %v2517_v20 = vunpack.i.l.bf16 %v2516_v18  ;;  %v2528_v22 = vunpack.i.h.bf16 %v2526_v17  ;;  %v2527_v23 = vunpack.i.l.bf16 %v2526_v17  ;;  %v1942_v18 = vld [vmem:[%s3067_s1 + $0x98] sm:$0xff] }
  0x88   : > { %v2398_v21 = vpack.c.bf16 %v2518_v19, %v2517_v20  ;;  %v2688_v34 = vpack.c.bf16 %v2528_v22, %v2527_v23  ;;  %v1956_v19 = vld [vmem:[%s3067_s1 + $0xc0] sm:$0xff] }
  0x89   : > { %v2531_v24 = vpop.permute.xlu1 %2530  ;;  %v2521_v25 = vpop.permute.xlu0 %2520 }
  0x8a   : > { %v2533_v26 = vunpack.i.h.bf16 %v2531_v24  ;;  %v2532_v27 = vunpack.i.l.bf16 %v2531_v24  ;;  %v2523_v28 = vunpack.i.h.bf16 %v2521_v25  ;;  %v2522_v29 = vunpack.i.l.bf16 %v2521_v25  ;;  %2399 = vmatpush3.bf16.msra.mxu0 %v2398_v21 }
  0x8b   : > { %2400 = vmatprep.subr.bf16.mxu0 %v2604_v0 }
  0x8c   : > { %v2686_v30 = vpack.c.bf16 %v2533_v26, %v2532_v27  ;;  %v2401_v31 = vpack.c.bf16 %v2523_v28, %v2522_v29  ;;  %v1943_v26 = vld [vmem:[%s3067_s1 + $0xa0] sm:$0xff]  ;;  %v1957_v27 = vld [vmem:[%s3067_s1 + $0xc8] sm:$0xff] }
  0x8d   : > { %v2541_v32 = vpop.permute.xlu1 %2540  ;;  %v2536_v33 = vpop.permute.xlu0 %2535 }
  0x8e   : > { %v2543_v35 = vunpack.i.h.bf16 %v2541_v32  ;;  %v2542_v36 = vunpack.i.l.bf16 %v2541_v32  ;;  %2402 = vmatpush3.bf16.msra.mxu0 %v2401_v31  ;;  %2417 = vmatpush3.bf16.msra.mxu1 %v2686_v30  ;;  %v2538_v38 = vunpack.i.h.bf16 %v2536_v33  ;;  %v2537_v39 = vunpack.i.l.bf16 %v2536_v33  ;;  %v1959_v32 = vld [vmem:[%s3067_s1 + $0xd8] sm:$0xff]  ;;  %v1958_v33 = vld [vmem:[%s3067_s1 + $0xd0] sm:$0xff] }
  0x8f   : > { %2409 = vmatprep.subr.bf16.mxu0 %v2604_v0  ;;  %2418 = vmatprep.subr.bf16.mxu1 %v2604_v0 }
  0x90   : > { %v2696_v40 = vpack.c.bf16 %v2543_v35, %v2542_v36  ;;  %v2707_v44 = vpack.c.bf16 %v2538_v38, %v2537_v39  ;;  %v1960_v36 = vld [vmem:[%s3067_s1 + $0xe0] sm:$0xff]  ;;  %v1961_v39 = vld [vmem:[%s3067_s1 + $0xe8] sm:$0xff] }
  0x91   : > { %2134 = vmatmul.mubr.msk.f32.vlgmr.msra.gmra.mrb[0].mxu0 %vm201_vm1, %v1908_v37  ;;  %v2546_v43 = vpop.permute.xlu0 %2545  ;;  %v2551_v49 = vpop.permute.xlu1 %2550  ;;  %v1974_v37 = vld [vmem:[%s3067_s1 + $0x108] sm:$0xff] }
  0x92   : > { %2411 = vmatpush3.bf16.msra.mxu0 %v2688_v34  ;;  %2420 = vmatpush3.bf16.msra.mxu1 %v2696_v40  ;;  %v2548_v45 = vunpack.i.h.bf16 %v2546_v43  ;;  %v2547_v46 = vunpack.i.l.bf16 %v2546_v43  ;;  %v2553_v54 = vunpack.i.h.bf16 %v2551_v49  ;;  %v2552_v55 = vunpack.i.l.bf16 %v2551_v49  ;;  %v1976_v43 = vld [vmem:[%s3067_s1 + $0x118] sm:$0xff] }
  0x93   : > { %2136 = vmatprep.mubr.msk.f32.mxu0 %vm2605_vm0, %v2606_v1  ;;  %2427 = vmatprep.subr.bf16.mxu1 %v2604_v0 }
  0x94   : > { %2412 = vmatprep.subr.bf16.mxu0 %v2604_v0  ;;  %v2422_v51 = vpack.c.bf16 %v2548_v45, %v2547_v46  ;;  %v2425_v59 = vpack.c.bf16 %v2553_v54, %v2552_v55  ;;  %v1986_v54 = vld [vmem:[%s3067_s1 + $0x138] sm:$0xff]  ;;  %v1985_v55 = vld [vmem:[%s3067_s1 + $0x130] sm:$0xff] }
  0x95   : > { %2137 = vmatmul.mubr.msk.f32.gmra.mrb[2].mxu0 %vm201_vm1, %v1909_v41  ;;  %2185 = vmatmul.mubr.msk.f32.vlgmr.msra.gmra.mrb[6].mxu1 %vm201_vm1, %v1923_v42  ;;  %v2556_v50 = vpop.permute.xlu0 %2555  ;;  %v2561_v58 = vpop.permute.xlu1 %2560  ;;  %v1975_v41 = vld [vmem:[%s3067_s1 + $0x110] sm:$0xff] }
  0x96   : > { %2429 = vmatpush3.bf16.msra.mxu1 %v2398_v21  ;;  %2139 = vmatprep.mubr.msk.f32.mxu0 %vm2605_vm0, %v2606_v1  ;;  %v2558_v56 = vunpack.i.h.bf16 %v2556_v50  ;;  %v2557_v57 = vunpack.i.l.bf16 %v2556_v50  ;;  %v2563_v63 = vunpack.i.h.bf16 %v2561_v58  ;;  %v2562_v2 = vunpack.i.l.bf16 %v2561_v58  ;;  %v1968_v42 = vld [vmem:[%s3067_s1 + $0xf0] sm:$0xff]  ;;  %v1988_v58 = vld [vmem:[%s3067_s1 + $0x148] sm:$0xff] }
  0x97   : > { %2414 = vmatpush3.bf16.msra.mxu0 %v2707_v44  ;;  %2187 = vmatprep.mubr.msk.f32.mxu1 %vm2605_vm0, %v2606_v1 }
  0x98   : > { %2430 = vmatprep.subr.bf16.mxu1 %v2604_v0  ;;  %2421 = vmatprep.subr.bf16.mxu0 %v2604_v0  ;;  %v2751_v62 = vpack.c.bf16 %v2558_v56, %v2557_v57  ;;  %v2766_v5 = vpack.c.bf16 %v2563_v63, %v2562_v2  ;;  %v1987_v56 = vld [vmem:[%s3067_s1 + $0x140] sm:$0xff]  ;;  %v2001_v57 = vld [vmem:[%s3067_s1 + $0x168] sm:$0xff] }
  0x99   : > { %2140 = vmatmul.mubr.msk.f32.gmra.mrb[4].mxu0 %vm201_vm1, %v1910_v47  ;;  %2188 = vmatmul.mubr.msk.f32.gmra.mrb[8].mxu1 %vm201_vm1, %v1924_v48  ;;  %v2571_v12 = vpop.permute.xlu1 %2570  ;;  %v2566_v20 = vpop.permute.xlu0 %2565  ;;  %v1983_v47 = vld [vmem:[%s3067_s1 + $0x120] sm:$0xff] }
  0x9a   : > { %2432 = vmatpush3.bf16.msra.mxu1 %v2401_v31  ;;  %2167 = vmatprep.mubr.msk.f32.mxu0 %vm2605_vm0, %v2606_v1  ;;  %v2573_v15 = vunpack.i.h.bf16 %v2571_v12  ;;  %v2572_v16 = vunpack.i.l.bf16 %v2571_v12  ;;  %v2568_v24 = vunpack.i.h.bf16 %v2566_v20  ;;  %v2567_v25 = vunpack.i.l.bf16 %v2566_v20 }
  0x9b   : > { %2190 = vmatprep.mubr.msk.f32.mxu1 %vm2605_vm0, %v2606_v1  ;;  %2439 = vmatprep.subr.bf16.mxu1 %v2604_v0 }
  0x9c   : > { %v2842_v21 = vpack.c.bf16 %v2573_v15, %v2572_v16  ;;  %v2458_v31 = vpack.c.bf16 %v2568_v24, %v2567_v25 }
  0x9d   : > { %2168 = vmatmul.mubr.msk.f32.vlgmr.msra.gmra.mrb[6].mxu0 %vm201_vm1, %v1917_v52  ;;  %2191 = vmatmul.mubr.msk.f32.gmra.mrb[10].mxu1 %vm201_vm1, %v1925_v53  ;;  %v2581_v17 = vpop.permute.xlu1 %2580  ;;  %v2576_v29 = vpop.permute.xlu0 %2575  ;;  %v1984_v52 = vld [vmem:[%s3067_s1 + $0x128] sm:$0xff] }
  0x9e   : > { %2423 = vmatpush3.bf16.msra.mxu0 %v2422_v51  ;;  %2170 = vmatprep.mubr.msk.f32.mxu0 %vm2605_vm0, %v2606_v1  ;;  %v2583_v22 = vunpack.i.h.bf16 %v2581_v17  ;;  %v2582_v23 = vunpack.i.l.bf16 %v2581_v17  ;;  %v2577_v35 = vunpack.i.l.bf16 %v2576_v29  ;;  %v1970_v51 = vld [vmem:[%s3067_s1 + $0x100] sm:$0xff] }
  0x9f   : > { %2218 = vmatprep.mubr.msk.f32.mxu1 %vm2605_vm0, %v2606_v1  ;;  %2424 = vmatprep.subr.bf16.mxu0 %v2604_v0 }
  0xa0   : > { %v2858_v28 = vpack.c.bf16 %v2583_v22, %v2582_v23 }
  0xa1   : > { %2171 = vmatmul.mubr.msk.f32.gmra.mrb[8].mxu0 %vm201_vm1, %v1918_v60  ;;  %2219 = vmatmul.mubr.msk.f32.vlgmr.msra.gmra.mrb[12].mxu1 %vm201_vm1, %v1929_v61  ;;  %v2591_v46 = vpop.permute.xlu1 %2590  ;;  %v2003_v60 = vld [vmem:[%s3067_s1 + $0x178] sm:$0xff] }
  0xa2   : > { %2173 = vmatprep.mubr.msk.f32.mxu0 %vm2605_vm0, %v2606_v1  ;;  %2426 = vmatpush3.bf16.msra.mxu0 %v2425_v59  ;;  %v2593_v49 = vunpack.i.h.bf16 %v2591_v46  ;;  %v2592_v50 = vunpack.i.l.bf16 %v2591_v46  ;;  %v1995_v59 = vld [vmem:[%s3067_s1 + $0x150] sm:$0xff]  ;;  %v1996_v61 = vld [vmem:[%s3067_s1 + $0x158] sm:$0xff] }
  0xa3   : > { %2221 = vmatprep.mubr.msk.f32.mxu1 %vm2605_vm0, %v2606_v1  ;;  %2441 = vmatpush3.bf16.msra.mxu1 %v2751_v62 }
  0xa4   : > { %2433 = vmatprep.subr.bf16.mxu0 %v2604_v0  ;;  %2442 = vmatprep.subr.bf16.mxu1 %v2604_v0  ;;  %v2491_v53 = vpack.c.bf16 %v2593_v49, %v2592_v50 }
  0xa5   : > { %2174 = vmatmul.mubr.msk.f32.gmra.mrb[10].mxu0 %vm201_vm1, %v1919_v3  ;;  %2222 = vmatmul.mubr.msk.f32.gmra.mrb[14].mxu1 %vm201_vm1, %v1930_v4 }
  0xa6   : > { %2201 = vmatprep.mubr.msk.f32.mxu0 %vm2605_vm0, %v2606_v1  ;;  %2224 = vmatprep.mubr.msk.f32.mxu1 %vm2605_vm0, %v2606_v1 }
  0xa7   : > { %2444 = vmatpush3.bf16.msra.mxu1 %v2766_v5 }
  0xa8   : > { %2451 = vmatprep.subr.bf16.mxu1 %v2604_v0 }
  0xa9   : > { %2202 = vmatmul.mubr.msk.f32.vlgmr.msra.gmra.mrb[12].mxu0 %vm201_vm1, %v1932_v6  ;;  %2225 = vmatmul.mubr.msk.f32.gmra.mrb[16].mxu1 %vm201_vm1, %v1931_v7 }
  0xaa   : > { %2435 = vmatpush3.bf16.msra.mxu0 %v2686_v30  ;;  %2204 = vmatprep.mubr.msk.f32.mxu0 %vm2605_vm0, %v2606_v1 }
  0xab   : > { %2436 = vmatprep.subr.bf16.mxu0 %v2604_v0  ;;  %2252 = vmatprep.mubr.msk.f32.mxu1 %vm2605_vm0, %v2606_v1 }
  0xad   : > { %2205 = vmatmul.mubr.msk.f32.gmra.mrb[14].mxu0 %vm201_vm1, %v1933_v8  ;;  %2253 = vmatmul.mubr.msk.f32.vlgmr.msra.gmra.mrb[18].mxu1 %vm201_vm1, %v1947_v9 }
  0xae   : > { %2438 = vmatpush3.bf16.msra.mxu0 %v2696_v40  ;;  %2453 = vmatpush3.bf16.msra.mxu1 %v2688_v34  ;;  %v2578_v34 = vunpack.i.h.bf16 %v2576_v29 }
  0xaf   : > { %2207 = vmatprep.mubr.msk.f32.mxu0 %vm2605_vm0, %v2606_v1  ;;  %2255 = vmatprep.mubr.msk.f32.mxu1 %vm2605_vm0, %v2606_v1 }
  0xb0   : > { %2454 = vmatprep.subr.bf16.mxu1 %v2604_v0  ;;  %2445 = vmatprep.subr.bf16.mxu0 %v2604_v0  ;;  %v2461_v38 = vpack.c.bf16 %v2578_v34, %v2577_v35 }
  0xb1   : > { %2208 = vmatmul.mubr.msk.f32.gmra.mrb[16].mxu0 %vm201_vm1, %v1934_v10  ;;  %2256 = vmatmul.mubr.msk.f32.gmra.mrb[20].mxu1 %vm201_vm1, %v1948_v11 }
  0xb2   : > { %2456 = vmatpush3.bf16.msra.mxu1 %v2707_v44  ;;  %2235 = vmatprep.mubr.msk.f32.mxu0 %vm2605_vm0, %v2606_v1 }
  0xb3   : > { %2258 = vmatprep.mubr.msk.f32.mxu1 %vm2605_vm0, %v2606_v1  ;;  %2463 = vmatprep.subr.bf16.mxu1 %v2604_v0 }
  0xb5   : > { %2236 = vmatmul.mubr.msk.f32.vlgmr.msra.gmra.mrb[18].mxu0 %vm201_vm1, %v1941_v13  ;;  %2259 = vmatmul.mubr.msk.f32.gmra.mrb[22].mxu1 %vm201_vm1, %v1949_v14 }
  0xb6   : > { %2447 = vmatpush3.bf16.msra.mxu0 %v2686_v30  ;;  %2238 = vmatprep.mubr.msk.f32.mxu0 %vm2605_vm0, %v2606_v1 }
  0xb7   : > { %2448 = vmatprep.subr.bf16.mxu0 %v2604_v0  ;;  %2286 = vmatprep.mubr.msk.f32.mxu1 %vm2605_vm0, %v2606_v1 }
  0xb9   : > { %2239 = vmatmul.mubr.msk.f32.gmra.mrb[20].mxu0 %vm201_vm1, %v1942_v18  ;;  %2287 = vmatmul.mubr.msk.f32.vlgmr.msra.gmra.mrb[24].mxu1 %vm201_vm1, %v1956_v19 }
  0xba   : > { %2450 = vmatpush3.bf16.msra.mxu0 %v2696_v40  ;;  %2241 = vmatprep.mubr.msk.f32.mxu0 %vm2605_vm0, %v2606_v1 }
  0xbb   : > { %2289 = vmatprep.mubr.msk.f32.mxu1 %vm2605_vm0, %v2606_v1  ;;  %2465 = vmatpush3.bf16.msra.mxu1 %v2842_v21 }
  0xbc   : > { %2466 = vmatprep.subr.bf16.mxu1 %v2604_v0  ;;  %2457 = vmatprep.subr.bf16.mxu0 %v2604_v0 }
  0xbd   : > { %2242 = vmatmul.mubr.msk.f32.gmra.mrb[22].mxu0 %vm201_vm1, %v1943_v26  ;;  %2290 = vmatmul.mubr.msk.f32.gmra.mrb[26].mxu1 %vm201_vm1, %v1957_v27  ;;  %v3018_v26 = vpop.permute.xlu1 %603 }
  0xbe   : > { %2269 = vmatprep.mubr.msk.f32.mxu0 %vm2605_vm0, %v2606_v1  ;;  %2292 = vmatprep.mubr.msk.f32.mxu1 %vm2605_vm0, %v2606_v1 }
  0xbf   : > { %2468 = vmatpush3.bf16.msra.mxu1 %v2858_v28 }
  0xc0   : > { %2475 = vmatprep.subr.bf16.mxu1 %v2604_v0 }
  0xc1   : > { %2270 = vmatmul.mubr.msk.f32.vlgmr.msra.gmra.mrb[24].mxu0 %vm201_vm1, %v1959_v32  ;;  %2293 = vmatmul.mubr.msk.f32.gmra.mrb[28].mxu1 %vm201_vm1, %v1958_v33 }
  0xc2   : > { %2459 = vmatpush3.bf16.msra.mxu0 %v2458_v31  ;;  %2272 = vmatprep.mubr.msk.f32.mxu0 %vm2605_vm0, %v2606_v1 }
  0xc3   : > { %2320 = vmatprep.mubr.msk.f32.mxu1 %vm2605_vm0, %v2606_v1  ;;  %2460 = vmatprep.subr.bf16.mxu0 %v2604_v0 }
  0xc5   : > { %2273 = vmatmul.mubr.msk.f32.gmra.mrb[26].mxu0 %vm201_vm1, %v1960_v36  ;;  %2321 = vmatmul.mubr.msk.f32.vlgmr.msra.gmra.mrb[30].mxu1 %vm201_vm1, %v1974_v37 }
  0xc6   : > { %2477 = vmatpush3.bf16.msra.mxu1 %v2686_v30  ;;  %2275 = vmatprep.mubr.msk.f32.mxu0 %vm2605_vm0, %v2606_v1  ;;  %v2586_v30 = vpop.permute.xlu0 %2585 }
  0xc7   : > { %2462 = vmatpush3.bf16.msra.mxu0 %v2461_v38  ;;  %2478 = vmatprep.subr.bf16.mxu1 %v2604_v0  ;;  %v2588_v44 = vunpack.i.h.bf16 %v2586_v30  ;;  %v2587_v45 = vunpack.i.l.bf16 %v2586_v30 }
  0xc8   : > { %2469 = vmatprep.subr.bf16.mxu0 %v2604_v0  ;;  %2323 = vmatprep.mubr.msk.f32.mxu1 %vm2605_vm0, %v2606_v1 }
  0xc9   : > { %2276 = vmatmul.mubr.msk.f32.gmra.mrb[28].mxu0 %vm201_vm1, %v1961_v39  ;;  %2324 = vmatmul.mubr.msk.f32.gmra.mrb[32].mxu1 %vm201_vm1, %v1975_v41  ;;  %v2488_v48 = vpack.c.bf16 %v2588_v44, %v2587_v45 }
  0xca   : > { %2480 = vmatpush3.bf16.msra.mxu1 %v2696_v40  ;;  %2303 = vmatprep.mubr.msk.f32.mxu0 %vm2605_vm0, %v2606_v1  ;;  %v1969_v40 = vld [vmem:[%s3067_s1 + $0xf8] sm:$0xff]  ;;  %v3016_v24 = vpop.permute.xlu0 %598 }
  0xcb   : > { %2326 = vmatprep.mubr.msk.f32.mxu1 %vm2605_vm0, %v2606_v1  ;;  %2487 = vmatprep.subr.bf16.mxu1 %v2604_v0 }
  0xcd   : > { %2304 = vmatmul.mubr.msk.f32.vlgmr.msra.gmra.mrb[30].mxu0 %vm201_vm1, %v1968_v42  ;;  %2327 = vmatmul.mubr.msk.f32.gmra.mrb[34].mxu1 %vm201_vm1, %v1976_v43  ;;  %v3029_v42 = vpop.permute.xlu1 %608 }
  0xce   : > { %2471 = vmatpush3.bf16.msra.mxu0 %v2751_v62  ;;  %2306 = vmatprep.mubr.msk.f32.mxu0 %vm2605_vm0, %v2606_v1  ;;  %v1997_v62 = vld [vmem:[%s3067_s1 + $0x160] sm:$0xff] }
  0xcf   : > { %2472 = vmatprep.subr.bf16.mxu0 %v2604_v0  ;;  %2354 = vmatprep.mubr.msk.f32.mxu1 %vm2605_vm0, %v2606_v1 }
  0xd1   : > { %2307 = vmatmul.mubr.msk.f32.gmra.mrb[32].mxu0 %vm201_vm1, %v1969_v40  ;;  %2355 = vmatmul.mubr.msk.f32.vlgmr.msra.gmra.mrb[36].mxu1 %vm201_vm1, %v1983_v47 }
  0xd2   : > { %2474 = vmatpush3.bf16.msra.mxu0 %v2766_v5  ;;  %2309 = vmatprep.mubr.msk.f32.mxu0 %vm2605_vm0, %v2606_v1 }
  0xd3   : > { %2481 = vmatprep.subr.bf16.mxu0 %v2604_v0  ;;  %2489 = vmatpush3.bf16.msra.mxu1 %v2488_v48 }
  0xd4   : > { %2357 = vmatprep.mubr.msk.f32.mxu1 %vm2605_vm0, %v2606_v1  ;;  %2490 = vmatprep.subr.bf16.mxu1 %v2604_v0 }
  0xd5   : > { %2310 = vmatmul.mubr.msk.f32.gmra.mrb[34].mxu0 %vm201_vm1, %v1970_v51  ;;  %2358 = vmatmul.mubr.msk.f32.gmra.mrb[38].mxu1 %vm201_vm1, %v1984_v52 }
  0xd6   : > { %2337 = vmatprep.mubr.msk.f32.mxu0 %vm2605_vm0, %v2606_v1  ;;  %2360 = vmatprep.mubr.msk.f32.mxu1 %vm2605_vm0, %v2606_v1 }
  0xd7   : > { %2492 = vmatpush3.bf16.msra.mxu1 %v2491_v53 }
  0xd9   : > { %2338 = vmatmul.mubr.msk.f32.vlgmr.msra.gmra.mrb[36].mxu0 %vm201_vm1, %v1986_v54  ;;  %2361 = vmatmul.mubr.msk.f32.gmra.mrb[40].mxu1 %vm201_vm1, %v1985_v55 }
  0xda   : > { %2483 = vmatpush3.bf16.msra.mxu0 %v2842_v21  ;;  %2340 = vmatprep.mubr.msk.f32.mxu0 %vm2605_vm0, %v2606_v1 }
  0xdb   : > { %2484 = vmatprep.subr.bf16.mxu0 %v2604_v0  ;;  %2388 = vmatprep.mubr.msk.f32.mxu1 %vm2605_vm0, %v2606_v1  ;;  %v2002_v0 = vld [vmem:[%s3067_s1 + $0x170] sm:$0xff] }
  0xdd   : > { %2341 = vmatmul.mubr.msk.f32.gmra.mrb[38].mxu0 %vm201_vm1, %v1987_v56  ;;  %2389 = vmatmul.mubr.msk.f32.vlgmr.msra.gmra.mrb[42].mxu1 %vm201_vm1, %v2001_v57 }
  0xde   : > { %2486 = vmatpush3.bf16.msra.mxu0 %v2858_v28  ;;  %2343 = vmatprep.mubr.msk.f32.mxu0 %vm2605_vm0, %v2606_v1 }
  0xdf   : > { %2391 = vmatprep.mubr.msk.f32.mxu1 %vm2605_vm0, %v2606_v1 }
  0xe1   : > { %2344 = vmatmul.mubr.msk.f32.gmra.mrb[40].mxu0 %vm201_vm1, %v1988_v58  ;;  %2392 = vmatmul.mubr.msk.f32.gmra.mrb[44].mxu1 %vm201_vm1, %v2002_v0 }
  0xe2   : > { %2371 = vmatprep.mubr.msk.f32.mxu0 %vm2605_vm0, %v2606_v1  ;;  %2394 = vmatprep.mubr.msk.f32.mxu1 %vm2605_vm0, %v2606_v1 }
  0xe5   : > { %2372 = vmatmul.mubr.msk.f32.vlgmr.msra.gmra.mrb[42].mxu0 %vm201_vm1, %v1995_v59  ;;  %2395 = vmatmul.mubr.msk.f32.gmra.mrb[46].mxu1 %vm201_vm1, %v2003_v60 }
  0xe6   : > { %2374 = vmatprep.mubr.msk.f32.mxu0 %vm2605_vm0, %v2606_v1 }
  0xe9   : > { %2375 = vmatmul.mubr.msk.f32.gmra.mrb[44].mxu0 %vm201_vm1, %v1996_v61 }
  0xea   : > { %2377 = vmatprep.mubr.msk.f32.mxu0 %vm2605_vm0, %v2606_v1 }
  0xed   : > { %2378 = vmatmul.mubr.msk.f32.gmra.mrb[46].mxu0 %vm201_vm1, %v1997_v62 }
  0xef   : > { %v366_v63 = vpop.f32.mrb[0].mxu1 }
  0xf0   : > { %v2152_v2 = vpop.f32.mrb[1].mxu1 }
  0xf3   : > { %v371_v3 = vpop.f32.mrb[2].mxu1 }
  0xf4   : > { %v2155_v4 = vpop.f32.mrb[3].mxu1 }
  0xf7   : > { %v376_v5 = vpop.f32.mrb[4].mxu1 }
  0xf8   : > { %v2158_v6 = vpop.f32.mrb[5].mxu1 }
 0x164   : > { %v277_v7 = vpop.f32.mrb[0].mxu0 }
 0x165   : > { %v2135_v8 = vpop.f32.mrb[1].mxu0  ;;  %v367_v9 = vadd.f32 %v366_v63, %v277_v7 }
 0x168   : > { %v282_v10 = vpop.f32.mrb[2].mxu0  ;;  %v579_v11 = vpop.f32.mrb[6].mxu1 }
 0x169   : > { %v2138_v12 = vpop.f32.mrb[3].mxu0  ;;  %v372_v1 = vadd.f32 %v371_v3, %v282_v10  ;;  %v2186_v13 = vpop.f32.mrb[7].mxu1 }
 0x16c   : > { %v287_v14 = vpop.f32.mrb[4].mxu0  ;;  %v584_v15 = vpop.f32.mrb[8].mxu1 }
 0x16d   : > { %v2141_v16 = vpop.f32.mrb[5].mxu0  ;;  %v377_v17 = vadd.f32 %v376_v5, %v287_v14  ;;  %v2189_v18 = vpop.f32.mrb[9].mxu1 }
 0x170   : > { %v471_v19 = vpop.f32.mrb[6].mxu0  ;;  %v589_v20 = vpop.f32.mrb[10].mxu1 }
 0x171   : > { %v485_v21 = vadd.f32 %v471_v19, %v367_v9  ;;  %v2169_v22 = vpop.f32.mrb[7].mxu0  ;;  %v2192_v23 = vpop.f32.mrb[11].mxu1 }
 0x173   : > { %v593_v25 = vadd.f32 %v579_v11, %v485_v21 }
 0x174   : > { %v476_v27 = vpop.f32.mrb[8].mxu0  ;;  %v805_v28 = vpop.f32.mrb[12].mxu1 }
 0x175   : > { %v611_v29 = vadd.f32 %v3016_v24, %v593_v25  ;;  %v486_v31 = vadd.f32 %v476_v27, %v372_v1  ;;  %v2172_v32 = vpop.f32.mrb[9].mxu0  ;;  %v2220_v33 = vpop.f32.mrb[13].mxu1 }
 0x177   : > { %v614_v34 = vmax.f32 %v611_v29, 0.0  ;;  %v594_v35 = vadd.f32 %v584_v15, %v486_v31 }
 0x178   : > { %v481_v36 = vpop.f32.mrb[10].mxu0  ;;  %v810_v37 = vpop.f32.mrb[14].mxu1 }
 0x179   : > { %618 = vst.msk [vmem:[%s3024_s4] sm:$0xff] %vm617_vm2, %v614_v34  ;;  %v612_v38 = vadd.f32 %v3018_v26, %v594_v35  ;;  %v487_v39 = vadd.f32 %v481_v36, %v377_v17  ;;  %v2175_v41 = vpop.f32.mrb[11].mxu0  ;;  %v2223_v30 = vpop.f32.mrb[15].mxu1 }
 0x17b   : > { %v615_v43 = vmax.f32 %v612_v38, 0.0  ;;  %v595_v44 = vadd.f32 %v589_v20, %v487_v39 }
 0x17c   : > { %v716_v45 = vpop.f32.mrb[12].mxu0  ;;  %v815_v46 = vpop.f32.mrb[16].mxu1 }
 0x17d   : > { %619 = vst.msk [vmem:[%s3024_s4 + $0x8] sm:$0xff] %vm617_vm2, %v615_v43  ;;  %v613_v40 = vadd.f32 %v3029_v42, %v595_v44  ;;  %v2203_v47 = vpop.f32.mrb[13].mxu0  ;;  %v806_v48 = vadd.f32 %v805_v28, %v716_v45  ;;  %v2226_v49 = vpop.f32.mrb[17].mxu1 }
 0x17f   : > { %v616_v50 = vmax.f32 %v613_v40, 0.0 }
 0x180   : > { %v721_v51 = vpop.f32.mrb[14].mxu0  ;;  %v1006_v52 = vpop.f32.mrb[18].mxu1 }
 0x181   : > { %620 = vst.msk [vmem:[%s3024_s4 + $0x10] sm:$0xff] %vm617_vm2, %v616_v50  ;;  %v2206_v53 = vpop.f32.mrb[15].mxu0  ;;  %v811_v54 = vadd.f32 %v810_v37, %v721_v51  ;;  %v2254_v55 = vpop.f32.mrb[19].mxu1 }
 0x184   : > { %v726_v56 = vpop.f32.mrb[16].mxu0  ;;  %v1011_v57 = vpop.f32.mrb[20].mxu1 }
 0x185   : > { %v2209_v58 = vpop.f32.mrb[17].mxu0  ;;  %v816_v0 = vadd.f32 %v815_v46, %v726_v56  ;;  %v2257_v59 = vpop.f32.mrb[21].mxu1 }
 0x188   : > { %v898_v60 = vpop.f32.mrb[18].mxu0  ;;  %v1016_v61 = vpop.f32.mrb[22].mxu1 }
 0x189   : > { %v912_v62 = vadd.f32 %v898_v60, %v806_v48  ;;  %v2237_v63 = vpop.f32.mrb[19].mxu0  ;;  %v2260_v2 = vpop.f32.mrb[23].mxu1 }
 0x18b   : > { %v1020_v3 = vadd.f32 %v1006_v52, %v912_v62 }
 0x18c   : > { %v903_v4 = vpop.f32.mrb[20].mxu0  ;;  %v1205_v5 = vpop.f32.mrb[24].mxu1 }
 0x18d   : > { %v1023_v6 = vadd.f32 %v1020_v3, %v3016_v24  ;;  %v913_v7 = vadd.f32 %v903_v4, %v811_v54  ;;  %v2240_v8 = vpop.f32.mrb[21].mxu0  ;;  %v2288_v9 = vpop.f32.mrb[25].mxu1 }
 0x18f   : > { %v1026_v10 = vmax.f32 %v1023_v6, 0.0  ;;  %v1021_v11 = vadd.f32 %v1011_v57, %v913_v7 }
 0x190   : > { %v908_v12 = vpop.f32.mrb[22].mxu0  ;;  %v1210_v1 = vpop.f32.mrb[26].mxu1 }
 0x191   : > { %1953 = vst.msk [vmem:[%s3024_s4 + $0x18] sm:$0xff] %vm617_vm2, %v1026_v10  ;;  %v1024_v13 = vadd.f32 %v1021_v11, %v3018_v26  ;;  %v914_v14 = vadd.f32 %v908_v12, %v816_v0  ;;  %v2243_v15 = vpop.f32.mrb[23].mxu0  ;;  %v2291_v16 = vpop.f32.mrb[27].mxu1 }
 0x193   : > { %v1027_v17 = vmax.f32 %v1024_v13, 0.0  ;;  %v1022_v18 = vadd.f32 %v1016_v61, %v914_v14 }
 0x194   : > { %v1116_v19 = vpop.f32.mrb[24].mxu0  ;;  %v1215_v20 = vpop.f32.mrb[28].mxu1 }
 0x195   : > { %1954 = vst.msk [vmem:[%s3024_s4 + $0x20] sm:$0xff] %vm617_vm2, %v1027_v17  ;;  %v1025_v21 = vadd.f32 %v1022_v18, %v3029_v42  ;;  %v2271_v22 = vpop.f32.mrb[25].mxu0  ;;  %v1206_v23 = vadd.f32 %v1205_v5, %v1116_v19  ;;  %v2294_v25 = vpop.f32.mrb[29].mxu1 }
 0x197   : > { %v1028_v27 = vmax.f32 %v1025_v21, 0.0 }
 0x198   : > { %v1121_v28 = vpop.f32.mrb[26].mxu0  ;;  %v1418_v29 = vpop.f32.mrb[30].mxu1 }
 0x199   : > { %1955 = vst.msk [vmem:[%s3024_s4 + $0x28] sm:$0xff] %vm617_vm2, %v1028_v27  ;;  %v2274_v31 = vpop.f32.mrb[27].mxu0  ;;  %v1211_v32 = vadd.f32 %v1210_v1, %v1121_v28  ;;  %v2322_v33 = vpop.f32.mrb[31].mxu1 }
 0x19c   : > { %v1126_v34 = vpop.f32.mrb[28].mxu0  ;;  %v1423_v35 = vpop.f32.mrb[32].mxu1 }
 0x19d   : > { %v2277_v36 = vpop.f32.mrb[29].mxu0  ;;  %v1216_v37 = vadd.f32 %v1215_v20, %v1126_v34  ;;  %v2325_v38 = vpop.f32.mrb[33].mxu1 }
 0x1a0   : > { %v1310_v39 = vpop.f32.mrb[30].mxu0  ;;  %v1428_v41 = vpop.f32.mrb[34].mxu1 }
 0x1a1   : > { %v1324_v30 = vadd.f32 %v1310_v39, %v1206_v23  ;;  %v2305_v43 = vpop.f32.mrb[31].mxu0  ;;  %v2328_v44 = vpop.f32.mrb[35].mxu1 }
 0x1a3   : > { %v1432_v45 = vadd.f32 %v1418_v29, %v1324_v30 }
 0x1a4   : > { %v1315_v46 = vpop.f32.mrb[32].mxu0  ;;  %v1617_v40 = vpop.f32.mrb[36].mxu1 }
 0x1a5   : > { %v1435_v47 = vadd.f32 %v1432_v45, %v3016_v24  ;;  %v1325_v48 = vadd.f32 %v1315_v46, %v1211_v32  ;;  %v2308_v49 = vpop.f32.mrb[33].mxu0  ;;  %v2356_v50 = vpop.f32.mrb[37].mxu1 }
 0x1a7   : > { %v1438_v51 = vmax.f32 %v1435_v47, 0.0  ;;  %v1433_v52 = vadd.f32 %v1423_v35, %v1325_v48 }
 0x1a8   : > { %v1320_v53 = vpop.f32.mrb[34].mxu0  ;;  %v1622_v54 = vpop.f32.mrb[38].mxu1 }
 0x1a9   : > { %1980 = vst.msk [vmem:[%s3024_s4 + $0x30] sm:$0xff] %vm617_vm2, %v1438_v51  ;;  %v1436_v55 = vadd.f32 %v1433_v52, %v3018_v26  ;;  %v1326_v56 = vadd.f32 %v1320_v53, %v1216_v37  ;;  %v2311_v57 = vpop.f32.mrb[35].mxu0  ;;  %v2359_v58 = vpop.f32.mrb[39].mxu1 }
 0x1ab   : > { %v1439_v0 = vmax.f32 %v1436_v55, 0.0  ;;  %v1434_v59 = vadd.f32 %v1428_v41, %v1326_v56 }
 0x1ac   : > { %v1528_v60 = vpop.f32.mrb[36].mxu0  ;;  %v1627_v61 = vpop.f32.mrb[40].mxu1 }
 0x1ad   : > { %1981 = vst.msk [vmem:[%s3024_s4 + $0x38] sm:$0xff] %vm617_vm2, %v1439_v0  ;;  %v1437_v62 = vadd.f32 %v1434_v59, %v3029_v42  ;;  %v2339_v63 = vpop.f32.mrb[37].mxu0  ;;  %v1618_v2 = vadd.f32 %v1617_v40, %v1528_v60  ;;  %v2362_v3 = vpop.f32.mrb[41].mxu1 }
 0x1af   : > { %v1440_v4 = vmax.f32 %v1437_v62, 0.0 }
 0x1b0   : > { %v1533_v5 = vpop.f32.mrb[38].mxu0  ;;  %v1818_v6 = vpop.f32.mrb[42].mxu1 }
 0x1b1   : > { %1982 = vst.msk [vmem:[%s3024_s4 + $0x40] sm:$0xff] %vm617_vm2, %v1440_v4  ;;  %v2342_v7 = vpop.f32.mrb[39].mxu0  ;;  %v1623_v8 = vadd.f32 %v1622_v54, %v1533_v5  ;;  %v2390_v9 = vpop.f32.mrb[43].mxu1 }
 0x1b4   : > { %v1538_v10 = vpop.f32.mrb[40].mxu0  ;;  %v1823_v11 = vpop.f32.mrb[44].mxu1 }
 0x1b5   : > { %v2345_v12 = vpop.f32.mrb[41].mxu0  ;;  %v1628_v1 = vadd.f32 %v1627_v61, %v1538_v10  ;;  %v2393_v13 = vpop.f32.mrb[45].mxu1 }
 0x1b8   : > { %v1710_v14 = vpop.f32.mrb[42].mxu0  ;;  %v1828_v15 = vpop.f32.mrb[46].mxu1 }
 0x1b9   : > { %v1724_v16 = vadd.f32 %v1710_v14, %v1618_v2  ;;  %v2373_v17 = vpop.f32.mrb[43].mxu0  ;;  %v2396_v18 = vpop.f32.mrb[47].mxu1 }
 0x1bb   : > { %v1832_v19 = vadd.f32 %v1818_v6, %v1724_v16 }
 0x1bc   : > { %v1715_v20 = vpop.f32.mrb[44].mxu0 }
 0x1bd   : > { %v1835_v21 = vadd.f32 %v1832_v19, %v3016_v24  ;;  %v1725_v22 = vadd.f32 %v1715_v20, %v1623_v8  ;;  %v2376_v23 = vpop.f32.mrb[45].mxu0 }
 0x1bf   : > { %v1838_v25 = vmax.f32 %v1835_v21, 0.0  ;;  %v1833_v27 = vadd.f32 %v1823_v11, %v1725_v22 }
 0x1c0   : > { %v1720_v28 = vpop.f32.mrb[46].mxu0 }
 0x1c1   : > { %2007 = vst.msk [vmem:[%s3024_s4 + $0x48] sm:$0xff] %vm617_vm2, %v1838_v25  ;;  %v1836_v29 = vadd.f32 %v1833_v27, %v3018_v26  ;;  %v1726_v31 = vadd.f32 %v1720_v28, %v1628_v1  ;;  %v2379_v32 = vpop.f32.mrb[47].mxu0 }
 0x1c3   : > { %v1839_v33 = vmax.f32 %v1836_v29, 0.0  ;;  %v1834_v34 = vadd.f32 %v1828_v15, %v1726_v31 }
 0x1c5   : > { %2008 = vst.msk [vmem:[%s3024_s4 + $0x50] sm:$0xff] %vm617_vm2, %v1839_v33  ;;  %v1837_v35 = vadd.f32 %v1834_v34, %v3029_v42 }
 0x1c7   : > { %v1840_v36 = vmax.f32 %v1837_v35, 0.0 }
 0x1c9   : > { %2009 = vst.msk [vmem:[%s3024_s4 + $0x58] sm:$0xff] %vm617_vm2, %v1840_v36 }
 0x1ca PF: > { %s13_s12 = sadd.s32 1, %s2602_s12  }
 0x1cb   : > { %p10_p4 = scmp.ge.s32.totalorder %s13_s12, 4  }
 0x1cd   :  { %12 = sbr.rel (!%p10_p4) target bundleno = 1 (0x1), region = 80 }

// kernel: g_nlayers_pallas.8
= control target key start
LH: loop header
LB: loop body
LE: loop exit
PB: predicated region body
PF: predicated region fallthrough
CT: control target
= control target key end

     0   :  { %s3372_s12 = smov 0   ;;  %s3791_s0 = inlined_call_operand.vmem [shape: f32[2,16,342], index: 0, kind: input, shape index: {}]   ;;  %s3792_s1 = inlined_call_operand.vmem [shape: f32[16,8,16], index: 1, kind: input, shape index: {}]   ;;  %s3793_s2 = inlined_call_operand.vmem [shape: f32[8,1], index: 2, kind: input, shape index: {}]   ;;  %s3794_s3 = inlined_call_operand.vmem [shape: f32[2,2,2,8,288], index: 3, kind: output, shape index: {}]  }
   0x1 LB: > { %s2828_s13 = sadd.s32 4294967295, %s3338_s12   ;;  %p2832_p0 = scmp.ge.s32.totalorder %s3338_s12, 1  ;;  %s3338_s12 = sphi %s3372_s12, %s13_s12  }
   0x2   : > { %p137_p1 = scmp.lt.s32.totalorder %s3338_s12, 3 }
   0x4   : > { %p138_p2 = pnand %p2832_p0, %p137_p1 }
   0x5   : > { %p161_p3 = scmp.lt.s32.totalorder (!%p138_p2), %s2828_s13, 1  ;;  %v3340_v0 = vmov (!%p138_p2), 0.0|0.0   ;;  %vm3341_vm0 = vmmov (!%p138_p2), 0   ;;  %v3342_v8 = vmov (!%p138_p2), 0.0   ;;  %s3343_s18 = smov (!%p138_p2), 127   ;;  %v177_v14 = vld [vmem:[%s3793_s2] sm:$0xff] (!%p138_p2) }
   0x6   : > { %141 = sbr.rel (%p138_p2) target bundleno = 474 (0x1da), region = 32  ;;  %3057 = vmatprep.subr.bf16.mxu1 (!%p138_p2), %v3340_v0  ;;  %2945 = vmatprep.mubr.msk.f32.mxu1 (!%p138_p2), %vm3341_vm0, %v3342_v8  ;;  %s3344_s19 = smov (!%p138_p2), 110   ;;  %v3351_v15 = vmov (!%p138_p2), 0   ;;  %vm199_vm1 = vcmask (!%p138_p2), 1039360   ;;  %vm513_vm2 = vcmask (!%p138_p2), 900096   ;;  %v2835_v39 = vld [vmem:[%s3792_s1 + $0x8] sm:$0xff] (!%p138_p2) }
   0x7   : > { %278 = vmatprep.mubr.f32.mxu0 (!%p138_p2), %v3342_v8  ;;  %s3345_s20 = smov (!%p138_p2), 109   ;;  %s3346_s21 = smov (!%p138_p2), 126   ;;  %3331 = vset.pattern.permute.xlu0 (!%p138_p2), %v3351_v15  ;;  %vm210_vm3 = vcmask (!%p138_p2), 130048   ;;  %v178_v50 = vld [vmem:[%s3792_s1] sm:$0xff] (!%p138_p2)  ;;  %vm685_vm4 = vcmask (!%p138_p2), 891904   ;;  %v2840_v60 = vld [vmem:[%s3792_s1 + $0x10] sm:$0xff] (!%p138_p2) }
   0x8   : > { %s3347_s22 = smov (!%p138_p2), 108   ;;  %s3348_s23 = smov (!%p138_p2), 92   ;;  %vm874_vm5 = vcmask (!%p138_p2), 1031168   ;;  %vm1336_vm6 = vcmask (!%p138_p2), 883712   ;;  %vm1810_vm7 = vcmask (!%p138_p2), 752640   ;;  %vm1982_vm8 = vcmask (!%p138_p2), 744448  }
   0x9   : > { %s3349_s24 = smov (!%p138_p2), 91   ;;  %s3350_s25 = smov (!%p138_p2), 90   ;;  %vm2605_vm9 = vcmask (!%p138_p2), 736256   ;;  %vm856_vm10 = vcmask (!%p138_p2), 261120  }
   0xd   : > { %s3796_s13 = smov (!%p161_p3, %s2828_s13), 1 }
   0xe   : > { %s3189_s14 = smul.u32 48, %s3796_s13 }
   0xf   : > { %s3190_s8 = smul.u32 96, %s3796_s13 }
  0x10   : > { %s165_s17 = scalar_lea.vmem %s3791_s0, %s3189_s14 }
  0x11   : > { %v3387_v1 = vld [vmem:[%s165_s17 + $0x8] sm:$0xff]  ;;  %v3389_v2 = vld [vmem:[%s165_s17 + $0x10] sm:$0xff]  ;;  %v3391_v3 = vld [vmem:[%s165_s17] sm:$0xff]  ;;  %s3759_s11 = scalar_lea.vmem %s3794_s3, %s3190_s8 }
  0x12   : > { %v3211_v4 = vpack.i.bf16 %v3389_v2, %v3387_v1  ;;  %v3395_v5 = vld [vmem:[%s165_s17 + $0x18] sm:$0xff]  ;;  %v3397_v6 = vld [vmem:[%s165_s17 + $0x20] sm:$0xff]  ;;  %v3399_v7 = vld [vmem:[%s165_s17 + $0x28] sm:$0xff] }
  0x13   : > { %v3221_v9 = vpack.i.bf16 %v3395_v5, %v3391_v3  ;;  %v3216_v10 = vpack.i.bf16 %v3399_v7, %v3397_v6  ;;  %v3065_v11 = vpack.c.bf16 %v3399_v7, %v3389_v2  ;;  %v3060_v12 = vpack.c.bf16 %v3397_v6, %v3387_v1  ;;  %v2843_v7 = vld [vmem:[%s3792_s1 + $0x18] sm:$0xff] }
  0x14   : > { %3212 = vrot.lane.b32.xlu0 %v3211_v4, %s3343_s18  ;;  %v3062_v13 = vpack.c.bf16 %v3395_v5, %v3391_v3 }
  0x15   : > { %3222 = vrot.lane.b32.xlu1 %v3221_v9, %s3343_s18 }
  0x18   : > { %3217 = vrot.lane.b32.xlu0 %v3216_v10, %s3343_s18 }
  0x19   : > { %3227 = vrot.lane.b32.xlu1 %v3211_v4, %s3344_s19 }
  0x1c   : > { %3232 = vrot.lane.b32.xlu0 %v3216_v10, %s3344_s19 }
  0x1d   : > { %3237 = vrot.lane.b32.xlu1 %v3221_v9, %s3344_s19 }
  0x20   : > { %3242 = vrot.lane.b32.xlu0 %v3211_v4, %s3345_s20 }
  0x21   : > { %3247 = vrot.lane.b32.xlu1 %v3216_v10, %s3345_s20 }
  0x24   : > { %3252 = vrot.lane.b32.xlu0 %v3221_v9, %s3345_s20 }
  0x25   : > { %3257 = vrot.lane.b32.xlu1 %v3211_v4, %s3346_s21 }
  0x28   : > { %3262 = vrot.lane.b32.xlu0 %v3216_v10, %s3346_s21 }
  0x29   : > { %3267 = vrot.lane.b32.xlu1 %v3221_v9, %s3346_s21 }
  0x2c   : > { %3272 = vrot.lane.b32.xlu0 %v3211_v4, %s3347_s22 }
  0x2d   : > { %3277 = vrot.lane.b32.xlu1 %v3216_v10, %s3347_s22 }
  0x30   : > { %3282 = vrot.lane.b32.xlu0 %v3221_v9, %s3347_s22 }
  0x31   : > { %3287 = vrot.lane.b32.xlu1 %v3211_v4, %s3348_s23 }
  0x34   : > { %3292 = vrot.lane.b32.xlu0 %v3216_v10, %s3348_s23 }
  0x35   : > { %3297 = vrot.lane.b32.xlu1 %v3221_v9, %s3348_s23 }
  0x38   : > { %3302 = vrot.lane.b32.xlu0 %v3211_v4, %s3349_s24 }
  0x39   : > { %3307 = vrot.lane.b32.xlu1 %v3216_v10, %s3349_s24 }
  0x3c   : > { %3312 = vrot.lane.b32.xlu0 %v3221_v9, %s3349_s24 }
  0x3d   : > { %3317 = vrot.lane.b32.xlu1 %v3211_v4, %s3350_s25 }
  0x40   : > { %3322 = vrot.lane.b32.xlu0 %v3216_v10, %s3350_s25 }
  0x41   : > { %3327 = vrot.lane.b32.xlu1 %v3221_v9, %s3350_s25 }
  0x44   : > { %845 = vperm.xlu0 %3331, %v177_v14  }
  0x86   : > { %v3213_v16 = vpop.permute.xlu0 %3212 }
  0x87   : > { %v3223_v17 = vpop.permute.xlu1 %3222  ;;  %v3215_v18 = vunpack.i.h.bf16 %v3213_v16  ;;  %v3214_v19 = vunpack.i.l.bf16 %v3213_v16 }
  0x88   : > { %v3224_v20 = vunpack.i.l.bf16 %v3223_v17  ;;  %v3225_v21 = vunpack.i.h.bf16 %v3223_v17 }
  0x89   : > { %v201_v27 = vsel %vm199_vm1, %v3214_v19, %v3215_v18 }
  0x8a   : > { %v3218_v22 = vpop.permute.xlu0 %3217  ;;  %v200_v28 = vsel %vm199_vm1, %v3224_v20, %v3214_v19 }
  0x8b   : > { %v3220_v23 = vunpack.i.h.bf16 %v3218_v22  ;;  %v3219_v24 = vunpack.i.l.bf16 %v3218_v22  ;;  %v3228_v25 = vpop.permute.xlu1 %3227  ;;  %v3511_v22 = vld [vmem:[%s3792_s1 + $0x20] sm:$0xff] }
  0x8c   : > { %v3229_v26 = vunpack.i.l.bf16 %v3228_v25  ;;  %v3230_v29 = vunpack.i.h.bf16 %v3228_v25 }
  0x8d   : > { %v3417_v30 = vpack.c.bf16 %v3220_v23, %v3215_v18  ;;  %v203_v31 = vsel %vm199_vm1, %v3219_v24, %v3220_v23  ;;  %v202_v32 = vsel %vm199_vm1, %v3225_v21, %v3219_v24 }
  0x8e   : > { %v3233_v33 = vpop.permute.xlu0 %3232  ;;  %v3419_v34 = vpack.c.bf16 %v203_v31, %v201_v27  ;;  %v3421_v35 = vpack.c.bf16 %v202_v32, %v200_v28  ;;  %v515_v40 = vsel %vm513_vm2, %v3229_v26, %v3230_v29  ;;  %v3531_v28 = vld [vmem:[%s3792_s1 + $0x30] sm:$0xff] }
  0x8f   : > { %v3235_v36 = vunpack.i.h.bf16 %v3233_v33  ;;  %v3234_v37 = vunpack.i.l.bf16 %v3233_v33  ;;  %3059 = vmatpush3.bf16.msra.mxu1 %v3417_v30  ;;  %v3238_v38 = vpop.permute.xlu1 %3237 }
  0x90   : > { %3054 = vmatprep.subr.bf16.mxu0 %v3419_v34  ;;  %3064 = vmatprep.subr.bf16.mxu1 %v3340_v0  ;;  %v3240_v43 = vunpack.i.h.bf16 %v3238_v38  ;;  %v3239_v44 = vunpack.i.l.bf16 %v3238_v38 }
  0x91   : > { %3056 = vmatpush1.bf16.msra.mxu0 %v3421_v35  ;;  %v517_v41 = vsel %vm513_vm2, %v3234_v37, %v3235_v36  ;;  %v3438_v46 = vpack.c.bf16 %v3235_v36, %v3230_v29  ;;  %v3548_v36 = vld [vmem:[%s3792_s1 + $0x38] sm:$0xff] }
  0x92   : > { %v3243_v42 = vpop.permute.xlu0 %3242  ;;  %2946 = vmatmul.mubr.msk.f32.vlgmr.msra.gmra.mrb[0].mxu1 %vm210_vm3, %v2835_v39  ;;  %3061 = vmatprep.subr.bf16.mxu0 %v3060_v12  ;;  %v3436_v45 = vpack.c.bf16 %v517_v41, %v515_v40  ;;  %v516_v53 = vsel %vm513_vm2, %v3240_v43, %v3234_v37  ;;  %v514_v54 = vsel %vm513_vm2, %v3239_v44, %v3229_v26  ;;  %v3566_v41 = vld [vmem:[%s3792_s1 + $0x48] sm:$0xff] }
  0x93   : > { %v3245_v47 = vunpack.i.h.bf16 %v3243_v42  ;;  %v3244_v48 = vunpack.i.l.bf16 %v3243_v42  ;;  %3066 = vmatpush3.bf16.msra.mxu1 %v3065_v11  ;;  %2952 = vmatprep.mubr.msk.f32.mxu1 %vm3341_vm0, %v3342_v8  ;;  %v3248_v49 = vpop.permute.xlu1 %3247  ;;  %v3469_v61 = vpack.c.bf16 %v516_v53, %v514_v54  ;;  %v3611_v53 = vld [vmem:[%s3792_s1 + $0x50] sm:$0xff] }
  0x94   : > { %2836 = vmatmul.mubr.msk.f32.vlgmr.msra.gmra.mrb[0].mxu0 %vm210_vm3, %v2835_v39  ;;  %3071 = vmatprep.subr.bf16.mxu1 %v3340_v0  ;;  %v3250_v51 = vunpack.i.h.bf16 %v3248_v49  ;;  %v3249_v52 = vunpack.i.l.bf16 %v3248_v49 }
  0x95   : > { %3063 = vmatpush1.bf16.msra.mxu0 %v3062_v13  ;;  %422 = vmatprep.mubr.f32.mxu0 %v3342_v8  ;;  %v687_v56 = vsel %vm685_vm4, %v3244_v48, %v3245_v47  ;;  %v2847_v13 = vld [vmem:[%s3792_s1 + $0x28] sm:$0xff] }
  0x96   : > { %v3253_v55 = vpop.permute.xlu0 %3252  ;;  %2953 = vmatmul.mubr.msk.f32.vlgmr.msra.gmra.mrb[2].mxu1 %vm210_vm3, %v178_v50  ;;  %3068 = vmatprep.subr.bf16.mxu0 %v3436_v45  ;;  %v3459_v57 = vpack.c.bf16 %v3250_v51, %v3245_v47  ;;  %v689_v58 = vsel %vm685_vm4, %v3249_v52, %v3250_v51 }
  0x97   : > { %3073 = vmatpush3.bf16.msra.mxu1 %v3438_v46  ;;  %2959 = vmatprep.mubr.msk.f32.mxu1 %vm3341_vm0, %v3342_v8  ;;  %v3258_v59 = vpop.permute.xlu1 %3257  ;;  %v3255_v63 = vunpack.i.h.bf16 %v3253_v55  ;;  %v3254_v1 = vunpack.i.l.bf16 %v3253_v55  ;;  %v3471_v2 = vpack.c.bf16 %v689_v58, %v687_v56  ;;  %v3628_v56 = vld [vmem:[%s3792_s1 + $0x58] sm:$0xff] }
  0x98   : > { %3078 = vmatprep.subr.bf16.mxu1 %v3340_v0  ;;  %v3260_v62 = vunpack.i.h.bf16 %v3258_v59  ;;  %v3259_v6 = vunpack.i.l.bf16 %v3258_v59 }
  0x99   : > { %v686_v11 = vsel %vm685_vm4, %v3254_v1, %v3244_v48  ;;  %v688_v12 = vsel %vm685_vm4, %v3255_v63, %v3249_v52  ;;  %v3592_v48 = vld [vmem:[%s3792_s1 + $0x40] sm:$0xff] }
  0x9a   : > { %v3263_v3 = vpop.permute.xlu0 %3262  ;;  %2960 = vmatmul.mubr.msk.f32.vlgmr.msra.gmra.mrb[4].mxu1 %vm210_vm3, %v2840_v60  ;;  %v876_v14 = vsel %vm874_vm5, %v3259_v6, %v3260_v62  ;;  %v3500_v18 = vpack.c.bf16 %v688_v12, %v686_v11 }
  0x9b   : > { %v3265_v4 = vunpack.i.h.bf16 %v3263_v3  ;;  %v3264_v5 = vunpack.i.l.bf16 %v3263_v3  ;;  %3080 = vmatpush3.bf16.msra.mxu1 %v3459_v57  ;;  %2966 = vmatprep.mubr.msk.f32.mxu1 %vm3341_vm0, %v3342_v8  ;;  %v3268_v9 = vpop.permute.xlu1 %3267 }
  0x9c   : > { %2838 = vmatmul.mubr.msk.f32.vlgmr.msra.gmra.mrb[0].mxu0 %vm210_vm3, %v178_v50  ;;  %3085 = vmatprep.subr.bf16.mxu1 %v3340_v0  ;;  %v3270_v23 = vunpack.i.h.bf16 %v3268_v9  ;;  %v3269_v24 = vunpack.i.l.bf16 %v3268_v9 }
  0x9d   : > { %v3086_v10 = vpack.c.bf16 %v3265_v4, %v3260_v62  ;;  %3070 = vmatpush1.bf16.msra.mxu0 %v3469_v61  ;;  %591 = vmatprep.mubr.f32.mxu0 %v3342_v8  ;;  %v878_v15 = vsel %vm874_vm5, %v3264_v5, %v3265_v4  ;;  %v3665_v4 = vld [vmem:[%s3792_s1 + $0x60] sm:$0xff] }
  0x9e   : > { %2967 = vmatmul.mubr.msk.f32.vlgmr.msra.gmra.mrb[6].mxu1 %vm210_vm3, %v2843_v7  ;;  %3075 = vmatprep.subr.bf16.mxu0 %v3471_v2  ;;  %v3496_v16 = vpop.permute.xlu0 %3272  ;;  %v3081_v19 = vpack.c.bf16 %v878_v15, %v876_v14  ;;  %v877_v29 = vsel %vm874_vm5, %v3270_v23, %v3264_v5 }
  0x9f   : > { %3087 = vmatpush3.bf16.msra.mxu1 %v3086_v10  ;;  %2973 = vmatprep.mubr.msk.f32.mxu1 %vm3341_vm0, %v3342_v8  ;;  %v3498_v17 = vpop.permute.xlu1 %3277  ;;  %v3275_v20 = vunpack.i.h.bf16 %v3496_v16  ;;  %v3274_v37 = vunpack.i.l.bf16 %v3496_v16  ;;  %v3687_v10 = vld [vmem:[%s3792_s1 + $0x70] sm:$0xff] }
  0xa0   : > { %3092 = vmatprep.subr.bf16.mxu1 %v3340_v0  ;;  %v3280_v21 = vunpack.i.h.bf16 %v3498_v17  ;;  %v3279_v38 = vunpack.i.l.bf16 %v3498_v17 }
  0xa1   : > { %v1338_v43 = vsel %vm1336_vm6, %v3274_v37, %v3275_v20 }
  0xa2   : > { %2974 = vmatmul.mubr.msk.f32.vlgmr.msra.gmra.mrb[8].mxu1 %vm210_vm3, %v2847_v13  ;;  %v3515_v25 = vpop.permute.xlu0 %3282  ;;  %v3523_v27 = vpack.c.bf16 %v3280_v21, %v3275_v20  ;;  %v1340_v49 = vsel %vm1336_vm6, %v3279_v38, %v3280_v21 }
  0xa3   : > { %3094 = vmatpush3.bf16.msra.mxu1 %v3417_v30  ;;  %2980 = vmatprep.mubr.msk.f32.mxu1 %vm3341_vm0, %v3342_v8  ;;  %v3517_v26 = vpop.permute.xlu1 %3287  ;;  %v875_v30 = vsel %vm874_vm5, %v3269_v24, %v3259_v6  ;;  %v3285_v50 = vunpack.i.h.bf16 %v3515_v25  ;;  %v3600_v51 = vpack.c.bf16 %v1340_v49, %v1338_v43 }
  0xa4   : > { %2841 = vmatmul.mubr.msk.f32.vlgmr.msra.gmra.mrb[0].mxu0 %vm210_vm3, %v2840_v60  ;;  %3099 = vmatprep.subr.bf16.mxu1 %v3340_v0  ;;  %v3083_v33 = vpack.c.bf16 %v877_v29, %v875_v30  ;;  %v3290_v39 = vunpack.i.h.bf16 %v3517_v26  ;;  %v3643_v60 = vld [vmem:[%s3792_s1 + $0x68] sm:$0xff]  ;;  %v3289_v1 = vunpack.i.l.bf16 %v3517_v26 }
  0xa5   : > { %3077 = vmatpush1.bf16.msra.mxu0 %v3500_v18  ;;  %763 = vmatprep.mubr.f32.mxu0 %v3342_v8  ;;  %v1339_v55 = vsel %vm1336_vm6, %v3285_v50, %v3279_v38 }
  0xa6   : > { %2981 = vmatmul.mubr.msk.f32.vlgmr.msra.gmra.mrb[10].mxu1 %vm210_vm3, %v3511_v22  ;;  %3082 = vmatprep.subr.bf16.mxu0 %v3081_v19  ;;  %v3538_v31 = vpop.permute.xlu0 %3292 }
  0xa7   : > { %3101 = vmatpush3.bf16.msra.mxu1 %v3459_v57  ;;  %2987 = vmatprep.mubr.msk.f32.mxu1 %vm3341_vm0, %v3342_v8  ;;  %v3540_v32 = vpop.permute.xlu1 %3297  ;;  %v3295_v40 = vunpack.i.h.bf16 %v3538_v31  ;;  %v3294_v3 = vunpack.i.l.bf16 %v3538_v31 }
  0xa8   : > { %3106 = vmatprep.subr.bf16.mxu1 %v3340_v0  ;;  %v3300_v11 = vunpack.i.h.bf16 %v3540_v32  ;;  %v3299_v12 = vunpack.i.l.bf16 %v3540_v32 }
  0xa9   : > { %v3128_v44 = vpack.c.bf16 %v3295_v40, %v3290_v39 }
  0xaa   : > { %2988 = vmatmul.mubr.msk.f32.vlgmr.msra.gmra.mrb[12].mxu1 %vm210_vm3, %v3531_v28  ;;  %v1811_v16 = vsel %vm1810_vm7, %v3299_v12, %v3289_v1 }
  0xab   : > { %3108 = vmatpush3.bf16.msra.mxu1 %v3523_v27  ;;  %2994 = vmatprep.mubr.msk.f32.mxu1 %vm3341_vm0, %v3342_v8  ;;  %v3572_v42 = vpop.permute.xlu1 %3307 }
  0xac   : > { %2844 = vmatmul.mubr.msk.f32.vlgmr.msra.gmra.mrb[0].mxu0 %vm210_vm3, %v2843_v7  ;;  %3113 = vmatprep.subr.bf16.mxu1 %v3340_v0  ;;  %v1814_v7 = vsel %vm1810_vm7, %v3294_v3, %v3295_v40  ;;  %v3309_v15 = vunpack.i.l.bf16 %v3572_v42 }
  0xad   : > { %3084 = vmatpush1.bf16.msra.mxu0 %v3083_v33  ;;  %952 = vmatprep.mubr.f32.mxu0 %v3342_v8 }
  0xae   : > { %3089 = vmatprep.subr.bf16.mxu0 %v3419_v34  ;;  %2995 = vmatmul.mubr.msk.f32.vlgmr.msra.gmra.mrb[14].mxu1 %vm210_vm3, %v3548_v36  ;;  %v3570_v34 = vpop.permute.xlu0 %3302 }
  0xaf   : > { %3115 = vmatpush3.bf16.msra.mxu1 %v3459_v57  ;;  %3001 = vmatprep.mubr.msk.f32.mxu1 %vm3341_vm0, %v3342_v8  ;;  %v3305_v47 = vunpack.i.h.bf16 %v3570_v34  ;;  %v3648_v62 = vpop.permute.xlu1 %3317  ;;  %v3304_v14 = vunpack.i.l.bf16 %v3570_v34 }
  0xb0   : > { %2848 = vmatmul.mubr.msk.f32.vlgmr.msra.gmra.mrb[2].mxu0 %vm210_vm3, %v2847_v13  ;;  %3120 = vmatprep.subr.bf16.mxu1 %v3340_v0  ;;  %v3320_v5 = vunpack.i.h.bf16 %v3648_v62  ;;  %v3319_v26 = vunpack.i.l.bf16 %v3648_v62 }
  0xb1   : > { %3091 = vmatpush1.bf16.msra.mxu0 %v3421_v35  ;;  %1096 = vmatprep.mubr.f32.mxu0 %v3342_v8  ;;  %v3310_v35 = vunpack.i.h.bf16 %v3572_v42  ;;  %v1984_v17 = vsel %vm1982_vm8, %v3304_v14, %v3305_v47 }
  0xb2   : > { %3096 = vmatprep.subr.bf16.mxu0 %v3471_v2  ;;  %3002 = vmatmul.mubr.msk.f32.vlgmr.msra.gmra.mrb[16].mxu1 %vm210_vm3, %v3566_v41  ;;  %v3631_v58 = vpop.permute.xlu0 %3312  ;;  %v2607_v29 = vsel %vm2605_vm9, %v3319_v26, %v3320_v5 }
  0xb3   : > { %3122 = vmatpush3.bf16.msra.mxu1 %v3438_v46  ;;  %3008 = vmatprep.mubr.msk.f32.mxu1 %vm3341_vm0, %v3342_v8  ;;  %v3284_v46 = vunpack.i.l.bf16 %v3515_v25  ;;  %v3135_v52 = vpack.c.bf16 %v3310_v35, %v3305_v47  ;;  %v1986_v19 = vsel %vm1982_vm8, %v3309_v15, %v3310_v35  ;;  %v3314_v21 = vunpack.i.l.bf16 %v3631_v58 }
  0xb4   : > { %3127 = vmatprep.subr.bf16.mxu1 %v3340_v0 }
  0xb5   : > { %v1337_v54 = vsel %vm1336_vm6, %v3284_v46, %v3274_v37  ;;  %v1983_v23 = vsel %vm1982_vm8, %v3314_v21, %v3304_v14 }
  0xb6   : > { %3009 = vmatmul.mubr.msk.f32.vlgmr.msra.gmra.mrb[18].mxu1 %vm210_vm3, %v3592_v48  ;;  %v3633_v59 = vpack.c.bf16 %v1339_v55, %v1337_v54  ;;  %v3650_v63 = vpop.permute.xlu0 %3322 }
  0xb7   : > { %3129 = vmatpush3.bf16.msra.mxu1 %v3128_v44  ;;  %3015 = vmatprep.mubr.msk.f32.mxu1 %vm3341_vm0, %v3342_v8  ;;  %v3325_v6 = vunpack.i.h.bf16 %v3650_v63 }
  0xb8   : > { %2850 = vmatmul.mubr.msk.f32.vlgmr.msra.gmra.mrb[2].mxu0 %vm210_vm3, %v3511_v22  ;;  %3134 = vmatprep.subr.bf16.mxu1 %v3340_v0  ;;  %v3130_v22 = vpack.c.bf16 %v1986_v19, %v1984_v17 }
  0xb9   : > { %3098 = vmatpush1.bf16.msra.mxu0 %v3500_v18  ;;  %1242 = vmatprep.mubr.f32.mxu0 %v3342_v8  ;;  %v3163_v9 = vpack.c.bf16 %v3325_v6, %v3320_v5 }
  0xba   : > { %3016 = vmatmul.mubr.msk.f32.vlgmr.msra.gmra.mrb[20].mxu1 %vm210_vm3, %v3611_v53  ;;  %3103 = vmatprep.subr.bf16.mxu0 %v3600_v51 }
  0xbb   : > { %3136 = vmatpush3.bf16.msra.mxu1 %v3135_v52  ;;  %3022 = vmatprep.mubr.msk.f32.mxu1 %vm3341_vm0, %v3342_v8 }
  0xbc   : > { %3141 = vmatprep.subr.bf16.mxu1 %v3340_v0 }
  0xbe   : > { %3023 = vmatmul.mubr.msk.f32.vlgmr.msra.gmra.mrb[22].mxu1 %vm210_vm3, %v3628_v56 }
  0xbf   : > { %3143 = vmatpush3.bf16.msra.mxu1 %v3523_v27  ;;  %3029 = vmatprep.mubr.msk.f32.mxu1 %vm3341_vm0, %v3342_v8  ;;  %v3324_v27 = vunpack.i.l.bf16 %v3650_v63 }
  0xc0   : > { %2853 = vmatmul.mubr.msk.f32.vlgmr.msra.gmra.mrb[2].mxu0 %vm210_vm3, %v3531_v28  ;;  %3148 = vmatprep.subr.bf16.mxu1 %v3340_v0  ;;  %v3328_v28 = vpop.permute.xlu1 %3327 }
  0xc1   : > { %3105 = vmatpush1.bf16.msra.mxu0 %v3633_v59  ;;  %1414 = vmatprep.mubr.f32.mxu0 %v3342_v8  ;;  %v3330_v30 = vunpack.i.h.bf16 %v3328_v28  ;;  %v3329_v31 = vunpack.i.l.bf16 %v3328_v28 }
  0xc2   : > { %3110 = vmatprep.subr.bf16.mxu0 %v3471_v2  ;;  %3030 = vmatmul.mubr.msk.f32.vlgmr.msra.gmra.mrb[24].mxu1 %vm210_vm3, %v3643_v60 }
  0xc3   : > { %3150 = vmatpush3.bf16.msra.mxu1 %v3459_v57  ;;  %3036 = vmatprep.mubr.msk.f32.mxu1 %vm3341_vm0, %v3342_v8  ;;  %v1812_v57 = vsel %vm1810_vm7, %v3289_v1, %v3290_v39  ;;  %v2606_v33 = vsel %vm2605_vm9, %v3329_v31, %v3319_v26 }
  0xc4   : > { %3155 = vmatprep.subr.bf16.mxu1 %v3340_v0  ;;  %v3123_v13 = vpack.c.bf16 %v1814_v7, %v1812_v57 }
  0xc6   : > { %3037 = vmatmul.mubr.msk.f32.vlgmr.msra.gmra.mrb[26].mxu1 %vm210_vm3, %v3665_v4 }
  0xc7   : > { %3157 = vmatpush3.bf16.msra.mxu1 %v3135_v52  ;;  %3043 = vmatprep.mubr.msk.f32.mxu1 %vm3341_vm0, %v3342_v8 }
  0xc8   : > { %2856 = vmatmul.mubr.msk.f32.vlgmr.msra.gmra.mrb[2].mxu0 %vm210_vm3, %v3548_v36  ;;  %3162 = vmatprep.subr.bf16.mxu1 %v3340_v0  ;;  %v2885_v0 = vld [vmem:[%s3792_s1 + $0x78] sm:$0xff] }
  0xc9   : > { %3112 = vmatpush1.bf16.msra.mxu0 %v3500_v18  ;;  %1575 = vmatprep.mubr.f32.mxu0 %v3342_v8 }
  0xca   : > { %3117 = vmatprep.subr.bf16.mxu0 %v3436_v45  ;;  %3044 = vmatmul.mubr.msk.f32.vlgmr.msra.gmra.mrb[28].mxu1 %vm210_vm3, %v3687_v10  ;;  %v1813_v45 = vsel %vm1810_vm7, %v3300_v11, %v3294_v3 }
  0xcb   : > { %3164 = vmatpush3.bf16.msra.mxu1 %v3163_v9  ;;  %3050 = vmatprep.mubr.msk.f32.mxu1 %vm3341_vm0, %v3342_v8  ;;  %v3125_v20 = vpack.c.bf16 %v1813_v45, %v1811_v16 }
  0xcc   : > { %2863 = vmatmul.mubr.msk.f32.vlgmr.msra.gmra.mrb[4].mxu0 %vm210_vm3, %v3566_v41 }
  0xcd   : > { %3119 = vmatpush1.bf16.msra.mxu0 %v3469_v61  ;;  %1719 = vmatprep.mubr.f32.mxu0 %v3342_v8  ;;  %v3315_v61 = vunpack.i.h.bf16 %v3631_v58 }
  0xce   : > { %3124 = vmatprep.subr.bf16.mxu0 %v3123_v13  ;;  %3051 = vmatmul.mubr.msk.f32.vlgmr.msra.gmra.mrb[30].mxu1 %vm210_vm3, %v2885_v0 }
  0xcf   : > { %v1985_v24 = vsel %vm1982_vm8, %v3315_v61, %v3309_v15 }
  0xd0   : > { %v3132_v25 = vpack.c.bf16 %v1985_v24, %v1983_v23 }
  0xd4   : > { %2865 = vmatmul.mubr.msk.f32.vlgmr.msra.gmra.mrb[4].mxu0 %vm210_vm3, %v3592_v48  ;;  %v3753_v48 = vpop.permute.xlu0 %845 }
  0xd5   : > { %3126 = vmatpush1.bf16.msra.mxu0 %v3125_v20  ;;  %1888 = vmatprep.mubr.f32.mxu0 %v3342_v8 }
  0xd6   : > { %3131 = vmatprep.subr.bf16.mxu0 %v3130_v22 }
  0xdc   : > { %2868 = vmatmul.mubr.msk.f32.vlgmr.msra.gmra.mrb[4].mxu0 %vm210_vm3, %v3611_v53 }
  0xdd   : > { %3133 = vmatpush1.bf16.msra.mxu0 %v3132_v25  ;;  %2060 = vmatprep.mubr.f32.mxu0 %v3342_v8 }
  0xde   : > { %3138 = vmatprep.subr.bf16.mxu0 %v3600_v51 }
  0xe4   : > { %2871 = vmatmul.mubr.msk.f32.vlgmr.msra.gmra.mrb[4].mxu0 %vm210_vm3, %v3628_v56 }
  0xe5   : > { %3140 = vmatpush1.bf16.msra.mxu0 %v3633_v59  ;;  %2221 = vmatprep.mubr.f32.mxu0 %v3342_v8 }
  0xe6   : > { %3145 = vmatprep.subr.bf16.mxu0 %v3471_v2  ;;  %v2609_v2 = vsel %vm2605_vm9, %v3324_v27, %v3325_v6 }
  0xe7   : > { %v3158_v32 = vpack.c.bf16 %v2609_v2, %v2607_v29 }
  0xe8   : > { %2878 = vmatmul.mubr.msk.f32.vlgmr.msra.gmra.mrb[6].mxu0 %vm210_vm3, %v3643_v60 }
  0xe9   : > { %3147 = vmatpush1.bf16.msra.mxu0 %v3500_v18  ;;  %2365 = vmatprep.mubr.f32.mxu0 %v3342_v8  ;;  %v2608_v18 = vsel %vm2605_vm9, %v3330_v30, %v3324_v27 }
  0xea   : > { %3152 = vmatprep.subr.bf16.mxu0 %v3130_v22  ;;  %v3160_v36 = vpack.c.bf16 %v2608_v18, %v2606_v33 }
  0xf0   : > { %2880 = vmatmul.mubr.msk.f32.vlgmr.msra.gmra.mrb[6].mxu0 %vm210_vm3, %v3665_v4 }
  0xf1   : > { %3154 = vmatpush1.bf16.msra.mxu0 %v3132_v25  ;;  %2511 = vmatprep.mubr.f32.mxu0 %v3342_v8 }
  0xf2   : > { %3159 = vmatprep.subr.bf16.mxu0 %v3158_v32 }
  0xf8   : > { %2883 = vmatmul.mubr.msk.f32.vlgmr.msra.gmra.mrb[6].mxu0 %vm210_vm3, %v3687_v10 }
  0xf9   : > { %3161 = vmatpush1.bf16.msra.mxu0 %v3160_v36  ;;  %2683 = vmatprep.mubr.f32.mxu0 %v3342_v8 }
 0x100   : > { %2886 = vmatmul.mubr.msk.f32.vlgmr.msra.gmra.mrb[6].mxu0 %vm210_vm3, %v2885_v0 }
 0x165   : > { %v351_v37 = vpop.f32.mrb[0].mxu1 }
 0x166   : > { %v2947_v38 = vpop.f32.mrb[1].mxu1 }
 0x169   : > { %v495_v39 = vpop.f32.mrb[2].mxu1 }
 0x16a   : > { %v496_v40 = vadd.f32 %v495_v39, %v351_v37  ;;  %v2954_v41 = vpop.f32.mrb[3].mxu1 }
 0x16d   : > { %v664_v34 = vpop.f32.mrb[4].mxu1 }
 0x16e   : > { %v670_v42 = vadd.f32 %v664_v34, %v496_v40  ;;  %v2961_v43 = vpop.f32.mrb[5].mxu1 }
 0x171   : > { %v836_v44 = vpop.f32.mrb[6].mxu1 }
 0x172   : > { %v842_v47 = vadd.f32 %v836_v44, %v670_v42  ;;  %v2968_v35 = vpop.f32.mrb[7].mxu1 }
 0x174   : > { %v850_v49 = vadd.f32 %v3753_v48, %v842_v47 }
 0x175   : > { %v1025_v8 = vpop.f32.mrb[8].mxu1 }
 0x176   : > { %v853_v50 = vmax.f32 %v850_v49, 0.0  ;;  %v2975_v46 = vpop.f32.mrb[9].mxu1 }
 0x178   : > { %857 = vst.msk [vmem:[%s3759_s11 + $0x10] sm:$0xff] %vm856_vm10, %v853_v50 }
 0x179   : > { %v1169_v51 = vpop.f32.mrb[10].mxu1 }
 0x17a   : > { %v1170_v52 = vadd.f32 %v1169_v51, %v1025_v8  ;;  %v2982_v53 = vpop.f32.mrb[11].mxu1 }
 0x17d   : > { %v1315_v54 = vpop.f32.mrb[12].mxu1 }
 0x17e   : > { %v1321_v55 = vadd.f32 %v1315_v54, %v1170_v52  ;;  %v2989_v56 = vpop.f32.mrb[13].mxu1 }
 0x17f   : > { %v765_v58 = vpop.f32.mrb[0].mxu0 }
 0x180   : > { %v848_v59 = vadd.f32 %v3753_v48, %v765_v58  ;;  %v767_v60 = vpop.f32.mrb[1].mxu0 }
 0x181   : > { %v849_v62 = vadd.f32 %v3753_v48, %v767_v60  ;;  %v1487_v63 = vpop.f32.mrb[14].mxu1 }
 0x182   : > { %v851_v1 = vmax.f32 %v848_v59, 0.0  ;;  %v1493_v3 = vadd.f32 %v1487_v63, %v1321_v55  ;;  %v2996_v4 = vpop.f32.mrb[15].mxu1 }
 0x183   : > { %v852_v5 = vmax.f32 %v849_v62, 0.0 }
 0x184   : > { %854 = vst [vmem:[%s3759_s11] sm:$0xff] %v851_v1  ;;  %v1496_v6 = vadd.f32 %v1493_v3, %v3753_v48 }
 0x185   : > { %855 = vst [vmem:[%s3759_s11 + $0x8] sm:$0xff] %v852_v5  ;;  %v1648_v57 = vpop.f32.mrb[16].mxu1 }
 0x186   : > { %v1499_v7 = vmax.f32 %v1496_v6, 0.0  ;;  %v3003_v9 = vpop.f32.mrb[17].mxu1 }
 0x188   : > { %2860 = vst.msk [vmem:[%s3759_s11 + $0x28] sm:$0xff] %vm856_vm10, %v1499_v7 }
 0x189   : > { %v1792_v10 = vpop.f32.mrb[18].mxu1 }
 0x18a   : > { %v1793_v11 = vadd.f32 %v1792_v10, %v1648_v57  ;;  %v3010_v12 = vpop.f32.mrb[19].mxu1 }
 0x18d   : > { %v1961_v13 = vpop.f32.mrb[20].mxu1 }
 0x18e   : > { %v1967_v14 = vadd.f32 %v1961_v13, %v1793_v11  ;;  %v3017_v15 = vpop.f32.mrb[21].mxu1 }
 0x191   : > { %v2133_v0 = vpop.f32.mrb[22].mxu1 }
 0x192   : > { %v2139_v45 = vadd.f32 %v2133_v0, %v1967_v14  ;;  %v3024_v16 = vpop.f32.mrb[23].mxu1 }
 0x194   : > { %v2142_v17 = vadd.f32 %v2139_v45, %v3753_v48 }
 0x195   : > { %v2294_v19 = vpop.f32.mrb[24].mxu1 }
 0x196   : > { %v2145_v20 = vmax.f32 %v2142_v17, 0.0  ;;  %v3031_v61 = vpop.f32.mrb[25].mxu1 }
 0x198   : > { %2875 = vst.msk [vmem:[%s3759_s11 + $0x40] sm:$0xff] %vm856_vm10, %v2145_v20 }
 0x199   : > { %v2438_v21 = vpop.f32.mrb[26].mxu1 }
 0x19a   : > { %v2439_v22 = vadd.f32 %v2438_v21, %v2294_v19  ;;  %v3038_v23 = vpop.f32.mrb[27].mxu1 }
 0x19b   : > { %v1416_v24 = vpop.f32.mrb[2].mxu0 }
 0x19c   : > { %v1494_v25 = vadd.f32 %v1416_v24, %v3753_v48  ;;  %v1418_v26 = vpop.f32.mrb[3].mxu0 }
 0x19d   : > { %v1495_v27 = vadd.f32 %v1418_v26, %v3753_v48  ;;  %v2584_v28 = vpop.f32.mrb[28].mxu1 }
 0x19e   : > { %v1497_v29 = vmax.f32 %v1494_v25, 0.0  ;;  %v2590_v2 = vadd.f32 %v2584_v28, %v2439_v22  ;;  %v3045_v30 = vpop.f32.mrb[29].mxu1 }
 0x19f   : > { %v1498_v31 = vmax.f32 %v1495_v27, 0.0 }
 0x1a0   : > { %2858 = vst [vmem:[%s3759_s11 + $0x18] sm:$0xff] %v1497_v29 }
 0x1a1   : > { %2859 = vst [vmem:[%s3759_s11 + $0x20] sm:$0xff] %v1498_v31  ;;  %v2756_v32 = vpop.f32.mrb[30].mxu1 }
 0x1a2   : > { %v2762_v18 = vadd.f32 %v2756_v32, %v2590_v2  ;;  %v3052_v33 = vpop.f32.mrb[31].mxu1 }
 0x1a4   : > { %v2765_v36 = vadd.f32 %v2762_v18, %v3753_v48 }
 0x1a6   : > { %v2768_v37 = vmax.f32 %v2765_v36, 0.0 }
 0x1a8   : > { %2890 = vst.msk [vmem:[%s3759_s11 + $0x58] sm:$0xff] %vm856_vm10, %v2768_v37 }
 0x1b7   : > { %v2062_v38 = vpop.f32.mrb[4].mxu0 }
 0x1b8   : > { %v2140_v39 = vadd.f32 %v2062_v38, %v3753_v48  ;;  %v2064_v40 = vpop.f32.mrb[5].mxu0 }
 0x1b9   : > { %v2141_v41 = vadd.f32 %v2064_v40, %v3753_v48 }
 0x1ba   : > { %v2143_v34 = vmax.f32 %v2140_v39, 0.0 }
 0x1bb   : > { %v2144_v42 = vmax.f32 %v2141_v41, 0.0 }
 0x1bc   : > { %2873 = vst [vmem:[%s3759_s11 + $0x30] sm:$0xff] %v2143_v34 }
 0x1bd   : > { %2874 = vst [vmem:[%s3759_s11 + $0x38] sm:$0xff] %v2144_v42 }
 0x1d3   : > { %v2685_v43 = vpop.f32.mrb[6].mxu0 }
 0x1d4   : > { %v2763_v44 = vadd.f32 %v2685_v43, %v3753_v48  ;;  %v2687_v47 = vpop.f32.mrb[7].mxu0 }
 0x1d5   : > { %v2764_v35 = vadd.f32 %v2687_v47, %v3753_v48 }
 0x1d6   : > { %v2766_v49 = vmax.f32 %v2763_v44, 0.0 }
 0x1d7   : > { %v2767_v8 = vmax.f32 %v2764_v35, 0.0 }
 0x1d8   : > { %2888 = vst [vmem:[%s3759_s11 + $0x48] sm:$0xff] %v2766_v49 }
 0x1d9   : > { %2889 = vst [vmem:[%s3759_s11 + $0x50] sm:$0xff] %v2767_v8 }
 0x1da PF: > { %s13_s12 = sadd.s32 1, %s3338_s12  }
 0x1db   : > { %p10_p4 = scmp.ge.s32.totalorder %s13_s12, 4  }
 0x1dd   :  { %12 = sbr.rel (!%p10_p4) target bundleno = 1 (0x1), region = 80 }

// kernel: g_nlayers_pallas.9
= control target key start
LH: loop header
LB: loop body
LE: loop exit
PB: predicated region body
PF: predicated region fallthrough
CT: control target
= control target key end

     0   :  { %s6986_s12 = smov 0   ;;  %s7770_s0 = inlined_call_operand.vmem [shape: f32[2,8,1190], index: 0, kind: input, shape index: {}]   ;;  %s7771_s1 = inlined_call_operand.vmem [shape: f32[16,3,8], index: 1, kind: input, shape index: {}]   ;;  %s7772_s2 = inlined_call_operand.vmem [shape: f32[3,1], index: 2, kind: input, shape index: {}]   ;;  %s7773_s3 = inlined_call_operand.vmem [shape: f32[2,2,2,3,1088], index: 3, kind: output, shape index: {}]  }
   0x1 LB: > { %s6525_s13 = sadd.s32 4294967295, %s6953_s12   ;;  %p6529_p0 = scmp.ge.s32.totalorder %s6953_s12, 1  ;;  %s6953_s12 = sphi %s6986_s12, %s13_s12  }
   0x2   : > { %p137_p1 = scmp.lt.s32.totalorder %s6953_s12, 3 }
   0x4   : > { %p138_p2 = pnand %p6529_p0, %p137_p1 }
   0x5   : > { %p161_p3 = scmp.lt.s32.totalorder (!%p138_p2), %s6525_s13, 1  ;;  %v6955_v0 = vmov (!%p138_p2), 0.0   ;;  %s6956_s18 = smov (!%p138_p2), 127   ;;  %v6963_v13 = vmov (!%p138_p2), 0   ;;  %vm212_vm0 = vcmask (!%p138_p2), 1039360   ;;  %vm230_vm1 = vcmask (!%p138_p2), 64512  }
   0x6   : > { %141 = sbr.rel (%p138_p2) target bundleno = 545 (0x221), region = 32  ;;  %298 = vmatprep.mubr.f32.mxu0 (!%p138_p2), %v6955_v0  ;;  %369 = vmatprep.mubr.f32.mxu1 (!%p138_p2), %v6955_v0  ;;  %s6957_s19 = smov (!%p138_p2), 94   ;;  %v6532_v17 = vld [vmem:[%s7771_s1 + $0x4] sm:$0x7] (!%p138_p2)  ;;  %vm6965_vm2 = vmmov (!%p138_p2), 0   ;;  %vm965_vm3 = vcmask (!%p138_p2), 769024  }
   0x7   : > { %s6958_s20 = smov (!%p138_p2), 93   ;;  %s6959_s21 = smov (!%p138_p2), 126   ;;  %6873 = vset.pattern.permute.xlu1 (!%p138_p2), %v6963_v13  ;;  %6874 = vset.pattern.permute.xlu0 (!%p138_p2), %v6963_v13  ;;  %v182_v33 = vld [vmem:[%s7771_s1] sm:$0x7] (!%p138_p2)  ;;  %v6543_v42 = vld [vmem:[%s7771_s1 + $0x8] sm:$0x7] (!%p138_p2) }
   0x8   : > { %s6960_s22 = smov (!%p138_p2), 92   ;;  %s6961_s23 = smov (!%p138_p2), 60   ;;  %vm1369_vm4 = vcmask (!%p138_p2), 760832   ;;  %v6549_v56 = vld [vmem:[%s7771_s1 + $0xc] sm:$0x7] (!%p138_p2)  ;;  %vm1820_vm5 = vcmask (!%p138_p2), 1031168  }
   0x9   : > { %s6962_s24 = smov (!%p138_p2), 59   ;;  %s6964_s27 = smov (!%p138_p2), 58   ;;  %vm2940_vm6 = vcmask (!%p138_p2), 752640   ;;  %vm4105_vm7 = vcmask (!%p138_p2), 490496   ;;  %vm4512_vm8 = vcmask (!%p138_p2), 482304   ;;  %vm6045_vm9 = vcmask (!%p138_p2), 474112  }
   0xa   : > { %vm1796_vm10 = vcmask (!%p138_p2), 518144  }
   0xd   : > { %s7775_s13 = smov (!%p161_p3, %s6525_s13), 1 }
   0xe   : > { %s6852_s14 = smul.u32 80, %s7775_s13 }
   0xf   : > { %s6853_s8 = smul.u32 144, %s7775_s13 }
  0x10   : > { %s7002_s17 = scalar_lea.vmem %s7770_s0, %s6852_s14 }
  0x11   : > { %v7005_v1 = vld [vmem:[%s7002_s17 + $0x8] sm:$0xff]  ;;  %v7008_v2 = vld [vmem:[%s7002_s17] sm:$0xff]  ;;  %v7013_v3 = vld [vmem:[%s7002_s17 + $0x10] sm:$0xff]  ;;  %s7713_s11 = scalar_lea.vmem %s7773_s3, %s6853_s8 }
  0x12   : > { %196 = vrot.lane.b32.xlu0 %v7005_v1, %s6956_s18  ;;  %194 = vrot.lane.b32.xlu1 %v7008_v2, %s6956_s18  ;;  %v7016_v4 = vld [vmem:[%s7002_s17 + $0x18] sm:$0xff]  ;;  %v7021_v5 = vld [vmem:[%s7002_s17 + $0x20] sm:$0xff] }
  0x13   : > { %v7024_v6 = vld [vmem:[%s7002_s17 + $0x28] sm:$0xff]  ;;  %v7029_v7 = vld [vmem:[%s7002_s17 + $0x30] sm:$0xff]  ;;  %v7032_v8 = vld [vmem:[%s7002_s17 + $0x38] sm:$0xff] }
  0x14   : > { %v7037_v9 = vld [vmem:[%s7002_s17 + $0x40] sm:$0xff]  ;;  %v7086_v10 = vld [vmem:[%s7002_s17 + $0x48] sm:$0xff] }
  0x16   : > { %198 = vrot.lane.b32.xlu0 %v7013_v3, %s6956_s18  ;;  %200 = vrot.lane.b32.xlu1 %v7016_v4, %s6956_s18 }
  0x1a   : > { %202 = vrot.lane.b32.xlu0 %v7021_v5, %s6956_s18  ;;  %204 = vrot.lane.b32.xlu1 %v7024_v6, %s6956_s18 }
  0x1e   : > { %206 = vrot.lane.b32.xlu0 %v7029_v7, %s6956_s18  ;;  %208 = vrot.lane.b32.xlu1 %v7032_v8, %s6956_s18 }
  0x22   : > { %210 = vrot.lane.b32.xlu0 %v7037_v9, %s6956_s18  ;;  %949 = vrot.lane.b32.xlu1 %v7005_v1, %s6957_s19 }
  0x26   : > { %951 = vrot.lane.b32.xlu0 %v7013_v3, %s6957_s19  ;;  %947 = vrot.lane.b32.xlu1 %v7008_v2, %s6957_s19 }
  0x2a   : > { %953 = vrot.lane.b32.xlu0 %v7016_v4, %s6957_s19  ;;  %955 = vrot.lane.b32.xlu1 %v7021_v5, %s6957_s19 }
  0x2e   : > { %957 = vrot.lane.b32.xlu0 %v7024_v6, %s6957_s19  ;;  %959 = vrot.lane.b32.xlu1 %v7029_v7, %s6957_s19 }
  0x32   : > { %961 = vrot.lane.b32.xlu0 %v7032_v8, %s6957_s19  ;;  %963 = vrot.lane.b32.xlu1 %v7037_v9, %s6957_s19 }
  0x36   : > { %1357 = vrot.lane.b32.xlu0 %v7016_v4, %s6958_s20  ;;  %1359 = vrot.lane.b32.xlu1 %v7021_v5, %s6958_s20 }
  0x3a   : > { %1355 = vrot.lane.b32.xlu0 %v7013_v3, %s6958_s20  ;;  %1353 = vrot.lane.b32.xlu1 %v7005_v1, %s6958_s20 }
  0x3e   : > { %1351 = vrot.lane.b32.xlu0 %v7008_v2, %s6958_s20  ;;  %1365 = vrot.lane.b32.xlu1 %v7032_v8, %s6958_s20 }
  0x42   : > { %1367 = vrot.lane.b32.xlu0 %v7037_v9, %s6958_s20  ;;  %1363 = vrot.lane.b32.xlu1 %v7029_v7, %s6958_s20 }
  0x46   : > { %1361 = vrot.lane.b32.xlu0 %v7024_v6, %s6958_s20  ;;  %1804 = vrot.lane.b32.xlu1 %v7005_v1, %s6959_s21 }
  0x4a   : > { %1806 = vrot.lane.b32.xlu0 %v7013_v3, %s6959_s21  ;;  %1802 = vrot.lane.b32.xlu1 %v7008_v2, %s6959_s21 }
  0x4e   : > { %1808 = vrot.lane.b32.xlu0 %v7016_v4, %s6959_s21  ;;  %1810 = vrot.lane.b32.xlu1 %v7021_v5, %s6959_s21 }
  0x52   : > { %1812 = vrot.lane.b32.xlu0 %v7024_v6, %s6959_s21  ;;  %1814 = vrot.lane.b32.xlu1 %v7029_v7, %s6959_s21 }
  0x56   : > { %1816 = vrot.lane.b32.xlu0 %v7032_v8, %s6959_s21  ;;  %1818 = vrot.lane.b32.xlu1 %v7037_v9, %s6959_s21 }
  0x5a   : > { %2928 = vrot.lane.b32.xlu0 %v7016_v4, %s6960_s22  ;;  %2930 = vrot.lane.b32.xlu1 %v7021_v5, %s6960_s22 }
  0x5e   : > { %2926 = vrot.lane.b32.xlu0 %v7013_v3, %s6960_s22  ;;  %2924 = vrot.lane.b32.xlu1 %v7005_v1, %s6960_s22 }
  0x62   : > { %2922 = vrot.lane.b32.xlu0 %v7008_v2, %s6960_s22  ;;  %2936 = vrot.lane.b32.xlu1 %v7032_v8, %s6960_s22 }
  0x66   : > { %2938 = vrot.lane.b32.xlu0 %v7037_v9, %s6960_s22  ;;  %2934 = vrot.lane.b32.xlu1 %v7029_v7, %s6960_s22 }
  0x6a   : > { %2932 = vrot.lane.b32.xlu0 %v7024_v6, %s6960_s22  ;;  %4087 = vrot.lane.b32.xlu1 %v7005_v1, %s6961_s23 }
  0x6e   : > { %4085 = vrot.lane.b32.xlu1 %v7008_v2, %s6961_s23  ;;  %4089 = vrot.lane.b32.xlu0 %v7013_v3, %s6961_s23 }
  0x72   : > { %4093 = vrot.lane.b32.xlu1 %v7021_v5, %s6961_s23  ;;  %4091 = vrot.lane.b32.xlu0 %v7016_v4, %s6961_s23 }
  0x76   : > { %4097 = vrot.lane.b32.xlu1 %v7029_v7, %s6961_s23  ;;  %4095 = vrot.lane.b32.xlu0 %v7024_v6, %s6961_s23 }
  0x7a   : > { %4101 = vrot.lane.b32.xlu1 %v7037_v9, %s6961_s23  ;;  %4099 = vrot.lane.b32.xlu0 %v7032_v8, %s6961_s23 }
  0x7e   : > { %4498 = vrot.lane.b32.xlu1 %v7016_v4, %s6962_s24  ;;  %4103 = vrot.lane.b32.xlu0 %v7086_v10, %s6961_s23 }
  0x82   : > { %4496 = vrot.lane.b32.xlu1 %v7013_v3, %s6962_s24  ;;  %4500 = vrot.lane.b32.xlu0 %v7021_v5, %s6962_s24 }
  0x84   : > { %v197_v11 = vpop.permute.xlu0 %196  ;;  %v195_v12 = vpop.permute.xlu1 %194 }
  0x85   : > { %v7109_v18 = vsel %vm212_vm0, %v195_v12, %v197_v11  ;;  %v6556_v12 = vld [vmem:[%s7771_s1 + $0x14] sm:$0x7] }
  0x86   : > { %4492 = vrot.lane.b32.xlu1 %v7008_v2, %s6962_s24  ;;  %4494 = vrot.lane.b32.xlu0 %v7005_v1, %s6962_s24 }
  0x88   : > { %v199_v14 = vpop.permute.xlu0 %198  ;;  %v201_v15 = vpop.permute.xlu1 %200 }
  0x89   : > { %v7100_v16 = vsel %vm212_vm0, %v197_v11, %v199_v14  ;;  %v7123_v22 = vsel %vm212_vm0, %v199_v14, %v201_v15 }
  0x8a   : > { %234 = vmatprep.subr.mxu0 %v7100_v16  ;;  %4508 = vrot.lane.b32.xlu1 %v7037_v9, %s6962_s24 }
  0x8b   : > { %235 = vmatpush1.msra.mxu0 %v7109_v18  ;;  %4506 = vrot.lane.b32.xlu0 %v7032_v8, %s6962_s24 }
  0x8c   : > { %v203_v19 = vpop.permute.xlu0 %202  ;;  %v205_v20 = vpop.permute.xlu1 %204  ;;  %6533 = vmatmul.mubr.msk.f32.vlgmr.msra.gmra.mrb[0].mxu0 %vm230_vm1, %v6532_v17 }
  0x8d   : > { %v7116_v21 = vsel %vm212_vm0, %v201_v15, %v203_v19  ;;  %440 = vmatprep.mubr.f32.mxu0 %v6955_v0  ;;  %v7134_v26 = vsel %vm212_vm0, %v203_v19, %v205_v20 }
  0x8e   : > { %305 = vmatprep.subr.mxu1 %v7116_v21  ;;  %4502 = vrot.lane.b32.xlu1 %v7024_v6, %s6962_s24 }
  0x8f   : > { %306 = vmatpush1.msra.mxu1 %v7123_v22  ;;  %4504 = vrot.lane.b32.xlu0 %v7029_v7, %s6962_s24 }
  0x90   : > { %v207_v23 = vpop.permute.xlu0 %206  ;;  %v209_v24 = vpop.permute.xlu1 %208  ;;  %6534 = vmatmul.mubr.msk.f32.vlgmr.msra.gmra.mrb[0].mxu1 %vm230_vm1, %v6532_v17 }
  0x91   : > { %v7130_v25 = vsel %vm212_vm0, %v205_v20, %v207_v23  ;;  %511 = vmatprep.mubr.f32.mxu1 %v6955_v0  ;;  %v7154_v30 = vsel %vm212_vm0, %v207_v23, %v209_v24 }
  0x92   : > { %376 = vmatprep.subr.mxu0 %v7130_v25  ;;  %6031 = vrot.lane.b32.xlu1 %v7016_v4, %s6964_s27 }
  0x93   : > { %377 = vmatpush1.msra.mxu0 %v7134_v26  ;;  %4510 = vrot.lane.b32.xlu0 %v7086_v10, %s6962_s24 }
  0x94   : > { %v7142_v27 = vpop.permute.xlu0 %210  ;;  %6535 = vmatmul.mubr.msk.f32.vlgmr.msra.gmra.mrb[2].mxu0 %vm230_vm1, %v6532_v17  ;;  %6676 = vmatprep.subr.mxu0 %v6955_v0  ;;  %v950_v28 = vpop.permute.xlu1 %949 }
  0x95   : > { %6677 = vmatpush3.msra.mxu0 %v7142_v27  ;;  %v7149_v29 = vsel %vm212_vm0, %v209_v24, %v7142_v27  ;;  %6678 = vmatprep.mubr.msk.f32.mxu0 %vm6965_vm2, %v6955_v0 }
  0x96   : > { %447 = vmatprep.subr.mxu1 %v7149_v29  ;;  %591 = vmatprep.subr.mxu0 %v7005_v1 }
  0x97   : > { %448 = vmatpush1.msra.mxu1 %v7154_v30  ;;  %6029 = vrot.lane.b32.xlu1 %v7013_v3, %s6964_s27 }
  0x98   : > { %v952_v31 = vpop.permute.xlu0 %951  ;;  %6536 = vmatmul.mubr.msk.f32.vlgmr.msra.gmra.mrb[2].mxu1 %vm230_vm1, %v6532_v17  ;;  %6679 = vmatmul.mubr.msk.f32.vlgmr.msra.gmra.mrb[4].mxu0 %vm230_vm1, %v6532_v17  ;;  %v948_v32 = vpop.permute.xlu1 %947 }
  0x99   : > { %592 = vmatpush1.msra.mxu0 %v7008_v2  ;;  %662 = vmatprep.subr.mxu1 %v7016_v4  ;;  %v7177_v36 = vsel %vm965_vm3, %v950_v28, %v952_v31  ;;  %v7184_v37 = vsel %vm965_vm3, %v948_v32, %v950_v28 }
  0x9a   : > { %655 = vmatprep.mubr.f32.mxu0 %v6955_v0  ;;  %663 = vmatpush1.msra.mxu1 %v7013_v3  ;;  %v181_v3 = vld [vmem:[%s7772_s2] sm:$0x7] }
  0x9b   : > { %726 = vmatprep.mubr.f32.mxu1 %v6955_v0  ;;  %733 = vmatprep.subr.mxu0 %v7024_v6 }
  0x9c   : > { %v954_v34 = vpop.permute.xlu0 %953  ;;  %6538 = vmatmul.mubr.msk.f32.vlgmr.msra.gmra.mrb[0].mxu0 %vm230_vm1, %v182_v33  ;;  %6539 = vmatmul.mubr.msk.f32.vlgmr.msra.gmra.mrb[0].mxu1 %vm230_vm1, %v182_v33  ;;  %v956_v35 = vpop.permute.xlu1 %955 }
  0x9d   : > { %734 = vmatpush1.msra.mxu0 %v7021_v5  ;;  %804 = vmatprep.subr.mxu1 %v7032_v8  ;;  %v7195_v41 = vsel %vm965_vm3, %v954_v34, %v956_v35  ;;  %v7210_v45 = vsel %vm965_vm3, %v952_v31, %v954_v34  ;;  %v6555_v34 = vld [vmem:[%s7771_s1 + $0x10] sm:$0x7] }
  0x9e   : > { %986 = vmatprep.subr.mxu0 %v7177_v36  ;;  %805 = vmatpush1.msra.mxu1 %v7029_v7 }
  0x9f   : > { %797 = vmatprep.mubr.f32.mxu0 %v6955_v0  ;;  %868 = vmatprep.mubr.f32.mxu1 %v6955_v0 }
  0xa0   : > { %6681 = vmatprep.subr.mxu1 %v6955_v0  ;;  %v958_v38 = vpop.permute.xlu0 %957  ;;  %6540 = vmatmul.mubr.msk.f32.vlgmr.msra.gmra.mrb[2].mxu0 %vm230_vm1, %v182_v33  ;;  %v960_v39 = vpop.permute.xlu1 %959 }
  0xa1   : > { %6541 = vmatmul.mubr.msk.f32.vlgmr.msra.gmra.mrb[2].mxu1 %vm230_vm1, %v182_v33  ;;  %987 = vmatpush1.msra.mxu0 %v7184_v37  ;;  %v7191_v40 = vsel %vm965_vm3, %v958_v38, %v960_v39  ;;  %v7213_v46 = vsel %vm965_vm3, %v956_v35, %v958_v38 }
  0xa2   : > { %6682 = vmatpush3.msra.mxu1 %v7037_v9  ;;  %1128 = vmatprep.subr.mxu0 %v7191_v40 }
  0xa3   : > { %1057 = vmatprep.subr.mxu1 %v7195_v41  ;;  %6683 = vmatprep.mubr.msk.f32.mxu1 %vm6965_vm2, %v6955_v0 }
  0xa4   : > { %1050 = vmatprep.mubr.f32.mxu0 %v6955_v0  ;;  %v962_v43 = vpop.permute.xlu0 %961  ;;  %v7205_v44 = vpop.permute.xlu1 %963  ;;  %6025 = vrot.lane.b32.xlu1 %v7008_v2, %s6964_s27 }
  0xa5   : > { %6684 = vmatmul.mubr.msk.f32.vlgmr.msra.gmra.mrb[4].mxu1 %vm230_vm1, %v182_v33  ;;  %6544 = vmatmul.mubr.msk.f32.vlgmr.msra.gmra.mrb[0].mxu0 %vm230_vm1, %v6543_v42  ;;  %v7219_v47 = vsel %vm965_vm3, %v962_v43, %v7205_v44  ;;  %v7228_v50 = vsel %vm965_vm3, %v960_v39, %v962_v43 }
  0xa6   : > { %1058 = vmatpush1.msra.mxu1 %v7210_v45  ;;  %1129 = vmatpush1.msra.mxu0 %v7213_v46 }
  0xa7   : > { %1199 = vmatprep.subr.mxu1 %v7219_v47  ;;  %1121 = vmatprep.mubr.f32.mxu1 %v6955_v0 }
  0xa8   : > { %1192 = vmatprep.mubr.f32.mxu0 %v6955_v0  ;;  %6686 = vmatprep.subr.mxu0 %v6955_v0  ;;  %v1358_v48 = vpop.permute.xlu0 %1357  ;;  %v1360_v49 = vpop.permute.xlu1 %1359 }
  0xa9   : > { %6545 = vmatmul.mubr.msk.f32.vlgmr.msra.gmra.mrb[0].mxu1 %vm230_vm1, %v6543_v42  ;;  %6546 = vmatmul.mubr.msk.f32.vlgmr.msra.gmra.mrb[2].mxu0 %vm230_vm1, %v6543_v42  ;;  %v7233_v51 = vsel %vm1369_vm4, %v1358_v48, %v1360_v49 }
  0xaa   : > { %1200 = vmatpush1.msra.mxu1 %v7228_v50  ;;  %6687 = vmatpush3.msra.mxu0 %v7205_v44 }
  0xab   : > { %1461 = vmatprep.subr.mxu1 %v7233_v51  ;;  %1263 = vmatprep.mubr.f32.mxu1 %v6955_v0 }
  0xac   : > { %6688 = vmatprep.mubr.msk.f32.mxu0 %vm6965_vm2, %v6955_v0  ;;  %v1356_v52 = vpop.permute.xlu0 %1355  ;;  %v1354_v53 = vpop.permute.xlu1 %1353  ;;  %6033 = vrot.lane.b32.xlu0 %v7021_v5, %s6964_s27 }
  0xad   : > { %v7244_v54 = vsel %vm1369_vm4, %v1356_v52, %v1358_v48  ;;  %6547 = vmatmul.mubr.msk.f32.vlgmr.msra.gmra.mrb[2].mxu1 %vm230_vm1, %v6543_v42  ;;  %6689 = vmatmul.mubr.msk.f32.vlgmr.msra.gmra.mrb[6].mxu0 %vm230_vm1, %v6543_v42  ;;  %v7249_v55 = vsel %vm1369_vm4, %v1354_v53, %v1356_v52 }
  0xae   : > { %1390 = vmatprep.subr.mxu0 %v7249_v55  ;;  %1462 = vmatpush1.msra.mxu1 %v7244_v54 }
  0xaf   : > { %1525 = vmatprep.mubr.f32.mxu1 %v6955_v0  ;;  %1454 = vmatprep.mubr.f32.mxu0 %v6955_v0 }
  0xb0   : > { %v1352_v57 = vpop.permute.xlu0 %1351  ;;  %v1366_v58 = vpop.permute.xlu1 %1365  ;;  %6041 = vrot.lane.b32.xlu1 %v7037_v9, %s6964_s27  ;;  %6027 = vrot.lane.b32.xlu0 %v7005_v1, %s6964_s27 }
  0xb1   : > { %v7263_v59 = vsel %vm1369_vm4, %v1352_v57, %v1354_v53  ;;  %6551 = vmatmul.mubr.msk.f32.vlgmr.msra.gmra.mrb[0].mxu1 %vm230_vm1, %v6549_v56  ;;  %v6573_v53 = vld [vmem:[%s7771_s1 + $0x1c] sm:$0x7] }
  0xb2   : > { %1391 = vmatpush1.msra.mxu0 %v7263_v59  ;;  %1667 = vmatprep.mubr.f32.mxu1 %v6955_v0 }
  0xb3   : > { %6550 = vmatmul.mubr.msk.f32.vlgmr.msra.gmra.mrb[0].mxu0 %vm230_vm1, %v6549_v56 }
  0xb4   : > { %v7269_v60 = vpop.permute.xlu0 %1367  ;;  %v1364_v61 = vpop.permute.xlu1 %1363  ;;  %6035 = vrot.lane.b32.xlu1 %v7024_v6, %s6964_s27  ;;  %6039 = vrot.lane.b32.xlu0 %v7032_v8, %s6964_s27 }
  0xb5   : > { %v7276_v62 = vsel %vm1369_vm4, %v1364_v61, %v1366_v58  ;;  %v7280_v63 = vsel %vm1369_vm4, %v1366_v58, %v7269_v60  ;;  %1596 = vmatprep.mubr.f32.mxu0 %v6955_v0 }
  0xb6   : > { %1603 = vmatprep.subr.mxu1 %v7280_v63 }
  0xb7   : > { %1604 = vmatpush1.msra.mxu1 %v7276_v62 }
  0xb8   : > { %v1362_v1 = vpop.permute.xlu0 %1361  ;;  %6553 = vmatmul.mubr.msk.f32.vlgmr.msra.gmra.mrb[2].mxu1 %vm230_vm1, %v6549_v56  ;;  %6691 = vmatprep.subr.mxu1 %v6955_v0  ;;  %v1805_v2 = vpop.permute.xlu1 %1804 }
  0xb9   : > { %v7291_v4 = vsel %vm1369_vm4, %v1360_v49, %v1362_v1  ;;  %v7294_v5 = vsel %vm1369_vm4, %v1362_v1, %v1364_v61  ;;  %6692 = vmatpush3.msra.mxu1 %v7269_v60  ;;  %6693 = vmatprep.mubr.msk.f32.mxu1 %vm6965_vm2, %v6955_v0 }
  0xba   : > { %1532 = vmatprep.subr.mxu0 %v7294_v5  ;;  %6037 = vrot.lane.b32.xlu0 %v7029_v7, %s6964_s27 }
  0xbb   : > { %1533 = vmatpush1.msra.mxu0 %v7291_v4  ;;  %1755 = vperm.xlu1 %6873, %v181_v3   ;;  %v6585_v3 = vld [vmem:[%s7771_s1 + $0x24] sm:$0x7] }
  0xbc   : > { %v1807_v6 = vpop.permute.xlu0 %1806  ;;  %6552 = vmatmul.mubr.msk.f32.vlgmr.msra.gmra.mrb[2].mxu0 %vm230_vm1, %v6549_v56  ;;  %6694 = vmatmul.mubr.msk.f32.vlgmr.msra.gmra.mrb[6].mxu1 %vm230_vm1, %v6549_v56  ;;  %v1803_v8 = vpop.permute.xlu1 %1802 }
  0xbd   : > { %v1821_v9 = vsel %vm1820_vm5, %v1803_v8, %v1805_v2  ;;  %v1822_v11 = vsel %vm1820_vm5, %v1805_v2, %v1807_v6  ;;  %1905 = vmatprep.mubr.f32.mxu0 %v6955_v0  ;;  %1976 = vmatprep.mubr.f32.mxu1 %v6955_v0 }
  0xbe   : > { %1841 = vmatprep.subr.mxu0 %v1822_v11  ;;  %6043 = vrot.lane.b32.xlu0 %v7086_v10, %s6964_s27 }
  0xbf   : > { %1842 = vmatpush1.msra.mxu0 %v1821_v9 }
  0xc0   : > { %v1809_v7 = vpop.permute.xlu0 %1808  ;;  %v1811_v13 = vpop.permute.xlu1 %1810  ;;  %6557 = vmatmul.mubr.msk.f32.vlgmr.msra.gmra.mrb[8].mxu0 %vm230_vm1, %v6556_v12 }
  0xc1   : > { %v1823_v14 = vsel %vm1820_vm5, %v1807_v6, %v1809_v7  ;;  %v1824_v15 = vsel %vm1820_vm5, %v1809_v7, %v1811_v13  ;;  %2047 = vmatprep.mubr.f32.mxu0 %v6955_v0 }
  0xc2   : > { %1912 = vmatprep.subr.mxu1 %v1824_v15 }
  0xc3   : > { %1913 = vmatpush1.msra.mxu1 %v1823_v14 }
  0xc4   : > { %v1813_v17 = vpop.permute.xlu0 %1812  ;;  %v1815_v19 = vpop.permute.xlu1 %1814  ;;  %6558 = vmatmul.mubr.msk.f32.vlgmr.msra.gmra.mrb[8].mxu1 %vm230_vm1, %v6556_v12 }
  0xc5   : > { %v1825_v20 = vsel %vm1820_vm5, %v1811_v13, %v1813_v17  ;;  %v1826_v10 = vsel %vm1820_vm5, %v1813_v17, %v1815_v19  ;;  %2118 = vmatprep.mubr.f32.mxu1 %v6955_v0 }
  0xc6   : > { %1983 = vmatprep.subr.mxu0 %v1826_v10 }
  0xc7   : > { %1984 = vmatpush1.msra.mxu0 %v1825_v20 }
  0xc8   : > { %v1817_v23 = vpop.permute.xlu0 %1816  ;;  %6559 = vmatmul.mubr.msk.f32.vlgmr.msra.gmra.mrb[10].mxu0 %vm230_vm1, %v6556_v12  ;;  %6696 = vmatprep.subr.mxu0 %v6955_v0  ;;  %v1819_v24 = vpop.permute.xlu1 %1818 }
  0xc9   : > { %v1827_v28 = vsel %vm1820_vm5, %v1815_v19, %v1817_v23  ;;  %6697 = vmatpush3.msra.mxu0 %v1819_v24  ;;  %v1828_v31 = vsel %vm1820_vm5, %v1817_v23, %v1819_v24  ;;  %6698 = vmatprep.mubr.msk.f32.mxu0 %vm6965_vm2, %v6955_v0 }
  0xca   : > { %2054 = vmatprep.subr.mxu1 %v1828_v31  ;;  %2198 = vmatprep.subr.mxu0 %v7100_v16 }
  0xcb   : > { %2055 = vmatpush1.msra.mxu1 %v1827_v28 }
  0xcc   : > { %v2929_v32 = vpop.permute.xlu0 %2928  ;;  %6560 = vmatmul.mubr.msk.f32.vlgmr.msra.gmra.mrb[10].mxu1 %vm230_vm1, %v6556_v12  ;;  %6699 = vmatmul.mubr.msk.f32.vlgmr.msra.gmra.mrb[12].mxu0 %vm230_vm1, %v6556_v12  ;;  %v7331_v33 = vpop.permute.xlu1 %2930 }
  0xcd   : > { %2199 = vmatpush1.msra.mxu0 %v7109_v18  ;;  %2269 = vmatprep.subr.mxu1 %v7116_v21  ;;  %v7384_v38 = vsel %vm2940_vm6, %v2929_v32, %v7331_v33 }
  0xce   : > { %2270 = vmatpush1.msra.mxu1 %v7123_v22  ;;  %2340 = vmatprep.subr.mxu0 %v7130_v25  ;;  %v6567_v25 = vld [vmem:[%s7771_s1 + $0x18] sm:$0x7] }
  0xcf   : > { %2411 = vmatprep.subr.mxu1 %v7149_v29  ;;  %2262 = vmatprep.mubr.f32.mxu0 %v6955_v0 }
  0xd0   : > { %2333 = vmatprep.mubr.f32.mxu1 %v6955_v0  ;;  %v2927_v16 = vpop.permute.xlu0 %2926  ;;  %6562 = vmatmul.mubr.msk.f32.vlgmr.msra.gmra.mrb[8].mxu0 %vm230_vm1, %v6555_v34  ;;  %v2925_v18 = vpop.permute.xlu1 %2924 }
  0xd1   : > { %6563 = vmatmul.mubr.msk.f32.vlgmr.msra.gmra.mrb[8].mxu1 %vm230_vm1, %v6555_v34  ;;  %2341 = vmatpush1.msra.mxu0 %v7134_v26  ;;  %v7399_v48 = vsel %vm2940_vm6, %v2927_v16, %v2929_v32 }
  0xd2   : > { %2412 = vmatpush1.msra.mxu1 %v7154_v30  ;;  %2557 = vmatprep.subr.mxu0 %v7249_v55  ;;  %v7374_v30 = vsel %vm2940_vm6, %v2925_v18, %v2927_v16  ;;  %v6602_v16 = vld [vmem:[%s7771_s1 + $0x2c] sm:$0x7] }
  0xd3   : > { %2404 = vmatprep.mubr.f32.mxu0 %v6955_v0  ;;  %2475 = vmatprep.mubr.f32.mxu1 %v6955_v0 }
  0xd4   : > { %6701 = vmatprep.subr.mxu1 %v6955_v0  ;;  %v2923_v21 = vpop.permute.xlu0 %2922  ;;  %6564 = vmatmul.mubr.msk.f32.vlgmr.msra.gmra.mrb[10].mxu0 %vm230_vm1, %v6555_v34  ;;  %v2937_v22 = vpop.permute.xlu1 %2936 }
  0xd5   : > { %6565 = vmatmul.mubr.msk.f32.vlgmr.msra.gmra.mrb[10].mxu1 %vm230_vm1, %v6555_v34  ;;  %2558 = vmatpush1.msra.mxu0 %v7263_v59  ;;  %v7387_v39 = vsel %vm2940_vm6, %v2923_v21, %v2925_v18 }
  0xd6   : > { %6702 = vmatpush3.msra.mxu1 %v7142_v27  ;;  %2699 = vmatprep.subr.mxu0 %v7294_v5 }
  0xd7   : > { %2628 = vmatprep.subr.mxu1 %v7233_v51  ;;  %6703 = vmatprep.mubr.msk.f32.mxu1 %vm6965_vm2, %v6955_v0 }
  0xd8   : > { %2621 = vmatprep.mubr.f32.mxu0 %v6955_v0  ;;  %v7363_v26 = vpop.permute.xlu0 %2938  ;;  %v2935_v29 = vpop.permute.xlu1 %2934 }
  0xd9   : > { %6704 = vmatmul.mubr.msk.f32.vlgmr.msra.gmra.mrb[12].mxu1 %vm230_vm1, %v6555_v34  ;;  %6568 = vmatmul.mubr.msk.f32.vlgmr.msra.gmra.mrb[8].mxu0 %vm230_vm1, %v6567_v25  ;;  %v7408_v52 = vsel %vm2940_vm6, %v2937_v22, %v7363_v26  ;;  %v7416_v56 = vsel %vm2940_vm6, %v2935_v29, %v2937_v22 }
  0xda   : > { %2629 = vmatpush1.msra.mxu1 %v7244_v54  ;;  %2700 = vmatpush1.msra.mxu0 %v7291_v4 }
  0xdb   : > { %2770 = vmatprep.subr.mxu1 %v7280_v63  ;;  %2692 = vmatprep.mubr.f32.mxu1 %v6955_v0 }
  0xdc   : > { %2763 = vmatprep.mubr.f32.mxu0 %v6955_v0  ;;  %6706 = vmatprep.subr.mxu0 %v6955_v0  ;;  %v2933_v27 = vpop.permute.xlu0 %2932  ;;  %v7376_v35 = vpop.permute.xlu1 %4087 }
  0xdd   : > { %6569 = vmatmul.mubr.msk.f32.vlgmr.msra.gmra.mrb[8].mxu1 %vm230_vm1, %v6567_v25  ;;  %6570 = vmatmul.mubr.msk.f32.vlgmr.msra.gmra.mrb[10].mxu0 %vm230_vm1, %v6567_v25  ;;  %v7404_v49 = vsel %vm2940_vm6, %v2933_v27, %v2935_v29  ;;  %v7428_v61 = vsel %vm2940_vm6, %v7331_v33, %v2933_v27  ;;  %v6614_v29 = vld [vmem:[%s7771_s1 + $0x34] sm:$0x7] }
  0xde   : > { %2771 = vmatpush1.msra.mxu1 %v7276_v62  ;;  %6707 = vmatpush3.msra.mxu0 %v7269_v60 }
  0xdf   : > { %2961 = vmatprep.subr.mxu0 %v7374_v30  ;;  %3032 = vmatprep.subr.mxu1 %v7384_v38 }
  0xe0   : > { %2834 = vmatprep.mubr.f32.mxu1 %v6955_v0  ;;  %6708 = vmatprep.mubr.msk.f32.mxu0 %vm6965_vm2, %v6955_v0  ;;  %v7394_v42 = vpop.permute.xlu1 %4085  ;;  %v7396_v43 = vpop.permute.xlu0 %4089 }
  0xe1   : > { %6571 = vmatmul.mubr.msk.f32.vlgmr.msra.gmra.mrb[10].mxu1 %vm230_vm1, %v6567_v25  ;;  %6709 = vmatmul.mubr.msk.f32.vlgmr.msra.gmra.mrb[14].mxu0 %vm230_vm1, %v6567_v25 }
  0xe2   : > { %2962 = vmatpush1.msra.mxu0 %v7387_v39  ;;  %3033 = vmatpush1.msra.mxu1 %v7399_v48 }
  0xe3   : > { %3025 = vmatprep.mubr.f32.mxu0 %v6955_v0  ;;  %3096 = vmatprep.mubr.f32.mxu1 %v6955_v0 }
  0xe4   : > { %3103 = vmatprep.subr.mxu0 %v7404_v49  ;;  %3174 = vmatprep.subr.mxu1 %v7408_v52  ;;  %v7422_v57 = vpop.permute.xlu1 %4093  ;;  %v7424_v58 = vpop.permute.xlu0 %4091 }
  0xe5   : > { %6574 = vmatmul.mubr.msk.f32.vlgmr.msra.gmra.mrb[8].mxu0 %vm230_vm1, %v6573_v53  ;;  %6575 = vmatmul.mubr.msk.f32.vlgmr.msra.gmra.mrb[8].mxu1 %vm230_vm1, %v6573_v53 }
  0xe6   : > { %3104 = vmatpush1.msra.mxu0 %v7428_v61  ;;  %3175 = vmatpush1.msra.mxu1 %v7416_v56 }
  0xe7   : > { %3371 = vmatprep.subr.mxu0 %v7249_v55  ;;  %3167 = vmatprep.mubr.f32.mxu0 %v6955_v0 }
  0xe8   : > { %3238 = vmatprep.mubr.f32.mxu1 %v6955_v0  ;;  %6711 = vmatprep.subr.mxu1 %v6955_v0  ;;  %v7438_v1 = vpop.permute.xlu1 %4097  ;;  %v7440_v2 = vpop.permute.xlu0 %4095 }
  0xe9   : > { %6576 = vmatmul.mubr.msk.f32.vlgmr.msra.gmra.mrb[10].mxu0 %vm230_vm1, %v6573_v53  ;;  %6577 = vmatmul.mubr.msk.f32.vlgmr.msra.gmra.mrb[10].mxu1 %vm230_vm1, %v6573_v53  ;;  %v4110_v13 = vsel %vm4105_vm7, %v7422_v57, %v7440_v2 }
  0xea   : > { %6712 = vmatpush3.msra.mxu1 %v7363_v26  ;;  %3372 = vmatpush1.msra.mxu0 %v7263_v59 }
  0xeb   : > { %3442 = vmatprep.subr.mxu1 %v7233_v51  ;;  %3513 = vmatprep.subr.mxu0 %v7294_v5 }
  0xec   : > { %6713 = vmatprep.mubr.msk.f32.mxu1 %vm6965_vm2, %v6955_v0  ;;  %3435 = vmatprep.mubr.f32.mxu0 %v6955_v0  ;;  %v7454_v6 = vpop.permute.xlu1 %4101  ;;  %v7456_v8 = vpop.permute.xlu0 %4099 }
  0xed   : > { %6714 = vmatmul.mubr.msk.f32.vlgmr.msra.gmra.mrb[14].mxu1 %vm230_vm1, %v6573_v53  ;;  %6586 = vmatmul.mubr.msk.f32.vlgmr.msra.gmra.mrb[16].mxu0 %vm230_vm1, %v6585_v3  ;;  %v4113_v15 = vsel %vm4105_vm7, %v7456_v8, %v7454_v6  ;;  %v4112_v20 = vsel %vm4105_vm7, %v7438_v1, %v7456_v8 }
  0xee   : > { %3443 = vmatpush1.msra.mxu1 %v7244_v54  ;;  %3514 = vmatpush1.msra.mxu0 %v7291_v4 }
  0xef   : > { %3584 = vmatprep.subr.mxu1 %v7280_v63  ;;  %3506 = vmatprep.mubr.f32.mxu1 %v6955_v0 }
  0xf0   : > { %3577 = vmatprep.mubr.f32.mxu0 %v6955_v0  ;;  %6716 = vmatprep.subr.mxu0 %v6955_v0  ;;  %v7466_v9 = vpop.permute.xlu1 %4498  ;;  %v4104_v11 = vpop.permute.xlu0 %4103 }
  0xf1   : > { %6587 = vmatmul.mubr.msk.f32.vlgmr.msra.gmra.mrb[16].mxu1 %vm230_vm1, %v6585_v3  ;;  %6588 = vmatmul.mubr.msk.f32.vlgmr.msra.gmra.mrb[18].mxu0 %vm230_vm1, %v6585_v3  ;;  %v4114_v10 = vsel %vm4105_vm7, %v7454_v6, %v4104_v11 }
  0xf2   : > { %3585 = vmatpush1.msra.mxu1 %v7276_v62  ;;  %6717 = vmatpush3.msra.mxu0 %v7269_v60 }
  0xf3   : > { %3728 = vmatprep.subr.mxu0 %v7177_v36  ;;  %3799 = vmatprep.subr.mxu1 %v7195_v41  ;;  %v6584_v36 = vld [vmem:[%s7771_s1 + $0x20] sm:$0x7] }
  0xf4   : > { %3648 = vmatprep.mubr.f32.mxu1 %v6955_v0  ;;  %6718 = vmatprep.mubr.msk.f32.mxu0 %vm6965_vm2, %v6955_v0  ;;  %v4497_v12 = vpop.permute.xlu1 %4496  ;;  %v7484_v7 = vpop.permute.xlu0 %4500 }
  0xf5   : > { %6589 = vmatmul.mubr.msk.f32.vlgmr.msra.gmra.mrb[18].mxu1 %vm230_vm1, %v6585_v3  ;;  %6719 = vmatmul.mubr.msk.f32.vlgmr.msra.gmra.mrb[20].mxu0 %vm230_vm1, %v6585_v3  ;;  %v7545_v23 = vsel %vm4512_vm8, %v7466_v9, %v7484_v7  ;;  %v7557_v32 = vsel %vm4512_vm8, %v4497_v12, %v7466_v9 }
  0xf6   : > { %3729 = vmatpush1.msra.mxu0 %v7184_v37  ;;  %3800 = vmatpush1.msra.mxu1 %v7210_v45  ;;  %v4107_v37 = vsel %vm4105_vm7, %v7376_v35, %v7396_v43  ;;  %v4106_v45 = vsel %vm4105_vm7, %v7394_v42, %v7376_v35 }
  0xf7   : > { %3870 = vmatprep.subr.mxu0 %v7191_v40  ;;  %3941 = vmatprep.subr.mxu1 %v7219_v47  ;;  %v4111_v47 = vsel %vm4105_vm7, %v7440_v2, %v7438_v1 }
  0xf8   : > { %3792 = vmatprep.mubr.f32.mxu0 %v6955_v0  ;;  %3863 = vmatprep.mubr.f32.mxu1 %v6955_v0  ;;  %v4493_v40 = vpop.permute.xlu1 %4492  ;;  %v4495_v41 = vpop.permute.xlu0 %4494 }
  0xf9   : > { %6591 = vmatmul.mubr.msk.f32.vlgmr.msra.gmra.mrb[16].mxu0 %vm230_vm1, %v6584_v36  ;;  %6592 = vmatmul.mubr.msk.f32.vlgmr.msra.gmra.mrb[16].mxu1 %vm230_vm1, %v6584_v36  ;;  %v7533_v19 = vsel %vm4512_vm8, %v4495_v41, %v4497_v12  ;;  %v7548_v24 = vsel %vm4512_vm8, %v4493_v40, %v4495_v41 }
  0xfa   : > { %3871 = vmatpush1.msra.mxu0 %v7213_v46  ;;  %3942 = vmatpush1.msra.mxu1 %v7228_v50  ;;  %v4109_v46 = vsel %vm4105_vm7, %v7424_v58, %v7422_v57  ;;  %v6596_v50 = vld [vmem:[%s7771_s1 + $0x28] sm:$0x7] }
  0xfb   : > { %4127 = vmatprep.subr.mxu0 %v4107_v37  ;;  %3934 = vmatprep.mubr.f32.mxu0 %v6955_v0 }
  0xfc   : > { %4005 = vmatprep.mubr.f32.mxu1 %v6955_v0  ;;  %6721 = vmatprep.subr.mxu1 %v6955_v0  ;;  %v4509_v14 = vpop.permute.xlu1 %4508 }
  0xfd   : > { %6593 = vmatmul.mubr.msk.f32.vlgmr.msra.gmra.mrb[18].mxu0 %vm230_vm1, %v6584_v36  ;;  %6594 = vmatmul.mubr.msk.f32.vlgmr.msra.gmra.mrb[18].mxu1 %vm230_vm1, %v6584_v36  ;;  %v4507_v17 = vpop.permute.xlu0 %4506 }
  0xfe   : > { %6722 = vmatpush3.msra.mxu1 %v7205_v44  ;;  %4128 = vmatpush1.msra.mxu0 %v4106_v45  ;;  %v4108_v44 = vsel %vm4105_vm7, %v7396_v43, %v7424_v58  ;;  %v7565_v34 = vsel %vm4512_vm8, %v4507_v17, %v4509_v14 }
  0xff   : > { %4198 = vmatprep.subr.mxu1 %v4109_v46  ;;  %4269 = vmatprep.subr.mxu0 %v4111_v47 }
 0x100   : > { %6723 = vmatprep.mubr.msk.f32.mxu1 %vm6965_vm2, %v6955_v0  ;;  %4191 = vmatprep.mubr.f32.mxu0 %v6955_v0  ;;  %v4503_v28 = vpop.permute.xlu1 %4502 }
 0x101   : > { %6724 = vmatmul.mubr.msk.f32.vlgmr.msra.gmra.mrb[20].mxu1 %vm230_vm1, %v6584_v36  ;;  %6597 = vmatmul.mubr.msk.f32.vlgmr.msra.gmra.mrb[16].mxu0 %vm230_vm1, %v6596_v50  ;;  %v4505_v31 = vpop.permute.xlu0 %4504  ;;  %v7581_v21 = vsel %vm4512_vm8, %v7484_v7, %v4503_v28 }
 0x102   : > { %4199 = vmatpush1.msra.mxu1 %v4108_v44  ;;  %4270 = vmatpush1.msra.mxu0 %v4110_v13  ;;  %v7562_v33 = vsel %vm4512_vm8, %v4503_v28, %v4505_v31  ;;  %v7573_v18 = vsel %vm4512_vm8, %v4505_v31, %v4507_v17 }
 0x103   : > { %4340 = vmatprep.subr.mxu1 %v4113_v15  ;;  %4262 = vmatprep.mubr.f32.mxu1 %v6955_v0 }
 0x104   : > { %4333 = vmatprep.mubr.f32.mxu0 %v6955_v0  ;;  %6726 = vmatprep.subr.mxu0 %v6955_v0  ;;  %v7614_v27 = vpop.permute.xlu1 %6031 }
 0x105   : > { %6598 = vmatmul.mubr.msk.f32.vlgmr.msra.gmra.mrb[16].mxu1 %vm230_vm1, %v6596_v50  ;;  %6599 = vmatmul.mubr.msk.f32.vlgmr.msra.gmra.mrb[18].mxu0 %vm230_vm1, %v6596_v50  ;;  %v4511_v22 = vpop.permute.xlu0 %4510 }
 0x106   : > { %4341 = vmatpush1.msra.mxu1 %v4112_v20  ;;  %6727 = vmatpush3.msra.mxu0 %v4114_v10  ;;  %v7592_v25 = vsel %vm4512_vm8, %v4509_v14, %v4511_v22 }
 0x107   : > { %4534 = vmatprep.subr.mxu0 %v7533_v19  ;;  %4605 = vmatprep.subr.mxu1 %v7545_v23 }
 0x108   : > { %4404 = vmatprep.mubr.f32.mxu1 %v6955_v0  ;;  %6728 = vmatprep.mubr.msk.f32.mxu0 %vm6965_vm2, %v6955_v0 }
 0x109   : > { %6600 = vmatmul.mubr.msk.f32.vlgmr.msra.gmra.mrb[18].mxu1 %vm230_vm1, %v6596_v50  ;;  %6729 = vmatmul.mubr.msk.f32.vlgmr.msra.gmra.mrb[22].mxu0 %vm230_vm1, %v6596_v50 }
 0x10a   : > { %4535 = vmatpush1.msra.mxu0 %v7548_v24  ;;  %4606 = vmatpush1.msra.mxu1 %v7557_v32 }
 0x10b   : > { %4598 = vmatprep.mubr.f32.mxu0 %v6955_v0  ;;  %4669 = vmatprep.mubr.f32.mxu1 %v6955_v0 }
 0x10c   : > { %4676 = vmatprep.subr.mxu0 %v7562_v33  ;;  %4747 = vmatprep.subr.mxu1 %v7565_v34 }
 0x10d   : > { %6603 = vmatmul.mubr.msk.f32.vlgmr.msra.gmra.mrb[16].mxu0 %vm230_vm1, %v6602_v16  ;;  %6604 = vmatmul.mubr.msk.f32.vlgmr.msra.gmra.mrb[16].mxu1 %vm230_vm1, %v6602_v16 }
 0x10e   : > { %4677 = vmatpush1.msra.mxu0 %v7581_v21  ;;  %4748 = vmatpush1.msra.mxu1 %v7573_v18 }
 0x10f   : > { %4944 = vmatprep.subr.mxu0 %v7374_v30  ;;  %4740 = vmatprep.mubr.f32.mxu0 %v6955_v0  ;;  %v6030_v30 = vpop.permute.xlu1 %6029 }
 0x110   : > { %4811 = vmatprep.mubr.f32.mxu1 %v6955_v0  ;;  %6731 = vmatprep.subr.mxu1 %v6955_v0 }
 0x111   : > { %6605 = vmatmul.mubr.msk.f32.vlgmr.msra.gmra.mrb[18].mxu0 %vm230_vm1, %v6602_v16  ;;  %6606 = vmatmul.mubr.msk.f32.vlgmr.msra.gmra.mrb[18].mxu1 %vm230_vm1, %v6602_v16 }
 0x112   : > { %6732 = vmatpush3.msra.mxu1 %v7592_v25  ;;  %4945 = vmatpush1.msra.mxu0 %v7387_v39  ;;  %v6048_v39 = vsel %vm6045_vm9, %v6030_v30, %v7614_v27 }
 0x113   : > { %5015 = vmatprep.subr.mxu1 %v7384_v38  ;;  %5086 = vmatprep.subr.mxu0 %v7404_v49 }
 0x114   : > { %6733 = vmatprep.mubr.msk.f32.mxu1 %vm6965_vm2, %v6955_v0  ;;  %5008 = vmatprep.mubr.f32.mxu0 %v6955_v0 }
 0x115   : > { %6734 = vmatmul.mubr.msk.f32.vlgmr.msra.gmra.mrb[22].mxu1 %vm230_vm1, %v6602_v16  ;;  %6615 = vmatmul.mubr.msk.f32.vlgmr.msra.gmra.mrb[24].mxu0 %vm230_vm1, %v6614_v29 }
 0x116   : > { %5016 = vmatpush1.msra.mxu1 %v7399_v48  ;;  %5087 = vmatpush1.msra.mxu0 %v7428_v61  ;;  %v6631_v48 = vld [vmem:[%s7771_s1 + $0x3c] sm:$0x7] }
 0x117   : > { %5157 = vmatprep.subr.mxu1 %v7408_v52  ;;  %5079 = vmatprep.mubr.f32.mxu1 %v6955_v0 }
 0x118   : > { %5150 = vmatprep.mubr.f32.mxu0 %v6955_v0  ;;  %6736 = vmatprep.subr.mxu0 %v6955_v0 }
 0x119   : > { %6616 = vmatmul.mubr.msk.f32.vlgmr.msra.gmra.mrb[24].mxu1 %vm230_vm1, %v6614_v29  ;;  %6617 = vmatmul.mubr.msk.f32.vlgmr.msra.gmra.mrb[26].mxu0 %vm230_vm1, %v6614_v29 }
 0x11a   : > { %5158 = vmatpush1.msra.mxu1 %v7416_v56  ;;  %6737 = vmatpush3.msra.mxu0 %v7363_v26 }
 0x11b   : > { %5301 = vmatprep.subr.mxu0 %v7249_v55  ;;  %5372 = vmatprep.subr.mxu1 %v7233_v51  ;;  %v6613_v55 = vld [vmem:[%s7771_s1 + $0x30] sm:$0x7]  ;;  %v6026_v51 = vpop.permute.xlu1 %6025 }
 0x11c   : > { %5221 = vmatprep.mubr.f32.mxu1 %v6955_v0  ;;  %6738 = vmatprep.mubr.msk.f32.mxu0 %vm6965_vm2, %v6955_v0 }
 0x11d   : > { %6618 = vmatmul.mubr.msk.f32.vlgmr.msra.gmra.mrb[26].mxu1 %vm230_vm1, %v6614_v29  ;;  %6739 = vmatmul.mubr.msk.f32.vlgmr.msra.gmra.mrb[28].mxu0 %vm230_vm1, %v6614_v29 }
 0x11e   : > { %5302 = vmatpush1.msra.mxu0 %v7263_v59  ;;  %5373 = vmatpush1.msra.mxu1 %v7244_v54  ;;  %v6034_v26 = vpop.permute.xlu0 %6033  ;;  %v6625_v59 = vld [vmem:[%s7771_s1 + $0x38] sm:$0x7] }
 0x11f   : > { %5443 = vmatprep.subr.mxu0 %v7294_v5  ;;  %5514 = vmatprep.subr.mxu1 %v7280_v63 }
 0x120   : > { %5365 = vmatprep.mubr.f32.mxu0 %v6955_v0  ;;  %5436 = vmatprep.mubr.f32.mxu1 %v6955_v0 }
 0x121   : > { %6620 = vmatmul.mubr.msk.f32.vlgmr.msra.gmra.mrb[24].mxu0 %vm230_vm1, %v6613_v55  ;;  %6621 = vmatmul.mubr.msk.f32.vlgmr.msra.gmra.mrb[24].mxu1 %vm230_vm1, %v6613_v55 }
 0x122   : > { %5444 = vmatpush1.msra.mxu0 %v7291_v4  ;;  %5515 = vmatpush1.msra.mxu1 %v7276_v62  ;;  %v6028_v54 = vpop.permute.xlu0 %6027  ;;  %v6049_v4 = vsel %vm6045_vm9, %v7614_v27, %v6034_v26 }
 0x123   : > { %5660 = vmatprep.subr.mxu0 %v7533_v19  ;;  %5507 = vmatprep.mubr.f32.mxu0 %v6955_v0  ;;  %v6047_v63 = vsel %vm6045_vm9, %v6028_v54, %v6030_v30  ;;  %v6046_v5 = vsel %vm6045_vm9, %v6026_v51, %v6028_v54 }
 0x124   : > { %5578 = vmatprep.mubr.f32.mxu1 %v6955_v0  ;;  %6741 = vmatprep.subr.mxu1 %v6955_v0 }
 0x125   : > { %6622 = vmatmul.mubr.msk.f32.vlgmr.msra.gmra.mrb[26].mxu0 %vm230_vm1, %v6613_v55  ;;  %6623 = vmatmul.mubr.msk.f32.vlgmr.msra.gmra.mrb[26].mxu1 %vm230_vm1, %v6613_v55 }
 0x126   : > { %6742 = vmatpush3.msra.mxu1 %v7269_v60  ;;  %5661 = vmatpush1.msra.mxu0 %v7548_v24  ;;  %v6042_v60 = vpop.permute.xlu1 %6041  ;;  %v6040_v62 = vpop.permute.xlu0 %6039 }
 0x127   : > { %5731 = vmatprep.subr.mxu1 %v7545_v23  ;;  %5802 = vmatprep.subr.mxu0 %v7562_v33  ;;  %v6053_v43 = vsel %vm6045_vm9, %v6040_v62, %v6042_v60 }
 0x128   : > { %6743 = vmatprep.mubr.msk.f32.mxu1 %vm6965_vm2, %v6955_v0  ;;  %5724 = vmatprep.mubr.f32.mxu0 %v6955_v0 }
 0x129   : > { %6744 = vmatmul.mubr.msk.f32.vlgmr.msra.gmra.mrb[28].mxu1 %vm230_vm1, %v6613_v55  ;;  %6626 = vmatmul.mubr.msk.f32.vlgmr.msra.gmra.mrb[24].mxu0 %vm230_vm1, %v6625_v59 }
 0x12a   : > { %5732 = vmatpush1.msra.mxu1 %v7557_v32  ;;  %5803 = vmatpush1.msra.mxu0 %v7581_v21  ;;  %v6036_v35 = vpop.permute.xlu1 %6035 }
 0x12b   : > { %5873 = vmatprep.subr.mxu1 %v7565_v34  ;;  %5795 = vmatprep.mubr.f32.mxu1 %v6955_v0  ;;  %v6050_v52 = vsel %vm6045_vm9, %v6034_v26, %v6036_v35 }
 0x12c   : > { %5866 = vmatprep.mubr.f32.mxu0 %v6955_v0  ;;  %6746 = vmatprep.subr.mxu0 %v6955_v0  ;;  %v6038_v38 = vpop.permute.xlu0 %6037 }
 0x12d   : > { %6627 = vmatmul.mubr.msk.f32.vlgmr.msra.gmra.mrb[24].mxu1 %vm230_vm1, %v6625_v59  ;;  %6628 = vmatmul.mubr.msk.f32.vlgmr.msra.gmra.mrb[26].mxu0 %vm230_vm1, %v6625_v59  ;;  %v6051_v42 = vsel %vm6045_vm9, %v6036_v35, %v6038_v38  ;;  %v6052_v49 = vsel %vm6045_vm9, %v6038_v38, %v6040_v62 }
 0x12e   : > { %5874 = vmatpush1.msra.mxu1 %v7573_v18  ;;  %6747 = vmatpush3.msra.mxu0 %v7592_v25 }
 0x12f   : > { %6067 = vmatprep.subr.mxu0 %v6047_v63  ;;  %6138 = vmatprep.subr.mxu1 %v6049_v4 }
 0x130   : > { %5937 = vmatprep.mubr.f32.mxu1 %v6955_v0  ;;  %6748 = vmatprep.mubr.msk.f32.mxu0 %vm6965_vm2, %v6955_v0  ;;  %v6044_v53 = vpop.permute.xlu0 %6043 }
 0x131   : > { %6629 = vmatmul.mubr.msk.f32.vlgmr.msra.gmra.mrb[26].mxu1 %vm230_vm1, %v6625_v59  ;;  %6749 = vmatmul.mubr.msk.f32.vlgmr.msra.gmra.mrb[30].mxu0 %vm230_vm1, %v6625_v59  ;;  %v6054_v56 = vsel %vm6045_vm9, %v6042_v60, %v6044_v53 }
 0x132   : > { %6068 = vmatpush1.msra.mxu0 %v6046_v5  ;;  %6139 = vmatpush1.msra.mxu1 %v6048_v39 }
 0x133   : > { %6131 = vmatprep.mubr.f32.mxu0 %v6955_v0  ;;  %6202 = vmatprep.mubr.f32.mxu1 %v6955_v0 }
 0x134   : > { %6209 = vmatprep.subr.mxu0 %v6051_v42  ;;  %6280 = vmatprep.subr.mxu1 %v6053_v43 }
 0x135   : > { %6632 = vmatmul.mubr.msk.f32.vlgmr.msra.gmra.mrb[24].mxu0 %vm230_vm1, %v6631_v48  ;;  %6633 = vmatmul.mubr.msk.f32.vlgmr.msra.gmra.mrb[24].mxu1 %vm230_vm1, %v6631_v48 }
 0x136   : > { %6210 = vmatpush1.msra.mxu0 %v6050_v52  ;;  %6281 = vmatpush1.msra.mxu1 %v6052_v49 }
 0x137   : > { %6273 = vmatprep.mubr.f32.mxu0 %v6955_v0  ;;  %6344 = vmatprep.mubr.f32.mxu1 %v6955_v0 }
 0x138   : > { %6751 = vmatprep.subr.mxu1 %v6955_v0 }
 0x139   : > { %6634 = vmatmul.mubr.msk.f32.vlgmr.msra.gmra.mrb[26].mxu0 %vm230_vm1, %v6631_v48  ;;  %6635 = vmatmul.mubr.msk.f32.vlgmr.msra.gmra.mrb[26].mxu1 %vm230_vm1, %v6631_v48 }
 0x13a   : > { %6752 = vmatpush3.msra.mxu1 %v6054_v56  ;;  %6753 = vmatprep.mubr.msk.f32.mxu1 %vm6965_vm2, %v6955_v0  ;;  %v7699_v9 = vpop.permute.xlu1 %1755 }
 0x13d   : > { %6754 = vmatmul.mubr.msk.f32.vlgmr.msra.gmra.mrb[30].mxu1 %vm230_vm1, %v6631_v48 }
 0x16b   : > { %v584_v57 = vpop.f32.mrb[4].mxu0 }
 0x16c   : > { %v6680_v58 = vpop.f32.mrb[5].mxu0 }
 0x178   : > { %v941_v61 = vpop.f32.mrb[4].mxu1 }
 0x179   : > { %v942_v1 = vadd.f32 %v941_v61, %v584_v57  ;;  %v6685_v2 = vpop.f32.mrb[5].mxu1 }
 0x180   : > { %v1336_v3 = vpop.f32.mrb[6].mxu0 }
 0x181   : > { %v1348_v6 = vadd.f32 %v1336_v3, %v942_v1  ;;  %v6690_v8 = vpop.f32.mrb[7].mxu0 }
 0x184   : > { %v1527_v11 = vpop.f32.mrb[0].mxu1 }
 0x185   : > { %v1529_v12 = vpop.f32.mrb[1].mxu1  ;;  %v1760_v36 = vadd.f32 %v7699_v9, %v1527_v11 }
 0x186   : > { %v1761_v7 = vadd.f32 %v7699_v9, %v1529_v12  ;;  %v1456_v0 = vpop.f32.mrb[0].mxu0 }
 0x187   : > { %6875 = vtanh.f32 %v1760_v36  ;;  %v1758_v37 = vadd.f32 %v7699_v9, %v1456_v0  ;;  %v1458_v40 = vpop.f32.mrb[1].mxu0 }
 0x188   : > { %6877 = vtanh.f32 %v1761_v7  ;;  %v1759_v41 = vadd.f32 %v7699_v9, %v1458_v40 }
 0x189   : > { %6879 = vtanh.f32 %v1758_v37 }
 0x18a   : > { %6881 = vtanh.f32 %v1759_v41 }
 0x18b   : > { %v1669_v45 = vpop.f32.mrb[2].mxu1 }
 0x18c   : > { %v1764_v46 = vadd.f32 %v7699_v9, %v1669_v45  ;;  %v1671_v47 = vpop.f32.mrb[3].mxu1 }
 0x18d   : > { %v1765_v50 = vadd.f32 %v7699_v9, %v1671_v47 }
 0x18e   : > { %6883 = vtanh.f32 %v1764_v46 }
 0x18f   : > { %6885 = vtanh.f32 %v1765_v50  ;;  %v1598_v44 = vpop.f32.mrb[2].mxu0  ;;  %v1740_v13 = vpop.f32.mrb[6].mxu1 }
 0x190   : > { %v1762_v14 = vadd.f32 %v7699_v9, %v1598_v44  ;;  %v1752_v15 = vadd.f32 %v1740_v13, %v1348_v6  ;;  %v1600_v17 = vpop.f32.mrb[3].mxu0  ;;  %v6695_v19 = vpop.f32.mrb[7].mxu1 }
 0x191   : > { %v6876_v20 = vpop.eup %6875  ;;  %v1763_v10 = vadd.f32 %v7699_v9, %v1600_v17 }
 0x192   : > { %v6878_v23 = vpop.eup %6877  ;;  %6887 = vtanh.f32 %v1762_v14  ;;  %v1766_v24 = vadd.f32 %v7699_v9, %v1752_v15 }
 0x193   : > { %v6880_v28 = vpop.eup %6879  ;;  %v1785_v31 = vcombine.low %v6876_v20, %v6878_v23  ;;  %6889 = vtanh.f32 %v1763_v10 }
 0x194   : > { %v6882_v32 = vpop.eup %6881  ;;  %6891 = vtanh.f32 %v1766_v24 }
 0x195   : > { %1793 = vst [vmem:[%s7713_s11 + $0x8] sm:$0x77] %v1785_v31  ;;  %v1784_v33 = vcombine.low %v6880_v28, %v6882_v32 }
 0x197   : > { %1792 = vst [vmem:[%s7713_s11] sm:$0x77] %v1784_v33 }
 0x198   : > { %v6884_v34 = vpop.eup %6883 }
 0x199   : > { %v6886_v16 = vpop.eup %6885 }
 0x19a   : > { %v1787_v18 = vcombine.low %v6884_v34, %v6886_v16 }
 0x19c   : > { %v6888_v21 = vpop.eup %6887  ;;  %1795 = vst [vmem:[%s7713_s11 + $0x18] sm:$0x77] %v1787_v18 }
 0x19d   : > { %v6890_v22 = vpop.eup %6889 }
 0x19e   : > { %v6892_v25 = vpop.eup %6891  ;;  %v1786_v29 = vcombine.low %v6888_v21, %v6890_v22 }
 0x19f   : > { %1797 = vst.msk [vmem:[%s7713_s11 + $0x20] sm:$0x7] %vm1796_vm10, %v6892_v25  ;;  %v2191_v27 = vpop.f32.mrb[12].mxu0 }
 0x1a0   : > { %1794 = vst [vmem:[%s7713_s11 + $0x10] sm:$0x77] %v1786_v29  ;;  %v6700_v30 = vpop.f32.mrb[13].mxu0 }
 0x1ac   : > { %v2548_v55 = vpop.f32.mrb[12].mxu1 }
 0x1ad   : > { %v2549_v26 = vadd.f32 %v2548_v55, %v2191_v27  ;;  %v6705_v51 = vpop.f32.mrb[13].mxu1 }
 0x1b4   : > { %v2907_v54 = vpop.f32.mrb[14].mxu0 }
 0x1b5   : > { %v2919_v59 = vadd.f32 %v2907_v54, %v2549_v26  ;;  %v6710_v60 = vpop.f32.mrb[15].mxu0 }
 0x1b8   : > { %v3027_v62 = vpop.f32.mrb[8].mxu0  ;;  %v3098_v63 = vpop.f32.mrb[8].mxu1 }
 0x1b9   : > { %v3324_v4 = vadd.f32 %v3027_v62, %v7699_v9  ;;  %v3326_v5 = vadd.f32 %v3098_v63, %v7699_v9  ;;  %v3029_v35 = vpop.f32.mrb[9].mxu0  ;;  %v3100_v38 = vpop.f32.mrb[9].mxu1 }
 0x1ba   : > { %v3325_v39 = vadd.f32 %v3029_v35, %v7699_v9  ;;  %v3327_v42 = vadd.f32 %v3100_v38, %v7699_v9 }
 0x1bb   : > { %6893 = vtanh.f32 %v3324_v4 }
 0x1bc   : > { %6895 = vtanh.f32 %v3326_v5  ;;  %v3169_v43 = vpop.f32.mrb[10].mxu0  ;;  %v3240_v48 = vpop.f32.mrb[10].mxu1 }
 0x1bd   : > { %6897 = vtanh.f32 %v3325_v39  ;;  %v3328_v49 = vadd.f32 %v3169_v43, %v7699_v9  ;;  %v3330_v52 = vadd.f32 %v3240_v48, %v7699_v9  ;;  %v3171_v53 = vpop.f32.mrb[11].mxu0  ;;  %v3242_v56 = vpop.f32.mrb[11].mxu1 }
 0x1be   : > { %6899 = vtanh.f32 %v3327_v42  ;;  %v3329_v57 = vadd.f32 %v3171_v53, %v7699_v9  ;;  %v3331_v58 = vadd.f32 %v3242_v56, %v7699_v9 }
 0x1bf   : > { %6901 = vtanh.f32 %v3328_v49 }
 0x1c0   : > { %6903 = vtanh.f32 %v3330_v52  ;;  %v3311_v61 = vpop.f32.mrb[14].mxu1 }
 0x1c1   : > { %6905 = vtanh.f32 %v3329_v57  ;;  %v3323_v1 = vadd.f32 %v3311_v61, %v2919_v59  ;;  %v6715_v2 = vpop.f32.mrb[15].mxu1 }
 0x1c2   : > { %6907 = vtanh.f32 %v3331_v58 }
 0x1c3   : > { %v3332_v3 = vadd.f32 %v3323_v1, %v7699_v9 }
 0x1c5   : > { %v6894_v6 = vpop.eup %6893  ;;  %6909 = vtanh.f32 %v3332_v3 }
 0x1c6   : > { %v6896_v8 = vpop.eup %6895 }
 0x1c7   : > { %v6898_v11 = vpop.eup %6897 }
 0x1c8   : > { %v6900_v12 = vpop.eup %6899  ;;  %v3350_v36 = vcombine.low %v6894_v6, %v6898_v11  ;;  %v3721_v7 = vpop.f32.mrb[20].mxu0 }
 0x1c9   : > { %v6902_v0 = vpop.eup %6901  ;;  %v3351_v37 = vcombine.low %v6896_v8, %v6900_v12  ;;  %v6720_v40 = vpop.f32.mrb[21].mxu0 }
 0x1ca   : > { %v6904_v41 = vpop.eup %6903  ;;  %6579 = vst [vmem:[%s7713_s11 + $0x24] sm:$0x77] %v3350_v36 }
 0x1cb   : > { %v6906_v45 = vpop.eup %6905  ;;  %6580 = vst [vmem:[%s7713_s11 + $0x2c] sm:$0x77] %v3351_v37 }
 0x1cc   : > { %v6908_v46 = vpop.eup %6907  ;;  %v3352_v47 = vcombine.low %v6902_v0, %v6906_v45 }
 0x1cd   : > { %v3353_v50 = vcombine.low %v6904_v41, %v6908_v46 }
 0x1ce   : > { %6581 = vst [vmem:[%s7713_s11 + $0x34] sm:$0x77] %v3352_v47 }
 0x1cf   : > { %v6910_v44 = vpop.eup %6909  ;;  %6582 = vst [vmem:[%s7713_s11 + $0x3c] sm:$0x77] %v3353_v50 }
 0x1d0   : > { %6583 = vst.msk [vmem:[%s7713_s11 + $0x44] sm:$0x7] %vm1796_vm10, %v6910_v44 }
 0x1d4   : > { %v4078_v13 = vpop.f32.mrb[20].mxu1 }
 0x1d5   : > { %v4079_v14 = vadd.f32 %v4078_v13, %v3721_v7  ;;  %v6725_v15 = vpop.f32.mrb[21].mxu1 }
 0x1dc   : > { %v4477_v17 = vpop.f32.mrb[22].mxu0 }
 0x1dd   : > { %v4489_v19 = vadd.f32 %v4477_v17, %v4079_v14  ;;  %v6730_v20 = vpop.f32.mrb[23].mxu0 }
 0x1e0   : > { %v4600_v10 = vpop.f32.mrb[16].mxu0  ;;  %v4671_v23 = vpop.f32.mrb[16].mxu1 }
 0x1e1   : > { %v4897_v24 = vadd.f32 %v4600_v10, %v7699_v9  ;;  %v4899_v28 = vadd.f32 %v4671_v23, %v7699_v9  ;;  %v4602_v31 = vpop.f32.mrb[17].mxu0  ;;  %v4673_v32 = vpop.f32.mrb[17].mxu1 }
 0x1e2   : > { %v4898_v33 = vadd.f32 %v4602_v31, %v7699_v9  ;;  %v4900_v34 = vadd.f32 %v4673_v32, %v7699_v9 }
 0x1e3   : > { %6911 = vtanh.f32 %v4897_v24 }
 0x1e4   : > { %6913 = vtanh.f32 %v4899_v28  ;;  %v4742_v16 = vpop.f32.mrb[18].mxu0  ;;  %v4813_v18 = vpop.f32.mrb[18].mxu1 }
 0x1e5   : > { %6915 = vtanh.f32 %v4898_v33  ;;  %v4901_v21 = vadd.f32 %v4742_v16, %v7699_v9  ;;  %v4903_v22 = vadd.f32 %v4813_v18, %v7699_v9  ;;  %v4744_v25 = vpop.f32.mrb[19].mxu0  ;;  %v4815_v29 = vpop.f32.mrb[19].mxu1 }
 0x1e6   : > { %6917 = vtanh.f32 %v4900_v34  ;;  %v4902_v27 = vadd.f32 %v4744_v25, %v7699_v9  ;;  %v4904_v30 = vadd.f32 %v4815_v29, %v7699_v9 }
 0x1e7   : > { %6919 = vtanh.f32 %v4901_v21 }
 0x1e8   : > { %6921 = vtanh.f32 %v4903_v22  ;;  %v4884_v55 = vpop.f32.mrb[22].mxu1 }
 0x1e9   : > { %6923 = vtanh.f32 %v4902_v27  ;;  %v4896_v26 = vadd.f32 %v4884_v55, %v4489_v19  ;;  %v6735_v51 = vpop.f32.mrb[23].mxu1 }
 0x1ea   : > { %6925 = vtanh.f32 %v4904_v30 }
 0x1eb   : > { %v4905_v54 = vadd.f32 %v4896_v26, %v7699_v9 }
 0x1ed   : > { %v6912_v59 = vpop.eup %6911  ;;  %6927 = vtanh.f32 %v4905_v54 }
 0x1ee   : > { %v6914_v60 = vpop.eup %6913 }
 0x1ef   : > { %v6916_v62 = vpop.eup %6915 }
 0x1f0   : > { %v6918_v63 = vpop.eup %6917  ;;  %v4923_v4 = vcombine.low %v6912_v59, %v6916_v62  ;;  %v5294_v5 = vpop.f32.mrb[28].mxu0 }
 0x1f1   : > { %v6920_v35 = vpop.eup %6919  ;;  %v4924_v38 = vcombine.low %v6914_v60, %v6918_v63  ;;  %v6740_v39 = vpop.f32.mrb[29].mxu0 }
 0x1f2   : > { %v6922_v42 = vpop.eup %6921  ;;  %6608 = vst [vmem:[%s7713_s11 + $0x48] sm:$0x77] %v4923_v4 }
 0x1f3   : > { %v6924_v43 = vpop.eup %6923  ;;  %6609 = vst [vmem:[%s7713_s11 + $0x50] sm:$0x77] %v4924_v38 }
 0x1f4   : > { %v6926_v48 = vpop.eup %6925  ;;  %v4925_v49 = vcombine.low %v6920_v35, %v6924_v43 }
 0x1f5   : > { %v4926_v52 = vcombine.low %v6922_v42, %v6926_v48 }
 0x1f6   : > { %6610 = vst [vmem:[%s7713_s11 + $0x58] sm:$0x77] %v4925_v49 }
 0x1f7   : > { %v6928_v53 = vpop.eup %6927  ;;  %6611 = vst [vmem:[%s7713_s11 + $0x60] sm:$0x77] %v4926_v52 }
 0x1f8   : > { %6612 = vst.msk [vmem:[%s7713_s11 + $0x68] sm:$0x7] %vm1796_vm10, %v6928_v53 }
 0x1fc   : > { %v5651_v56 = vpop.f32.mrb[28].mxu1 }
 0x1fd   : > { %v5652_v57 = vadd.f32 %v5651_v56, %v5294_v5  ;;  %v6745_v58 = vpop.f32.mrb[29].mxu1 }
 0x204   : > { %v6010_v61 = vpop.f32.mrb[30].mxu0 }
 0x205   : > { %v6022_v1 = vadd.f32 %v6010_v61, %v5652_v57  ;;  %v6750_v2 = vpop.f32.mrb[31].mxu0 }
 0x208   : > { %v6133_v3 = vpop.f32.mrb[24].mxu0  ;;  %v6204_v6 = vpop.f32.mrb[24].mxu1 }
 0x209   : > { %v6430_v8 = vadd.f32 %v6133_v3, %v7699_v9  ;;  %v6432_v11 = vadd.f32 %v6204_v6, %v7699_v9  ;;  %v6135_v12 = vpop.f32.mrb[25].mxu0  ;;  %v6206_v36 = vpop.f32.mrb[25].mxu1 }
 0x20a   : > { %v6431_v7 = vadd.f32 %v6135_v12, %v7699_v9  ;;  %v6433_v0 = vadd.f32 %v6206_v36, %v7699_v9 }
 0x20b   : > { %6929 = vtanh.f32 %v6430_v8 }
 0x20c   : > { %6931 = vtanh.f32 %v6432_v11  ;;  %v6275_v37 = vpop.f32.mrb[26].mxu0  ;;  %v6346_v40 = vpop.f32.mrb[26].mxu1 }
 0x20d   : > { %6933 = vtanh.f32 %v6431_v7  ;;  %v6434_v41 = vadd.f32 %v6275_v37, %v7699_v9  ;;  %v6436_v45 = vadd.f32 %v6346_v40, %v7699_v9  ;;  %v6277_v46 = vpop.f32.mrb[27].mxu0  ;;  %v6348_v47 = vpop.f32.mrb[27].mxu1 }
 0x20e   : > { %6935 = vtanh.f32 %v6433_v0  ;;  %v6435_v50 = vadd.f32 %v6277_v46, %v7699_v9  ;;  %v6437_v44 = vadd.f32 %v6348_v47, %v7699_v9 }
 0x20f   : > { %6937 = vtanh.f32 %v6434_v41 }
 0x210   : > { %6939 = vtanh.f32 %v6436_v45  ;;  %v6417_v13 = vpop.f32.mrb[30].mxu1 }
 0x211   : > { %6941 = vtanh.f32 %v6435_v50  ;;  %v6429_v14 = vadd.f32 %v6417_v13, %v6022_v1  ;;  %v6755_v15 = vpop.f32.mrb[31].mxu1 }
 0x212   : > { %6943 = vtanh.f32 %v6437_v44 }
 0x213   : > { %v6438_v17 = vadd.f32 %v6429_v14, %v7699_v9 }
 0x215   : > { %v6930_v19 = vpop.eup %6929  ;;  %6945 = vtanh.f32 %v6438_v17 }
 0x216   : > { %v6932_v20 = vpop.eup %6931 }
 0x217   : > { %v6934_v10 = vpop.eup %6933 }
 0x218   : > { %v6936_v23 = vpop.eup %6935  ;;  %v6456_v24 = vcombine.low %v6930_v19, %v6934_v10 }
 0x219   : > { %v6938_v28 = vpop.eup %6937  ;;  %v6457_v31 = vcombine.low %v6932_v20, %v6936_v23 }
 0x21a   : > { %v6940_v32 = vpop.eup %6939  ;;  %6637 = vst [vmem:[%s7713_s11 + $0x6c] sm:$0x77] %v6456_v24 }
 0x21b   : > { %v6942_v33 = vpop.eup %6941  ;;  %6638 = vst [vmem:[%s7713_s11 + $0x74] sm:$0x77] %v6457_v31 }
 0x21c   : > { %v6944_v34 = vpop.eup %6943  ;;  %v6458_v16 = vcombine.low %v6938_v28, %v6942_v33 }
 0x21d   : > { %v6459_v18 = vcombine.low %v6940_v32, %v6944_v34 }
 0x21e   : > { %6639 = vst [vmem:[%s7713_s11 + $0x7c] sm:$0x77] %v6458_v16 }
 0x21f   : > { %v6946_v9 = vpop.eup %6945  ;;  %6640 = vst [vmem:[%s7713_s11 + $0x84] sm:$0x77] %v6459_v18 }
 0x220   : > { %6641 = vst.msk [vmem:[%s7713_s11 + $0x8c] sm:$0x7] %vm1796_vm10, %v6946_v9 }
 0x221 PF: > { %s13_s12 = sadd.s32 1, %s6953_s12  }
 0x222   : > { %p10_p4 = scmp.ge.s32.totalorder %s13_s12, 4  }
 0x224   :  { %12 = sbr.rel (!%p10_p4) target bundleno = 1 (0x1), region = 80 }

</bundles_post_ra>
